<compile_context>
chip_gen: v7x
topology: tpu7x:2x2x1
jax: 0.10.0
libtpu: 0.0.40
codegen_flags: <defaults>
</compile_context>

<pallas_src>
import functools
import math

import jax
import jax.numpy as jnp
from jax.experimental import pallas as pl
from jax.experimental.pallas import tpu as pltpu


# ------------------------------ in-kernel helpers ------------------------------

def _layer_norm_f32(x, g, b):
    # LayerNorm over the last dim, eps = 1e-5 (PyTorch default), f32 statistics.
    mean = jnp.mean(x, axis=-1, keepdims=True)
    xc = x - mean
    var = jnp.mean(xc * xc, axis=-1, keepdims=True)
    return xc * jax.lax.rsqrt(var + 1e-5) * g + b


# Abramowitz & Stegun 7.1.26 rational erf approximation (|err| < 1.5e-7),
# built only from exp / mul / add / where (guaranteed Mosaic lowering; keeps
# the exact-erf GELU semantics of nn.GELU to float precision).
_ERF_P = 0.3275911
_ERF_A1 = 0.254829592
_ERF_A2 = -0.284496736
_ERF_A3 = 1.421413741
_ERF_A4 = -1.453152027
_ERF_A5 = 1.061405429


def _erf_f32(x):
    ax = jnp.abs(x)
    t = 1.0 / (1.0 + _ERF_P * ax)
    poly = ((((_ERF_A5 * t + _ERF_A4) * t + _ERF_A3) * t + _ERF_A2) * t + _ERF_A1) * t
    y = 1.0 - poly * jnp.exp(-ax * ax)
    return jnp.where(x >= 0.0, y, -y)


def _gelu_f32(x):
    return 0.5 * x * (1.0 + _erf_f32(x * (1.0 / math.sqrt(2.0))))


def _regroup_rows(x, src_ref, dst_ref, outer, inner):
    # Rows of x are ordered (outer, inner) -> reorder to (inner, outer).
    # Row o*inner + i  ->  row i*outer + o, done with strided VMEM reads
    # through a scratch buffer (ref[pl.ds(start, size, stride)]).
    src_ref[...] = x
    for i in range(inner):
        dst_ref[pl.ds(i * outer, outer), :] = src_ref[pl.ds(i, outer, stride=inner), :]
    return dst_ref[...]


def _grouped_attention(xn, wqkv_ref, wp_ref, bp_ref, *, G, L, H, Dh, bias=None):
    # xn: (G*L, D) f32, rows grouped by G (outer) / L (inner).
    # Multi-head attention computed per group: scores are (G, L, L) per head,
    # never a dense token x token matrix.  1/sqrt(Dh) is folded into wqkv's Q
    # columns at init.  Returns (G*L, D) f32 (projection output + bias).
    D = H * Dh
    xb = xn.astype(jnp.bfloat16)
    # Single wide QKV matmul: (G*L, D) x (D, 3D) -> 3*D output lanes on the MXU.
    qkv = jnp.dot(xb, wqkv_ref[...], preferred_element_type=jnp.float32)

    acc = jnp.zeros((G * L, D), jnp.float32)
    for h in range(H):                       # H is small; static unroll is fine here.
        q = qkv[:, h * Dh:(h + 1) * Dh].reshape(G, L, Dh).astype(jnp.bfloat16)
        k = qkv[:, D + h * Dh:D + (h + 1) * Dh].reshape(G, L, Dh).astype(jnp.bfloat16)
        v = qkv[:, 2 * D + h * Dh:2 * D + (h + 1) * Dh].reshape(G, L, Dh).astype(jnp.bfloat16)

        s = jnp.einsum('gqd,gkd->gqk', q, k,
                       preferred_element_type=jnp.float32)          # (G, L, L) f32
        if bias is not None:
            s = s + bias                                             # (G, 1, L) additive mask
        s = s - jnp.max(s, axis=-1, keepdims=True)
        p = jnp.exp(s)
        p = p * pl.reciprocal(jnp.sum(p, axis=-1, keepdims=True), approx=True)
        o = jnp.einsum('gqk,gkd->gqd', p.astype(jnp.bfloat16), v,
                       preferred_element_type=jnp.float32)           # (G, L, Dh)
        # Fold this head's output-projection slice straight into the accumulator.
        acc = acc + jnp.dot(o.reshape(G * L, Dh).astype(jnp.bfloat16), wp_ref[h],
                            preferred_element_type=jnp.float32)      # (G*L, D)
    return acc + bp_ref[...]


# ------------------------------ Pallas kernels ------------------------------

def _encoder_block_kernel(x_ref, sbias_ref,
                          tln_g, tln_b, t_wqkv, t_wp, t_bp, t_wfc, t_bfc,
                          sln_g, sln_b, s_wqkv, s_wp, s_bp,
                          mln_g, mln_b, w1, b1, w2, b2,
                          o_ref, tmp_a, tmp_b, *, N, T, H, Dh):
    # One grid step = one batch element.  Rows of x are in the canonical
    # 'b (n t)' order: row = n*T + t.
    x = x_ref[0]                                           # (N*T, D) f32 residual

    # ---- temporal attention over frames within each (batch, patch) group ----
    xn = _layer_norm_f32(x, tln_g[...], tln_b[...])
    res_t = _grouped_attention(xn, t_wqkv, t_wp, t_bp, G=N, L=T, H=H, Dh=Dh)
    res_t = jnp.dot(res_t.astype(jnp.bfloat16), t_wfc[...],
                    preferred_element_type=jnp.float32) + t_bfc[...]    # temporal_fc
    xt = x + res_t                                         # (N*T, D), (n, t) row order

    # ---- regroup rows (n, t) -> (t, n): spatial groups become contiguous ----
    xs = _regroup_rows(xt, tmp_a, tmp_b, outer=N, inner=T)

    # ---- spatial attention over patches within each (batch, frame) group ----
    xsn = _layer_norm_f32(xs, sln_g[...], sln_b[...])
    res_s = _grouped_attention(xsn, s_wqkv, s_wp, s_bp, G=T, L=N, H=H, Dh=Dh,
                               bias=sbias_ref[0])          # (T, 1, N) key-padding bias
    xsp = xs + res_s                                       # (t, n) row order

    # ---- MLP (per-token; row order irrelevant) ----
    hn = _layer_norm_f32(xsp, mln_g[...], mln_b[...])
    h1 = jnp.dot(hn.astype(jnp.bfloat16), w1[...],
                 preferred_element_type=jnp.float32) + b1[...]
    h1 = _gelu_f32(h1)
    y = jnp.dot(h1.astype(jnp.bfloat16), w2[...],
                preferred_element_type=jnp.float32) + b2[...]
    out_t = xsp + y                                        # (t, n) row order

    # ---- regroup back to (n, t) and store ----
    o_ref[0] = _regroup_rows(out_t, tmp_a, tmp_b, outer=T, inner=N)


def _final_ln_kernel(x_ref, g_ref, b_ref, o_ref):
    o_ref[0] = _layer_norm_f32(x_ref[0], g_ref[...], b_ref[...])


# ------------------------------ kernel wrappers ------------------------------

def _resident_spec(arr):
    # Whole-array block whose index_map is constant across the grid, so the
    # weight stays resident in VMEM for every grid step.
    zeros = (0,) * arr.ndim
    return pl.BlockSpec(arr.shape, lambda b, _z=zeros: _z)


def encoder_block(h, sbias, p, *, N, T, num_heads):
    B, NT, D = h.shape
    Dh = D // num_heads
    kern = functools.partial(_encoder_block_kernel, N=N, T=T, H=num_heads, Dh=Dh)
    args = (h, sbias,
            p["tn1_g"], p["tn1_b"], p["t_wqkv"], p["t_wp"], p["t_bp"],
            p["t_wfc"], p["t_bfc"],
            p["n1_g"], p["n1_b"], p["s_wqkv"], p["s_wp"], p["s_bp"],
            p["n2_g"], p["n2_b"], p["fc1_w"], p["fc1_b"], p["fc2_w"], p["fc2_b"])
    in_specs = [pl.BlockSpec((1, NT, D), lambda b: (b, 0, 0)),
                pl.BlockSpec((1, T, 1, N), lambda b: (b, 0, 0, 0))]
    in_specs += [_resident_spec(a) for a in args[2:]]
    return pl.pallas_call(
        kern,
        out_shape=jax.ShapeDtypeStruct((B, NT, D), jnp.float32),
        grid=(B,),
        in_specs=in_specs,
        out_specs=pl.BlockSpec((1, NT, D), lambda b: (b, 0, 0)),
        scratch_shapes=[pltpu.VMEM((NT, D), jnp.float32),
                        pltpu.VMEM((NT, D), jnp.float32)],
        compiler_params=pltpu.CompilerParams(
            dimension_semantics=("parallel",),          # shards batches across v7x's 2 TCs
            vmem_limit_bytes=32 * 1024 * 1024),          # explicit: safe on v7x's 64 MiB VMEM
    )(*args)


def final_layer_norm(h, g, b):
    B, NT, D = h.shape
    return pl.pallas_call(
        _final_ln_kernel,
        out_shape=jax.ShapeDtypeStruct((B, NT, D), jnp.float32),
        grid=(B,),
        in_specs=[pl.BlockSpec((1, NT, D), lambda i: (i, 0, 0)),
                  _resident_spec(g), _resident_spec(b)],
        out_specs=pl.BlockSpec((1, NT, D), lambda i: (i, 0, 0)),
        compiler_params=pltpu.CompilerParams(dimension_semantics=("parallel",)),
    )(h, g, b)


# ------------------------------ model glue (JAX) ------------------------------

def sinusoid_pe(T, D):
    assert D % 2 == 0, "sinusoidal time embedding requires even embed_dim"
    pos = jnp.arange(T, dtype=jnp.float32)[:, None]
    div = jnp.exp(jnp.arange(0, D, 2, dtype=jnp.float32) * (-math.log(10000.0) / D))
    pe = jnp.zeros((T, D), jnp.float32)
    pe = pe.at[:, 0::2].set(jnp.sin(pos * div))
    pe = pe.at[:, 1::2].set(jnp.cos(pos * div))
    return pe


def encoder_forward(x, mask, params, num_heads):
    # x: (B, T, N, D); mask: (B, N, T) validity flags (1 = valid key patch).
    B, T, N, D = x.shape
    NT = N * T
    # pos_embed (per patch) + sinusoidal time embedding (per frame): per-token
    # adds, applied in the canonical (B, N, T, D) layout.
    xc = jnp.transpose(x, (0, 2, 1, 3))                         # (B, N, T, D)
    xc = xc + params["pos_embed"][0][None, :, None, :]
    xc = xc + params["time_pe"][None, None, :T, :]
    h = xc.reshape(B, NT, D)

    # Key-padding additive bias for the spatial attention only: (B, T, 1, N),
    # 0 for valid keys / -1e30 for padded patches (f32, so finite).
    mask_btn = jnp.transpose(mask, (0, 2, 1))                   # mask.transpose(1, 2)
    sbias = jnp.where(mask_btn > 0, 0.0, -1e30).astype(jnp.float32)
    sbias = sbias.reshape(B, T, 1, N)

    for p in params["blocks"]:
        h = encoder_block(h, sbias, p, N=N, T=T, num_heads=num_heads)

    h = final_layer_norm(h, params["norm_g"], params["norm_b"])
    return jnp.transpose(h.reshape(B, N, T, D), (0, 2, 1, 3))   # 'b (n t) m -> b t n m'


def init_params(key, depth, D, Hmlp, num_patches, max_T, num_heads):
    # Deterministic synthetic init (normal * 0.02; PyTorch uses trunc_normal_).
    # Matmul weights stored bf16 (MXU-native); LN params / biases stay f32.
    assert D % num_heads == 0
    Dh = D // num_heads
    scale = float(Dh) ** -0.5
    ks = jax.random.split(key, depth + 1)
    nrm = lambda k, s: 0.02 * jax.random.normal(k, s, jnp.float32)

    def qkv_weight(k):
        # Right-multiply QKV weight, columns = [Q | K | V], head-major within
        # each segment (matches the PyTorch reshape to (..., 3, H, Dh)).
        # The 1/sqrt(Dh) query scale is folded into the Q columns (perf).
        w = nrm(k, (D, 3 * D))
        w = w.at[:, :D].multiply(scale)
        return w.astype(jnp.bfloat16)

    def proj_weight(k):
        # (D, D) right-multiply output projection, rows head-major -> (H, Dh, D).
        return nrm(k, (D, D)).reshape(num_heads, Dh, D).astype(jnp.bfloat16)

    params = {
        "pos_embed": nrm(ks[0], (1, num_patches, D)),
        "time_pe": sinusoid_pe(max_T, D),
        "norm_g": jnp.ones((1, D), jnp.float32),
        "norm_b": jnp.zeros((1, D), jnp.float32),
        "blocks": [],
    }
    for i in range(depth):
        bk = jax.random.split(ks[1 + i], 7)
        params["blocks"].append(dict(
            tn1_g=jnp.ones((1, D), jnp.float32), tn1_b=jnp.zeros((1, D), jnp.float32),
            t_wqkv=qkv_weight(bk[0]),
            t_wp=proj_weight(bk[1]),
            t_bp=jnp.zeros((1, D), jnp.float32),
            t_wfc=nrm(bk[2], (D, D)).astype(jnp.bfloat16),
            t_bfc=jnp.zeros((1, D), jnp.float32),
            n1_g=jnp.ones((1, D), jnp.float32), n1_b=jnp.zeros((1, D), jnp.float32),
            s_wqkv=qkv_weight(bk[3]),
            s_wp=proj_weight(bk[4]),
            s_bp=jnp.zeros((1, D), jnp.float32),
            n2_g=jnp.ones((1, D), jnp.float32), n2_b=jnp.zeros((1, D), jnp.float32),
            fc1_w=nrm(bk[5], (D, Hmlp)).astype(jnp.bfloat16),
            fc1_b=jnp.zeros((1, Hmlp), jnp.float32),
            fc2_w=nrm(bk[6], (Hmlp, D)).astype(jnp.bfloat16),
            fc2_b=jnp.zeros((1, D), jnp.float32),
        ))
    return params


if __name__ == "__main__":
    # Small shapes: batch=2, frames T=4, patches N=5, embed_dim=64, heads=4, depth=2.
    B, T, N, D = 2, 4, 5, 64
    num_heads, depth = 4, 2
    mlp_hidden = D * 4

    key = jax.random.PRNGKey(0)
    kx, kp = jax.random.split(key)
    x = jax.random.normal(kx, (B, T, N, D), jnp.float32)
    # mask: (B, N, T) validity flags; last patch masked out everywhere.
    mask = jnp.ones((B, N, T), jnp.float32).at[:, N - 1, :].set(0.0)

    params = init_params(kp, depth, D, mlp_hidden, N, max_T=T, num_heads=num_heads)

    fwd = jax.jit(lambda xx, mm, pp: encoder_forward(xx, mm, pp, num_heads=num_heads))
    out = fwd(x, mask, params)
    out = jax.block_until_ready(out)

    assert out.shape == (B, T, N, D), out.shape
    assert bool(jnp.all(jnp.isfinite(out)))
    # TODO(synk): Dropout / DropPath are training-only stochastic ops; eval-mode identity here.
    print("KERNEL_OK")
</pallas_src>

<mosaic_0001>
module attributes {stable_mosaic.version = 11 : i64} {
  func.func @_final_ln_kernel(%arg0: i32, %arg1: memref<1x20x64xf32, #tpu.memory_space<vmem>>, %arg2: memref<1x64xf32, #tpu.memory_space<vmem>>, %arg3: memref<1x64xf32, #tpu.memory_space<vmem>>, %arg4: memref<1x20x64xf32, #tpu.memory_space<vmem>>) attributes {dimension_semantics = [#tpu.dimension_semantics<parallel>], iteration_bounds = array<i64: 2>, scalar_prefetch = 0 : i64, scratch_operands = 0 : i64, tpu.core_type = #tpu.core_type<tc>, window_params = [{transform_indices = @transform_0, window_bounds = array<i64: 1, 20, 64>}, {pipeline_mode = #tpu.pipeline_mode<synchronous>, transform_indices = @transform_1, window_bounds = array<i64: 1, 64>}, {pipeline_mode = #tpu.pipeline_mode<synchronous>, transform_indices = @transform_2, window_bounds = array<i64: 1, 64>}, {transform_indices = @transform_3, window_bounds = array<i64: 1, 20, 64>}]} {
    %c0 = arith.constant 0 : index
    %c0_0 = arith.constant 0 : index
    %c0_1 = arith.constant 0 : index
    %0 = vector.load %arg1[%c0, %c0_0, %c0_1] : memref<1x20x64xf32, #tpu.memory_space<vmem>>, vector<1x20x64xf32>
    %1 = vector.shape_cast %0 : vector<1x20x64xf32> to vector<20x64xf32>
    %c0_2 = arith.constant 0 : index
    %c0_3 = arith.constant 0 : index
    %2 = vector.load %arg2[%c0_2, %c0_3] : memref<1x64xf32, #tpu.memory_space<vmem>>, vector<1x64xf32>
    %c0_4 = arith.constant 0 : index
    %c0_5 = arith.constant 0 : index
    %3 = vector.load %arg3[%c0_4, %c0_5] : memref<1x64xf32, #tpu.memory_space<vmem>>, vector<1x64xf32>
    %cst = arith.constant dense<0.000000e+00> : vector<20xf32>
    %4 = vector.multi_reduction <add>, %1, %cst [1] : vector<20x64xf32> to vector<20xf32>
    %5 = vector.shape_cast %4 : vector<20xf32> to vector<20x1xf32>
    %cst_6 = arith.constant 6.400000e+01 : f32
    %6 = vector.broadcast %cst_6 : f32 to vector<20x1xf32>
    %7 = arith.divf %5, %6 : vector<20x1xf32>
    %8 = vector.broadcast %7 : vector<20x1xf32> to vector<20x64xf32>
    %9 = arith.subf %1, %8 : vector<20x64xf32>
    %10 = arith.mulf %9, %9 : vector<20x64xf32>
    %cst_7 = arith.constant dense<0.000000e+00> : vector<20xf32>
    %11 = vector.multi_reduction <add>, %10, %cst_7 [1] : vector<20x64xf32> to vector<20xf32>
    %12 = vector.shape_cast %11 : vector<20xf32> to vector<20x1xf32>
    %cst_8 = arith.constant 6.400000e+01 : f32
    %13 = vector.broadcast %cst_8 : f32 to vector<20x1xf32>
    %14 = arith.divf %12, %13 : vector<20x1xf32>
    %cst_9 = arith.constant 9.99999974E-6 : f32
    %15 = vector.broadcast %cst_9 : f32 to vector<20x1xf32>
    %16 = arith.addf %14, %15 : vector<20x1xf32>
    %17 = math.rsqrt %16 : vector<20x1xf32>
    %18 = vector.broadcast %17 : vector<20x1xf32> to vector<20x64xf32>
    %19 = arith.mulf %9, %18 : vector<20x64xf32>
    %20 = vector.broadcast %2 : vector<1x64xf32> to vector<20x64xf32>
    %21 = arith.mulf %19, %20 : vector<20x64xf32>
    %22 = vector.broadcast %3 : vector<1x64xf32> to vector<20x64xf32>
    %23 = arith.addf %21, %22 : vector<20x64xf32>
    %c0_10 = arith.constant 0 : index
    %c0_11 = arith.constant 0 : index
    %c0_12 = arith.constant 0 : index
    %24 = vector.load %arg4[%c0_10, %c0_11, %c0_12] : memref<1x20x64xf32, #tpu.memory_space<vmem>>, vector<1x20x64xf32>
    %25 = vector.shape_cast %24 : vector<1x20x64xf32> to vector<20x64xf32>
    %26 = vector.shape_cast %23 : vector<20x64xf32> to vector<1x20x64xf32>
    tpu.vector_store %arg4[%c0_10, %c0_11, %c0_12], %26 {strides = array<i32>} : memref<1x20x64xf32, #tpu.memory_space<vmem>>, vector<1x20x64xf32>,
    return
  }
  func.func @transform_0(%arg0: i32) -> (i32, i32, i32) {
    %c0_i32 = arith.constant 0 : i32
    %c0_i32_0 = arith.constant 0 : i32
    %c0_i32_1 = arith.constant 0 : i32
    return %arg0, %c0_i32, %c0_i32_0 : i32, i32, i32
  }
  func.func @transform_1(%arg0: i32) -> (i32, i32) {
    %c0_i32 = arith.constant 0 : i32
    %c0_i32_0 = arith.constant 0 : i32
    %c0_i32_1 = arith.constant 0 : i32
    return %c0_i32, %c0_i32_0 : i32, i32
  }
  func.func @transform_2(%arg0: i32) -> (i32, i32) {
    %c0_i32 = arith.constant 0 : i32
    %c0_i32_0 = arith.constant 0 : i32
    %c0_i32_1 = arith.constant 0 : i32
    return %c0_i32, %c0_i32_0 : i32, i32
  }
  func.func @transform_3(%arg0: i32) -> (i32, i32, i32) {
    %c0_i32 = arith.constant 0 : i32
    %c0_i32_0 = arith.constant 0 : i32
    %c0_i32_1 = arith.constant 0 : i32
    return %arg0, %c0_i32, %c0_i32_0 : i32, i32, i32
  }
}

module attributes {stable_mosaic.version = 11 : i64} {
  func.func @_encoder_block_kernel(%arg0: i32, %arg1: memref<1x20x64xf32, #tpu.memory_space<vmem>>, %arg2: memref<1x4x1x5xf32, #tpu.memory_space<vmem>>, %arg3: memref<1x64xf32, #tpu.memory_space<vmem>>, %arg4: memref<1x64xf32, #tpu.memory_space<vmem>>, %arg5: memref<64x192xbf16, #tpu.memory_space<vmem>>, %arg6: memref<4x16x64xbf16, #tpu.memory_space<vmem>>, %arg7: memref<1x64xf32, #tpu.memory_space<vmem>>, %arg8: memref<64x64xbf16, #tpu.memory_space<vmem>>, %arg9: memref<1x64xf32, #tpu.memory_space<vmem>>, %arg10: memref<1x64xf32, #tpu.memory_space<vmem>>, %arg11: memref<1x64xf32, #tpu.memory_space<vmem>>, %arg12: memref<64x192xbf16, #tpu.memory_space<vmem>>, %arg13: memref<4x16x64xbf16, #tpu.memory_space<vmem>>, %arg14: memref<1x64xf32, #tpu.memory_space<vmem>>, %arg15: memref<1x64xf32, #tpu.memory_space<vmem>>, %arg16: memref<1x64xf32, #tpu.memory_space<vmem>>, %arg17: memref<64x256xbf16, #tpu.memory_space<vmem>>, %arg18: memref<1x256xf32, #tpu.memory_space<vmem>>, %arg19: memref<256x64xbf16, #tpu.memory_space<vmem>>, %arg20: memref<1x64xf32, #tpu.memory_space<vmem>>, %arg21: memref<1x20x64xf32, #tpu.memory_space<vmem>>, %arg22: memref<20x64xf32, #tpu.memory_space<vmem>>, %arg23: memref<20x64xf32, #tpu.memory_space<vmem>>) attributes {dimension_semantics = [#tpu.dimension_semantics<parallel>], iteration_bounds = array<i64: 2>, scalar_prefetch = 0 : i64, scratch_operands = 2 : i64, tpu.core_type = #tpu.core_type<tc>, window_params = [{transform_indices = @transform_0, window_bounds = array<i64: 1, 20, 64>}, {transform_indices = @transform_1, window_bounds = array<i64: 1, 4, 1, 5>}, {pipeline_mode = #tpu.pipeline_mode<synchronous>, transform_indices = @transform_2, window_bounds = array<i64: 1, 64>}, {pipeline_mode = #tpu.pipeline_mode<synchronous>, transform_indices = @transform_3, window_bounds = array<i64: 1, 64>}, {pipeline_mode = #tpu.pipeline_mode<synchronous>, transform_indices = @transform_4, window_bounds = array<i64: 64, 192>}, {pipeline_mode = #tpu.pipeline_mode<synchronous>, transform_indices = @transform_5, window_bounds = array<i64: 4, 16, 64>}, {pipeline_mode = #tpu.pipeline_mode<synchronous>, transform_indices = @transform_6, window_bounds = array<i64: 1, 64>}, {pipeline_mode = #tpu.pipeline_mode<synchronous>, transform_indices = @transform_7, window_bounds = array<i64: 64, 64>}, {pipeline_mode = #tpu.pipeline_mode<synchronous>, transform_indices = @transform_8, window_bounds = array<i64: 1, 64>}, {pipeline_mode = #tpu.pipeline_mode<synchronous>, transform_indices = @transform_9, window_bounds = array<i64: 1, 64>}, {pipeline_mode = #tpu.pipeline_mode<synchronous>, transform_indices = @transform_10, window_bounds = array<i64: 1, 64>}, {pipeline_mode = #tpu.pipeline_mode<synchronous>, transform_indices = @transform_11, window_bounds = array<i64: 64, 192>}, {pipeline_mode = #tpu.pipeline_mode<synchronous>, transform_indices = @transform_12, window_bounds = array<i64: 4, 16, 64>}, {pipeline_mode = #tpu.pipeline_mode<synchronous>, transform_indices = @transform_13, window_bounds = array<i64: 1, 64>}, {pipeline_mode = #tpu.pipeline_mode<synchronous>, transform_indices = @transform_14, window_bounds = array<i64: 1, 64>}, {pipeline_mode = #tpu.pipeline_mode<synchronous>, transform_indices = @transform_15, window_bounds = array<i64: 1, 64>}, {pipeline_mode = #tpu.pipeline_mode<synchronous>, transform_indices = @transform_16, window_bounds = array<i64: 64, 256>}, {pipeline_mode = #tpu.pipeline_mode<synchronous>, transform_indices = @transform_17, window_bounds = array<i64: 1, 256>}, {pipeline_mode = #tpu.pipeline_mode<synchronous>, transform_indices = @transform_18, window_bounds = array<i64: 256, 64>}, {pipeline_mode = #tpu.pipeline_mode<synchronous>, transform_indices = @transform_19, window_bounds = array<i64: 1, 64>}, {transform_indices = @transform_20, window_bounds = array<i64: 1, 20, 64>}]} {
    %c0 = arith.constant 0 : index
    %c0_0 = arith.constant 0 : index
    %c0_1 = arith.constant 0 : index
    %0 = vector.load %arg1[%c0, %c0_0, %c0_1] : memref<1x20x64xf32, #tpu.memory_space<vmem>>, vector<1x20x64xf32>
    %1 = vector.shape_cast %0 : vector<1x20x64xf32> to vector<20x64xf32>
    %c0_2 = arith.constant 0 : index
    %c0_3 = arith.constant 0 : index
    %2 = vector.load %arg3[%c0_2, %c0_3] : memref<1x64xf32, #tpu.memory_space<vmem>>, vector<1x64xf32>
    %c0_4 = arith.constant 0 : index
    %c0_5 = arith.constant 0 : index
    %3 = vector.load %arg4[%c0_4, %c0_5] : memref<1x64xf32, #tpu.memory_space<vmem>>, vector<1x64xf32>
    %cst = arith.constant dense<0.000000e+00> : vector<20xf32>
    %4 = vector.multi_reduction <add>, %1, %cst [1] : vector<20x64xf32> to vector<20xf32>
    %5 = vector.shape_cast %4 : vector<20xf32> to vector<20x1xf32>
    %cst_6 = arith.constant 6.400000e+01 : f32
    %6 = vector.broadcast %cst_6 : f32 to vector<20x1xf32>
    %7 = arith.divf %5, %6 : vector<20x1xf32>
    %8 = vector.broadcast %7 : vector<20x1xf32> to vector<20x64xf32>
    %9 = arith.subf %1, %8 : vector<20x64xf32>
    %10 = arith.mulf %9, %9 : vector<20x64xf32>
    %cst_7 = arith.constant dense<0.000000e+00> : vector<20xf32>
    %11 = vector.multi_reduction <add>, %10, %cst_7 [1] : vector<20x64xf32> to vector<20xf32>
    %12 = vector.shape_cast %11 : vector<20xf32> to vector<20x1xf32>
    %cst_8 = arith.constant 6.400000e+01 : f32
    %13 = vector.broadcast %cst_8 : f32 to vector<20x1xf32>
    %14 = arith.divf %12, %13 : vector<20x1xf32>
    %cst_9 = arith.constant 9.99999974E-6 : f32
    %15 = vector.broadcast %cst_9 : f32 to vector<20x1xf32>
    %16 = arith.addf %14, %15 : vector<20x1xf32>
    %17 = math.rsqrt %16 : vector<20x1xf32>
    %18 = vector.broadcast %17 : vector<20x1xf32> to vector<20x64xf32>
    %19 = arith.mulf %9, %18 : vector<20x64xf32>
    %20 = vector.broadcast %2 : vector<1x64xf32> to vector<20x64xf32>
    %21 = arith.mulf %19, %20 : vector<20x64xf32>
    %22 = vector.broadcast %3 : vector<1x64xf32> to vector<20x64xf32>
    %23 = arith.addf %21, %22 : vector<20x64xf32>
    %24 = arith.truncf %23 : vector<20x64xf32> to vector<20x64xbf16>
    %c0_10 = arith.constant 0 : index
    %c0_11 = arith.constant 0 : index
    %25 = vector.load %arg5[%c0_10, %c0_11] : memref<64x192xbf16, #tpu.memory_space<vmem>>, vector<64x192xbf16>
    %cst_12 = arith.constant dense<0.000000e+00> : vector<20x192xf32>
    %26 = tpu.matmul %24, %25, %cst_12 {dimension_numbers = #tpu.dot_dimension_numbers<[1], [0], [0], [1], [0, 0, 1, 1], [], []>} : vector<20x64xbf16>, vector<64x192xbf16>, vector<20x192xf32> -> vector<20x192xf32>
    %cst_13 = arith.constant 0.000000e+00 : f32
    %27 = vector.broadcast %cst_13 : f32 to vector<20x64xf32>
    %28 = vector.extract_strided_slice %26 {offsets = [0, 0], sizes = [20, 16], strides = [1, 1]} : vector<20x192xf32> to vector<20x16xf32>
    %29 = vector.shape_cast %28 : vector<20x16xf32> to vector<5x4x16xf32>
    %30 = arith.truncf %29 : vector<5x4x16xf32> to vector<5x4x16xbf16>
    %31 = vector.extract_strided_slice %26 {offsets = [0, 64], sizes = [20, 16], strides = [1, 1]} : vector<20x192xf32> to vector<20x16xf32>
    %32 = vector.shape_cast %31 : vector<20x16xf32> to vector<5x4x16xf32>
    %33 = arith.truncf %32 : vector<5x4x16xf32> to vector<5x4x16xbf16>
    %34 = vector.extract_strided_slice %26 {offsets = [0, 128], sizes = [20, 16], strides = [1, 1]} : vector<20x192xf32> to vector<20x16xf32>
    %35 = vector.shape_cast %34 : vector<20x16xf32> to vector<5x4x16xf32>
    %36 = arith.truncf %35 : vector<5x4x16xf32> to vector<5x4x16xbf16>
    "tpu.trace_start"() <{level = 10 : i32, message = "gqd,gkd->gqk"}> : () -> ()
    %cst_14 = arith.constant dense<0.000000e+00> : vector<5x4x4xf32>
    %37 = tpu.matmul %30, %33, %cst_14 {dimension_numbers = #tpu.dot_dimension_numbers<[2], [2], [1], [1], [0, 0, 0, 1, 1, 1], [0], [0]>} : vector<5x4x16xbf16>, vector<5x4x16xbf16>, vector<5x4x4xf32> -> vector<5x4x4xf32>
    "tpu.trace_stop"() : () -> ()
    %cst_15 = arith.constant dense<0xFF800000> : vector<5x4xf32>
    %38 = vector.multi_reduction <maximumf>, %37, %cst_15 [2] : vector<5x4x4xf32> to vector<5x4xf32>
    %39 = vector.shape_cast %38 : vector<5x4xf32> to vector<5x4x1xf32>
    %40 = vector.broadcast %39 : vector<5x4x1xf32> to vector<5x4x4xf32>
    %41 = arith.subf %37, %40 : vector<5x4x4xf32>
    %42 = math.exp %41 : vector<5x4x4xf32>
    %cst_16 = arith.constant dense<0.000000e+00> : vector<5x4xf32>
    %43 = vector.multi_reduction <add>, %42, %cst_16 [2] : vector<5x4x4xf32> to vector<5x4xf32>
    %44 = vector.shape_cast %43 : vector<5x4xf32> to vector<5x4x1xf32>
    %45 = tpu.reciprocal %44 {approx = true} : vector<5x4x1xf32> -> vector<5x4x1xf32>
    %46 = vector.broadcast %45 : vector<5x4x1xf32> to vector<5x4x4xf32>
    %47 = arith.mulf %42, %46 : vector<5x4x4xf32>
    %48 = arith.truncf %47 : vector<5x4x4xf32> to vector<5x4x4xbf16>
    "tpu.trace_start"() <{level = 10 : i32, message = "gqk,gkd->gqd"}> : () -> ()
    %cst_17 = arith.constant dense<0.000000e+00> : vector<5x4x16xf32>
    %49 = tpu.matmul %48, %36, %cst_17 {dimension_numbers = #tpu.dot_dimension_numbers<[2], [1], [1], [2], [0, 0, 0, 1, 1, 2], [0], [0]>} : vector<5x4x4xbf16>, vector<5x4x16xbf16>, vector<5x4x16xf32> -> vector<5x4x16xf32>
    "tpu.trace_stop"() : () -> ()
    %50 = vector.shape_cast %49 : vector<5x4x16xf32> to vector<20x16xf32>
    %51 = arith.truncf %50 : vector<20x16xf32> to vector<20x16xbf16>
    %c0_18 = arith.constant 0 : index
    %c0_19 = arith.constant 0 : index
    %c0_20 = arith.constant 0 : index
    %52 = vector.load %arg6[%c0_18, %c0_19, %c0_20] : memref<4x16x64xbf16, #tpu.memory_space<vmem>>, vector<1x16x64xbf16>
    %53 = vector.shape_cast %52 : vector<1x16x64xbf16> to vector<16x64xbf16>
    %cst_21 = arith.constant dense<0.000000e+00> : vector<20x64xf32>
    %54 = tpu.matmul %51, %53, %cst_21 {dimension_numbers = #tpu.dot_dimension_numbers<[1], [0], [0], [1], [0, 0, 1, 1], [], []>} : vector<20x16xbf16>, vector<16x64xbf16>, vector<20x64xf32> -> vector<20x64xf32>
    %55 = arith.addf %27, %54 : vector<20x64xf32>
    %56 = vector.extract_strided_slice %26 {offsets = [0, 16], sizes = [20, 16], strides = [1, 1]} : vector<20x192xf32> to vector<20x16xf32>
    %57 = vector.shape_cast %56 : vector<20x16xf32> to vector<5x4x16xf32>
    %58 = arith.truncf %57 : vector<5x4x16xf32> to vector<5x4x16xbf16>
    %59 = vector.extract_strided_slice %26 {offsets = [0, 80], sizes = [20, 16], strides = [1, 1]} : vector<20x192xf32> to vector<20x16xf32>
    %60 = vector.shape_cast %59 : vector<20x16xf32> to vector<5x4x16xf32>
    %61 = arith.truncf %60 : vector<5x4x16xf32> to vector<5x4x16xbf16>
    %62 = vector.extract_strided_slice %26 {offsets = [0, 144], sizes = [20, 16], strides = [1, 1]} : vector<20x192xf32> to vector<20x16xf32>
    %63 = vector.shape_cast %62 : vector<20x16xf32> to vector<5x4x16xf32>
    %64 = arith.truncf %63 : vector<5x4x16xf32> to vector<5x4x16xbf16>
    "tpu.trace_start"() <{level = 10 : i32, message = "gqd,gkd->gqk"}> : () -> ()
    %cst_22 = arith.constant dense<0.000000e+00> : vector<5x4x4xf32>
    %65 = tpu.matmul %58, %61, %cst_22 {dimension_numbers = #tpu.dot_dimension_numbers<[2], [2], [1], [1], [0, 0, 0, 1, 1, 1], [0], [0]>} : vector<5x4x16xbf16>, vector<5x4x16xbf16>, vector<5x4x4xf32> -> vector<5x4x4xf32>
    "tpu.trace_stop"() : () -> ()
    %cst_23 = arith.constant dense<0xFF800000> : vector<5x4xf32>
    %66 = vector.multi_reduction <maximumf>, %65, %cst_23 [2] : vector<5x4x4xf32> to vector<5x4xf32>
    %67 = vector.shape_cast %66 : vector<5x4xf32> to vector<5x4x1xf32>
    %68 = vector.broadcast %67 : vector<5x4x1xf32> to vector<5x4x4xf32>
    %69 = arith.subf %65, %68 : vector<5x4x4xf32>
    %70 = math.exp %69 : vector<5x4x4xf32>
    %cst_24 = arith.constant dense<0.000000e+00> : vector<5x4xf32>
    %71 = vector.multi_reduction <add>, %70, %cst_24 [2] : vector<5x4x4xf32> to vector<5x4xf32>
    %72 = vector.shape_cast %71 : vector<5x4xf32> to vector<5x4x1xf32>
    %73 = tpu.reciprocal %72 {approx = true} : vector<5x4x1xf32> -> vector<5x4x1xf32>
    %74 = vector.broadcast %73 : vector<5x4x1xf32> to vector<5x4x4xf32>
    %75 = arith.mulf %70, %74 : vector<5x4x4xf32>
    %76 = arith.truncf %75 : vector<5x4x4xf32> to vector<5x4x4xbf16>
    "tpu.trace_start"() <{level = 10 : i32, message = "gqk,gkd->gqd"}> : () -> ()
    %cst_25 = arith.constant dense<0.000000e+00> : vector<5x4x16xf32>
    %77 = tpu.matmul %76, %64, %cst_25 {dimension_numbers = #tpu.dot_dimension_numbers<[2], [1], [1], [2], [0, 0, 0, 1, 1, 2], [0], [0]>} : vector<5x4x4xbf16>, vector<5x4x16xbf16>, vector<5x4x16xf32> -> vector<5x4x16xf32>
    "tpu.trace_stop"() : () -> ()
    %78 = vector.shape_cast %77 : vector<5x4x16xf32> to vector<20x16xf32>
    %79 = arith.truncf %78 : vector<20x16xf32> to vector<20x16xbf16>
    %c1 = arith.constant 1 : index
    %c0_26 = arith.constant 0 : index
    %c0_27 = arith.constant 0 : index
    %80 = vector.load %arg6[%c1, %c0_26, %c0_27] : memref<4x16x64xbf16, #tpu.memory_space<vmem>>, vector<1x16x64xbf16>
    %81 = vector.shape_cast %80 : vector<1x16x64xbf16> to vector<16x64xbf16>
    %cst_28 = arith.constant dense<0.000000e+00> : vector<20x64xf32>
    %82 = tpu.matmul %79, %81, %cst_28 {dimension_numbers = #tpu.dot_dimension_numbers<[1], [0], [0], [1], [0, 0, 1, 1], [], []>} : vector<20x16xbf16>, vector<16x64xbf16>, vector<20x64xf32> -> vector<20x64xf32>
    %83 = arith.addf %55, %82 : vector<20x64xf32>
    %84 = vector.extract_strided_slice %26 {offsets = [0, 32], sizes = [20, 16], strides = [1, 1]} : vector<20x192xf32> to vector<20x16xf32>
    %85 = vector.shape_cast %84 : vector<20x16xf32> to vector<5x4x16xf32>
    %86 = arith.truncf %85 : vector<5x4x16xf32> to vector<5x4x16xbf16>
    %87 = vector.extract_strided_slice %26 {offsets = [0, 96], sizes = [20, 16], strides = [1, 1]} : vector<20x192xf32> to vector<20x16xf32>
    %88 = vector.shape_cast %87 : vector<20x16xf32> to vector<5x4x16xf32>
    %89 = arith.truncf %88 : vector<5x4x16xf32> to vector<5x4x16xbf16>
    %90 = vector.extract_strided_slice %26 {offsets = [0, 160], sizes = [20, 16], strides = [1, 1]} : vector<20x192xf32> to vector<20x16xf32>
    %91 = vector.shape_cast %90 : vector<20x16xf32> to vector<5x4x16xf32>
    %92 = arith.truncf %91 : vector<5x4x16xf32> to vector<5x4x16xbf16>
    "tpu.trace_start"() <{level = 10 : i32, message = "gqd,gkd->gqk"}> : () -> ()
    %cst_29 = arith.constant dense<0.000000e+00> : vector<5x4x4xf32>
    %93 = tpu.matmul %86, %89, %cst_29 {dimension_numbers = #tpu.dot_dimension_numbers<[2], [2], [1], [1], [0, 0, 0, 1, 1, 1], [0], [0]>} : vector<5x4x16xbf16>, vector<5x4x16xbf16>, vector<5x4x4xf32> -> vector<5x4x4xf32>
    "tpu.trace_stop"() : () -> ()
    %cst_30 = arith.constant dense<0xFF800000> : vector<5x4xf32>
    %94 = vector.multi_reduction <maximumf>, %93, %cst_30 [2] : vector<5x4x4xf32> to vector<5x4xf32>
    %95 = vector.shape_cast %94 : vector<5x4xf32> to vector<5x4x1xf32>
    %96 = vector.broadcast %95 : vector<5x4x1xf32> to vector<5x4x4xf32>
    %97 = arith.subf %93, %96 : vector<5x4x4xf32>
    %98 = math.exp %97 : vector<5x4x4xf32>
    %cst_31 = arith.constant dense<0.000000e+00> : vector<5x4xf32>
    %99 = vector.multi_reduction <add>, %98, %cst_31 [2] : vector<5x4x4xf32> to vector<5x4xf32>
    %100 = vector.shape_cast %99 : vector<5x4xf32> to vector<5x4x1xf32>
    %101 = tpu.reciprocal %100 {approx = true} : vector<5x4x1xf32> -> vector<5x4x1xf32>
    %102 = vector.broadcast %101 : vector<5x4x1xf32> to vector<5x4x4xf32>
    %103 = arith.mulf %98, %102 : vector<5x4x4xf32>
    %104 = arith.truncf %103 : vector<5x4x4xf32> to vector<5x4x4xbf16>
    "tpu.trace_start"() <{level = 10 : i32, message = "gqk,gkd->gqd"}> : () -> ()
    %cst_32 = arith.constant dense<0.000000e+00> : vector<5x4x16xf32>
    %105 = tpu.matmul %104, %92, %cst_32 {dimension_numbers = #tpu.dot_dimension_numbers<[2], [1], [1], [2], [0, 0, 0, 1, 1, 2], [0], [0]>} : vector<5x4x4xbf16>, vector<5x4x16xbf16>, vector<5x4x16xf32> -> vector<5x4x16xf32>
    "tpu.trace_stop"() : () -> ()
    %106 = vector.shape_cast %105 : vector<5x4x16xf32> to vector<20x16xf32>
    %107 = arith.truncf %106 : vector<20x16xf32> to vector<20x16xbf16>
    %c2 = arith.constant 2 : index
    %c0_33 = arith.constant 0 : index
    %c0_34 = arith.constant 0 : index
    %108 = vector.load %arg6[%c2, %c0_33, %c0_34] : memref<4x16x64xbf16, #tpu.memory_space<vmem>>, vector<1x16x64xbf16>
    %109 = vector.shape_cast %108 : vector<1x16x64xbf16> to vector<16x64xbf16>
    %cst_35 = arith.constant dense<0.000000e+00> : vector<20x64xf32>
    %110 = tpu.matmul %107, %109, %cst_35 {dimension_numbers = #tpu.dot_dimension_numbers<[1], [0], [0], [1], [0, 0, 1, 1], [], []>} : vector<20x16xbf16>, vector<16x64xbf16>, vector<20x64xf32> -> vector<20x64xf32>
    %111 = arith.addf %83, %110 : vector<20x64xf32>
    %112 = vector.extract_strided_slice %26 {offsets = [0, 48], sizes = [20, 16], strides = [1, 1]} : vector<20x192xf32> to vector<20x16xf32>
    %113 = vector.shape_cast %112 : vector<20x16xf32> to vector<5x4x16xf32>
    %114 = arith.truncf %113 : vector<5x4x16xf32> to vector<5x4x16xbf16>
    %115 = vector.extract_strided_slice %26 {offsets = [0, 112], sizes = [20, 16], strides = [1, 1]} : vector<20x192xf32> to vector<20x16xf32>
    %116 = vector.shape_cast %115 : vector<20x16xf32> to vector<5x4x16xf32>
    %117 = arith.truncf %116 : vector<5x4x16xf32> to vector<5x4x16xbf16>
    %118 = vector.extract_strided_slice %26 {offsets = [0, 176], sizes = [20, 16], strides = [1, 1]} : vector<20x192xf32> to vector<20x16xf32>
    %119 = vector.shape_cast %118 : vector<20x16xf32> to vector<5x4x16xf32>
    %120 = arith.truncf %119 : vector<5x4x16xf32> to vector<5x4x16xbf16>
    "tpu.trace_start"() <{level = 10 : i32, message = "gqd,gkd->gqk"}> : () -> ()
    %cst_36 = arith.constant dense<0.000000e+00> : vector<5x4x4xf32>
    %121 = tpu.matmul %114, %117, %cst_36 {dimension_numbers = #tpu.dot_dimension_numbers<[2], [2], [1], [1], [0, 0, 0, 1, 1, 1], [0], [0]>} : vector<5x4x16xbf16>, vector<5x4x16xbf16>, vector<5x4x4xf32> -> vector<5x4x4xf32>
    "tpu.trace_stop"() : () -> ()
    %cst_37 = arith.constant dense<0xFF800000> : vector<5x4xf32>
    %122 = vector.multi_reduction <maximumf>, %121, %cst_37 [2] : vector<5x4x4xf32> to vector<5x4xf32>
    %123 = vector.shape_cast %122 : vector<5x4xf32> to vector<5x4x1xf32>
    %124 = vector.broadcast %123 : vector<5x4x1xf32> to vector<5x4x4xf32>
    %125 = arith.subf %121, %124 : vector<5x4x4xf32>
    %126 = math.exp %125 : vector<5x4x4xf32>
    %cst_38 = arith.constant dense<0.000000e+00> : vector<5x4xf32>
    %127 = vector.multi_reduction <add>, %126, %cst_38 [2] : vector<5x4x4xf32> to vector<5x4xf32>
    %128 = vector.shape_cast %127 : vector<5x4xf32> to vector<5x4x1xf32>
    %129 = tpu.reciprocal %128 {approx = true} : vector<5x4x1xf32> -> vector<5x4x1xf32>
    %130 = vector.broadcast %129 : vector<5x4x1xf32> to vector<5x4x4xf32>
    %131 = arith.mulf %126, %130 : vector<5x4x4xf32>
    %132 = arith.truncf %131 : vector<5x4x4xf32> to vector<5x4x4xbf16>
    "tpu.trace_start"() <{level = 10 : i32, message = "gqk,gkd->gqd"}> : () -> ()
    %cst_39 = arith.constant dense<0.000000e+00> : vector<5x4x16xf32>
    %133 = tpu.matmul %132, %120, %cst_39 {dimension_numbers = #tpu.dot_dimension_numbers<[2], [1], [1], [2], [0, 0, 0, 1, 1, 2], [0], [0]>} : vector<5x4x4xbf16>, vector<5x4x16xbf16>, vector<5x4x16xf32> -> vector<5x4x16xf32>
    "tpu.trace_stop"() : () -> ()
    %134 = vector.shape_cast %133 : vector<5x4x16xf32> to vector<20x16xf32>
    %135 = arith.truncf %134 : vector<20x16xf32> to vector<20x16xbf16>
    %c3 = arith.constant 3 : index
    %c0_40 = arith.constant 0 : index
    %c0_41 = arith.constant 0 : index
    %136 = vector.load %arg6[%c3, %c0_40, %c0_41] : memref<4x16x64xbf16, #tpu.memory_space<vmem>>, vector<1x16x64xbf16>
    %137 = vector.shape_cast %136 : vector<1x16x64xbf16> to vector<16x64xbf16>
    %cst_42 = arith.constant dense<0.000000e+00> : vector<20x64xf32>
    %138 = tpu.matmul %135, %137, %cst_42 {dimension_numbers = #tpu.dot_dimension_numbers<[1], [0], [0], [1], [0, 0, 1, 1], [], []>} : vector<20x16xbf16>, vector<16x64xbf16>, vector<20x64xf32> -> vector<20x64xf32>
    %139 = arith.addf %111, %138 : vector<20x64xf32>
    %c0_43 = arith.constant 0 : index
    %c0_44 = arith.constant 0 : index
    %140 = vector.load %arg7[%c0_43, %c0_44] : memref<1x64xf32, #tpu.memory_space<vmem>>, vector<1x64xf32>
    %141 = vector.broadcast %140 : vector<1x64xf32> to vector<20x64xf32>
    %142 = arith.addf %139, %141 : vector<20x64xf32>
    %143 = arith.truncf %142 : vector<20x64xf32> to vector<20x64xbf16>
    %c0_45 = arith.constant 0 : index
    %c0_46 = arith.constant 0 : index
    %144 = vector.load %arg8[%c0_45, %c0_46] : memref<64x64xbf16, #tpu.memory_space<vmem>>, vector<64x64xbf16>
    %cst_47 = arith.constant dense<0.000000e+00> : vector<20x64xf32>
    %145 = tpu.matmul %143, %144, %cst_47 {dimension_numbers = #tpu.dot_dimension_numbers<[1], [0], [0], [1], [0, 0, 1, 1], [], []>} : vector<20x64xbf16>, vector<64x64xbf16>, vector<20x64xf32> -> vector<20x64xf32>
    %c0_48 = arith.constant 0 : index
    %c0_49 = arith.constant 0 : index
    %146 = vector.load %arg9[%c0_48, %c0_49] : memref<1x64xf32, #tpu.memory_space<vmem>>, vector<1x64xf32>
    %147 = vector.broadcast %146 : vector<1x64xf32> to vector<20x64xf32>
    %148 = arith.addf %145, %147 : vector<20x64xf32>
    %149 = arith.addf %1, %148 : vector<20x64xf32>
    %c0_50 = arith.constant 0 : index
    %c0_51 = arith.constant 0 : index
    %150 = vector.load %arg22[%c0_50, %c0_51] : memref<20x64xf32, #tpu.memory_space<vmem>>, vector<20x64xf32>
    tpu.vector_store %arg22[%c0_50, %c0_51], %149 {strides = array<i32>} : memref<20x64xf32, #tpu.memory_space<vmem>>, vector<20x64xf32>,
    %c0_52 = arith.constant 0 : index
    %c0_53 = arith.constant 0 : index
    %151 = tpu.strided_load %arg22[%c0_52, %c0_53] {strides = array<i32: 4, 1>} : memref<20x64xf32, #tpu.memory_space<vmem>>, vector<5x64xf32>
    %c0_54 = arith.constant 0 : index
    %c0_55 = arith.constant 0 : index
    %152 = vector.load %arg23[%c0_54, %c0_55] : memref<20x64xf32, #tpu.memory_space<vmem>>, vector<5x64xf32>
    tpu.vector_store %arg23[%c0_54, %c0_55], %151 {strides = array<i32>} : memref<20x64xf32, #tpu.memory_space<vmem>>, vector<5x64xf32>,
    %c1_56 = arith.constant 1 : index
    %c0_57 = arith.constant 0 : index
    %153 = tpu.strided_load %arg22[%c1_56, %c0_57] {strides = array<i32: 4, 1>} : memref<20x64xf32, #tpu.memory_space<vmem>>, vector<5x64xf32>
    %c5 = arith.constant 5 : index
    %c0_58 = arith.constant 0 : index
    %154 = vector.load %arg23[%c5, %c0_58] : memref<20x64xf32, #tpu.memory_space<vmem>>, vector<5x64xf32>
    tpu.vector_store %arg23[%c5, %c0_58], %153 {strides = array<i32>} : memref<20x64xf32, #tpu.memory_space<vmem>>, vector<5x64xf32>,
    %c2_59 = arith.constant 2 : index
    %c0_60 = arith.constant 0 : index
    %155 = tpu.strided_load %arg22[%c2_59, %c0_60] {strides = array<i32: 4, 1>} : memref<20x64xf32, #tpu.memory_space<vmem>>, vector<5x64xf32>
    %c10 = arith.constant 10 : index
    %c0_61 = arith.constant 0 : index
    %156 = vector.load %arg23[%c10, %c0_61] : memref<20x64xf32, #tpu.memory_space<vmem>>, vector<5x64xf32>
    tpu.vector_store %arg23[%c10, %c0_61], %155 {strides = array<i32>} : memref<20x64xf32, #tpu.memory_space<vmem>>, vector<5x64xf32>,
    %c3_62 = arith.constant 3 : index
    %c0_63 = arith.constant 0 : index
    %157 = tpu.strided_load %arg22[%c3_62, %c0_63] {strides = array<i32: 4, 1>} : memref<20x64xf32, #tpu.memory_space<vmem>>, vector<5x64xf32>
    %c15 = arith.constant 15 : index
    %c0_64 = arith.constant 0 : index
    %158 = vector.load %arg23[%c15, %c0_64] : memref<20x64xf32, #tpu.memory_space<vmem>>, vector<5x64xf32>
    tpu.vector_store %arg23[%c15, %c0_64], %157 {strides = array<i32>} : memref<20x64xf32, #tpu.memory_space<vmem>>, vector<5x64xf32>,
    %c0_65 = arith.constant 0 : index
    %c0_66 = arith.constant 0 : index
    %159 = vector.load %arg23[%c0_65, %c0_66] : memref<20x64xf32, #tpu.memory_space<vmem>>, vector<20x64xf32>
    %c0_67 = arith.constant 0 : index
    %c0_68 = arith.constant 0 : index
    %160 = vector.load %arg10[%c0_67, %c0_68] : memref<1x64xf32, #tpu.memory_space<vmem>>, vector<1x64xf32>
    %c0_69 = arith.constant 0 : index
    %c0_70 = arith.constant 0 : index
    %161 = vector.load %arg11[%c0_69, %c0_70] : memref<1x64xf32, #tpu.memory_space<vmem>>, vector<1x64xf32>
    %cst_71 = arith.constant dense<0.000000e+00> : vector<20xf32>
    %162 = vector.multi_reduction <add>, %159, %cst_71 [1] : vector<20x64xf32> to vector<20xf32>
    %163 = vector.shape_cast %162 : vector<20xf32> to vector<20x1xf32>
    %cst_72 = arith.constant 6.400000e+01 : f32
    %164 = vector.broadcast %cst_72 : f32 to vector<20x1xf32>
    %165 = arith.divf %163, %164 : vector<20x1xf32>
    %166 = vector.broadcast %165 : vector<20x1xf32> to vector<20x64xf32>
    %167 = arith.subf %159, %166 : vector<20x64xf32>
    %168 = arith.mulf %167, %167 : vector<20x64xf32>
    %cst_73 = arith.constant dense<0.000000e+00> : vector<20xf32>
    %169 = vector.multi_reduction <add>, %168, %cst_73 [1] : vector<20x64xf32> to vector<20xf32>
    %170 = vector.shape_cast %169 : vector<20xf32> to vector<20x1xf32>
    %cst_74 = arith.constant 6.400000e+01 : f32
    %171 = vector.broadcast %cst_74 : f32 to vector<20x1xf32>
    %172 = arith.divf %170, %171 : vector<20x1xf32>
    %cst_75 = arith.constant 9.99999974E-6 : f32
    %173 = vector.broadcast %cst_75 : f32 to vector<20x1xf32>
    %174 = arith.addf %172, %173 : vector<20x1xf32>
    %175 = math.rsqrt %174 : vector<20x1xf32>
    %176 = vector.broadcast %175 : vector<20x1xf32> to vector<20x64xf32>
    %177 = arith.mulf %167, %176 : vector<20x64xf32>
    %178 = vector.broadcast %160 : vector<1x64xf32> to vector<20x64xf32>
    %179 = arith.mulf %177, %178 : vector<20x64xf32>
    %180 = vector.broadcast %161 : vector<1x64xf32> to vector<20x64xf32>
    %181 = arith.addf %179, %180 : vector<20x64xf32>
    %c0_76 = arith.constant 0 : index
    %c0_77 = arith.constant 0 : index
    %c0_78 = arith.constant 0 : index
    %c0_79 = arith.constant 0 : index
    %182 = vector.load %arg2[%c0_76, %c0_77, %c0_78, %c0_79] : memref<1x4x1x5xf32, #tpu.memory_space<vmem>>, vector<1x4x1x5xf32>
    %183 = vector.shape_cast %182 : vector<1x4x1x5xf32> to vector<4x1x5xf32>
    %184 = arith.truncf %181 : vector<20x64xf32> to vector<20x64xbf16>
    %c0_80 = arith.constant 0 : index
    %c0_81 = arith.constant 0 : index
    %185 = vector.load %arg12[%c0_80, %c0_81] : memref<64x192xbf16, #tpu.memory_space<vmem>>, vector<64x192xbf16>
    %cst_82 = arith.constant dense<0.000000e+00> : vector<20x192xf32>
    %186 = tpu.matmul %184, %185, %cst_82 {dimension_numbers = #tpu.dot_dimension_numbers<[1], [0], [0], [1], [0, 0, 1, 1], [], []>} : vector<20x64xbf16>, vector<64x192xbf16>, vector<20x192xf32> -> vector<20x192xf32>
    %cst_83 = arith.constant 0.000000e+00 : f32
    %187 = vector.broadcast %cst_83 : f32 to vector<20x64xf32>
    %188 = vector.extract_strided_slice %186 {offsets = [0, 0], sizes = [20, 16], strides = [1, 1]} : vector<20x192xf32> to vector<20x16xf32>
    %189 = vector.shape_cast %188 : vector<20x16xf32> to vector<4x5x16xf32>
    %190 = arith.truncf %189 : vector<4x5x16xf32> to vector<4x5x16xbf16>
    %191 = vector.extract_strided_slice %186 {offsets = [0, 64], sizes = [20, 16], strides = [1, 1]} : vector<20x192xf32> to vector<20x16xf32>
    %192 = vector.shape_cast %191 : vector<20x16xf32> to vector<4x5x16xf32>
    %193 = arith.truncf %192 : vector<4x5x16xf32> to vector<4x5x16xbf16>
    %194 = vector.extract_strided_slice %186 {offsets = [0, 128], sizes = [20, 16], strides = [1, 1]} : vector<20x192xf32> to vector<20x16xf32>
    %195 = vector.shape_cast %194 : vector<20x16xf32> to vector<4x5x16xf32>
    %196 = arith.truncf %195 : vector<4x5x16xf32> to vector<4x5x16xbf16>
    "tpu.trace_start"() <{level = 10 : i32, message = "gqd,gkd->gqk"}> : () -> ()
    %cst_84 = arith.constant dense<0.000000e+00> : vector<4x5x5xf32>
    %197 = tpu.matmul %190, %193, %cst_84 {dimension_numbers = #tpu.dot_dimension_numbers<[2], [2], [1], [1], [0, 0, 0, 1, 1, 1], [0], [0]>} : vector<4x5x16xbf16>, vector<4x5x16xbf16>, vector<4x5x5xf32> -> vector<4x5x5xf32>
    "tpu.trace_stop"() : () -> ()
    %198 = vector.broadcast %183 : vector<4x1x5xf32> to vector<4x5x5xf32>
    %199 = arith.addf %197, %198 : vector<4x5x5xf32>
    %cst_85 = arith.constant dense<0xFF800000> : vector<4x5xf32>
    %200 = vector.multi_reduction <maximumf>, %199, %cst_85 [2] : vector<4x5x5xf32> to vector<4x5xf32>
    %201 = vector.shape_cast %200 : vector<4x5xf32> to vector<4x5x1xf32>
    %202 = vector.broadcast %201 : vector<4x5x1xf32> to vector<4x5x5xf32>
    %203 = arith.subf %199, %202 : vector<4x5x5xf32>
    %204 = math.exp %203 : vector<4x5x5xf32>
    %cst_86 = arith.constant dense<0.000000e+00> : vector<4x5xf32>
    %205 = vector.multi_reduction <add>, %204, %cst_86 [2] : vector<4x5x5xf32> to vector<4x5xf32>
    %206 = vector.shape_cast %205 : vector<4x5xf32> to vector<4x5x1xf32>
    %207 = tpu.reciprocal %206 {approx = true} : vector<4x5x1xf32> -> vector<4x5x1xf32>
    %208 = vector.broadcast %207 : vector<4x5x1xf32> to vector<4x5x5xf32>
    %209 = arith.mulf %204, %208 : vector<4x5x5xf32>
    %210 = arith.truncf %209 : vector<4x5x5xf32> to vector<4x5x5xbf16>
    "tpu.trace_start"() <{level = 10 : i32, message = "gqk,gkd->gqd"}> : () -> ()
    %cst_87 = arith.constant dense<0.000000e+00> : vector<4x5x16xf32>
    %211 = tpu.matmul %210, %196, %cst_87 {dimension_numbers = #tpu.dot_dimension_numbers<[2], [1], [1], [2], [0, 0, 0, 1, 1, 2], [0], [0]>} : vector<4x5x5xbf16>, vector<4x5x16xbf16>, vector<4x5x16xf32> -> vector<4x5x16xf32>
    "tpu.trace_stop"() : () -> ()
    %212 = vector.shape_cast %211 : vector<4x5x16xf32> to vector<20x16xf32>
    %213 = arith.truncf %212 : vector<20x16xf32> to vector<20x16xbf16>
    %c0_88 = arith.constant 0 : index
    %c0_89 = arith.constant 0 : index
    %c0_90 = arith.constant 0 : index
    %214 = vector.load %arg13[%c0_88, %c0_89, %c0_90] : memref<4x16x64xbf16, #tpu.memory_space<vmem>>, vector<1x16x64xbf16>
    %215 = vector.shape_cast %214 : vector<1x16x64xbf16> to vector<16x64xbf16>
    %cst_91 = arith.constant dense<0.000000e+00> : vector<20x64xf32>
    %216 = tpu.matmul %213, %215, %cst_91 {dimension_numbers = #tpu.dot_dimension_numbers<[1], [0], [0], [1], [0, 0, 1, 1], [], []>} : vector<20x16xbf16>, vector<16x64xbf16>, vector<20x64xf32> -> vector<20x64xf32>
    %217 = arith.addf %187, %216 : vector<20x64xf32>
    %218 = vector.extract_strided_slice %186 {offsets = [0, 16], sizes = [20, 16], strides = [1, 1]} : vector<20x192xf32> to vector<20x16xf32>
    %219 = vector.shape_cast %218 : vector<20x16xf32> to vector<4x5x16xf32>
    %220 = arith.truncf %219 : vector<4x5x16xf32> to vector<4x5x16xbf16>
    %221 = vector.extract_strided_slice %186 {offsets = [0, 80], sizes = [20, 16], strides = [1, 1]} : vector<20x192xf32> to vector<20x16xf32>
    %222 = vector.shape_cast %221 : vector<20x16xf32> to vector<4x5x16xf32>
    %223 = arith.truncf %222 : vector<4x5x16xf32> to vector<4x5x16xbf16>
    %224 = vector.extract_strided_slice %186 {offsets = [0, 144], sizes = [20, 16], strides = [1, 1]} : vector<20x192xf32> to vector<20x16xf32>
    %225 = vector.shape_cast %224 : vector<20x16xf32> to vector<4x5x16xf32>
    %226 = arith.truncf %225 : vector<4x5x16xf32> to vector<4x5x16xbf16>
    "tpu.trace_start"() <{level = 10 : i32, message = "gqd,gkd->gqk"}> : () -> ()
    %cst_92 = arith.constant dense<0.000000e+00> : vector<4x5x5xf32>
    %227 = tpu.matmul %220, %223, %cst_92 {dimension_numbers = #tpu.dot_dimension_numbers<[2], [2], [1], [1], [0, 0, 0, 1, 1, 1], [0], [0]>} : vector<4x5x16xbf16>, vector<4x5x16xbf16>, vector<4x5x5xf32> -> vector<4x5x5xf32>
    "tpu.trace_stop"() : () -> ()
    %228 = vector.broadcast %183 : vector<4x1x5xf32> to vector<4x5x5xf32>
    %229 = arith.addf %227, %228 : vector<4x5x5xf32>
    %cst_93 = arith.constant dense<0xFF800000> : vector<4x5xf32>
    %230 = vector.multi_reduction <maximumf>, %229, %cst_93 [2] : vector<4x5x5xf32> to vector<4x5xf32>
    %231 = vector.shape_cast %230 : vector<4x5xf32> to vector<4x5x1xf32>
    %232 = vector.broadcast %231 : vector<4x5x1xf32> to vector<4x5x5xf32>
    %233 = arith.subf %229, %232 : vector<4x5x5xf32>
    %234 = math.exp %233 : vector<4x5x5xf32>
    %cst_94 = arith.constant dense<0.000000e+00> : vector<4x5xf32>
    %235 = vector.multi_reduction <add>, %234, %cst_94 [2] : vector<4x5x5xf32> to vector<4x5xf32>
    %236 = vector.shape_cast %235 : vector<4x5xf32> to vector<4x5x1xf32>
    %237 = tpu.reciprocal %236 {approx = true} : vector<4x5x1xf32> -> vector<4x5x1xf32>
    %238 = vector.broadcast %237 : vector<4x5x1xf32> to vector<4x5x5xf32>
    %239 = arith.mulf %234, %238 : vector<4x5x5xf32>
    %240 = arith.truncf %239 : vector<4x5x5xf32> to vector<4x5x5xbf16>
    "tpu.trace_start"() <{level = 10 : i32, message = "gqk,gkd->gqd"}> : () -> ()
    %cst_95 = arith.constant dense<0.000000e+00> : vector<4x5x16xf32>
    %241 = tpu.matmul %240, %226, %cst_95 {dimension_numbers = #tpu.dot_dimension_numbers<[2], [1], [1], [2], [0, 0, 0, 1, 1, 2], [0], [0]>} : vector<4x5x5xbf16>, vector<4x5x16xbf16>, vector<4x5x16xf32> -> vector<4x5x16xf32>
    "tpu.trace_stop"() : () -> ()
    %242 = vector.shape_cast %241 : vector<4x5x16xf32> to vector<20x16xf32>
    %243 = arith.truncf %242 : vector<20x16xf32> to vector<20x16xbf16>
    %c1_96 = arith.constant 1 : index
    %c0_97 = arith.constant 0 : index
    %c0_98 = arith.constant 0 : index
    %244 = vector.load %arg13[%c1_96, %c0_97, %c0_98] : memref<4x16x64xbf16, #tpu.memory_space<vmem>>, vector<1x16x64xbf16>
    %245 = vector.shape_cast %244 : vector<1x16x64xbf16> to vector<16x64xbf16>
    %cst_99 = arith.constant dense<0.000000e+00> : vector<20x64xf32>
    %246 = tpu.matmul %243, %245, %cst_99 {dimension_numbers = #tpu.dot_dimension_numbers<[1], [0], [0], [1], [0, 0, 1, 1], [], []>} : vector<20x16xbf16>, vector<16x64xbf16>, vector<20x64xf32> -> vector<20x64xf32>
    %247 = arith.addf %217, %246 : vector<20x64xf32>
    %248 = vector.extract_strided_slice %186 {offsets = [0, 32], sizes = [20, 16], strides = [1, 1]} : vector<20x192xf32> to vector<20x16xf32>
    %249 = vector.shape_cast %248 : vector<20x16xf32> to vector<4x5x16xf32>
    %250 = arith.truncf %249 : vector<4x5x16xf32> to vector<4x5x16xbf16>
    %251 = vector.extract_strided_slice %186 {offsets = [0, 96], sizes = [20, 16], strides = [1, 1]} : vector<20x192xf32> to vector<20x16xf32>
    %252 = vector.shape_cast %251 : vector<20x16xf32> to vector<4x5x16xf32>
    %253 = arith.truncf %252 : vector<4x5x16xf32> to vector<4x5x16xbf16>
    %254 = vector.extract_strided_slice %186 {offsets = [0, 160], sizes = [20, 16], strides = [1, 1]} : vector<20x192xf32> to vector<20x16xf32>
    %255 = vector.shape_cast %254 : vector<20x16xf32> to vector<4x5x16xf32>
    %256 = arith.truncf %255 : vector<4x5x16xf32> to vector<4x5x16xbf16>
    "tpu.trace_start"() <{level = 10 : i32, message = "gqd,gkd->gqk"}> : () -> ()
    %cst_100 = arith.constant dense<0.000000e+00> : vector<4x5x5xf32>
    %257 = tpu.matmul %250, %253, %cst_100 {dimension_numbers = #tpu.dot_dimension_numbers<[2], [2], [1], [1], [0, 0, 0, 1, 1, 1], [0], [0]>} : vector<4x5x16xbf16>, vector<4x5x16xbf16>, vector<4x5x5xf32> -> vector<4x5x5xf32>
    "tpu.trace_stop"() : () -> ()
    %258 = vector.broadcast %183 : vector<4x1x5xf32> to vector<4x5x5xf32>
    %259 = arith.addf %257, %258 : vector<4x5x5xf32>
    %cst_101 = arith.constant dense<0xFF800000> : vector<4x5xf32>
    %260 = vector.multi_reduction <maximumf>, %259, %cst_101 [2] : vector<4x5x5xf32> to vector<4x5xf32>
    %261 = vector.shape_cast %260 : vector<4x5xf32> to vector<4x5x1xf32>
    %262 = vector.broadcast %261 : vector<4x5x1xf32> to vector<4x5x5xf32>
    %263 = arith.subf %259, %262 : vector<4x5x5xf32>
    %264 = math.exp %263 : vector<4x5x5xf32>
    %cst_102 = arith.constant dense<0.000000e+00> : vector<4x5xf32>
    %265 = vector.multi_reduction <add>, %264, %cst_102 [2] : vector<4x5x5xf32> to vector<4x5xf32>
    %266 = vector.shape_cast %265 : vector<4x5xf32> to vector<4x5x1xf32>
    %267 = tpu.reciprocal %266 {approx = true} : vector<4x5x1xf32> -> vector<4x5x1xf32>
    %268 = vector.broadcast %267 : vector<4x5x1xf32> to vector<4x5x5xf32>
    %269 = arith.mulf %264, %268 : vector<4x5x5xf32>
    %270 = arith.truncf %269 : vector<4x5x5xf32> to vector<4x5x5xbf16>
    "tpu.trace_start"() <{level = 10 : i32, message = "gqk,gkd->gqd"}> : () -> ()
    %cst_103 = arith.constant dense<0.000000e+00> : vector<4x5x16xf32>
    %271 = tpu.matmul %270, %256, %cst_103 {dimension_numbers = #tpu.dot_dimension_numbers<[2], [1], [1], [2], [0, 0, 0, 1, 1, 2], [0], [0]>} : vector<4x5x5xbf16>, vector<4x5x16xbf16>, vector<4x5x16xf32> -> vector<4x5x16xf32>
    "tpu.trace_stop"() : () -> ()
    %272 = vector.shape_cast %271 : vector<4x5x16xf32> to vector<20x16xf32>
    %273 = arith.truncf %272 : vector<20x16xf32> to vector<20x16xbf16>
    %c2_104 = arith.constant 2 : index
    %c0_105 = arith.constant 0 : index
    %c0_106 = arith.constant 0 : index
    %274 = vector.load %arg13[%c2_104, %c0_105, %c0_106] : memref<4x16x64xbf16, #tpu.memory_space<vmem>>, vector<1x16x64xbf16>
    %275 = vector.shape_cast %274 : vector<1x16x64xbf16> to vector<16x64xbf16>
    %cst_107 = arith.constant dense<0.000000e+00> : vector<20x64xf32>
    %276 = tpu.matmul %273, %275, %cst_107 {dimension_numbers = #tpu.dot_dimension_numbers<[1], [0], [0], [1], [0, 0, 1, 1], [], []>} : vector<20x16xbf16>, vector<16x64xbf16>, vector<20x64xf32> -> vector<20x64xf32>
    %277 = arith.addf %247, %276 : vector<20x64xf32>
    %278 = vector.extract_strided_slice %186 {offsets = [0, 48], sizes = [20, 16], strides = [1, 1]} : vector<20x192xf32> to vector<20x16xf32>
    %279 = vector.shape_cast %278 : vector<20x16xf32> to vector<4x5x16xf32>
    %280 = arith.truncf %279 : vector<4x5x16xf32> to vector<4x5x16xbf16>
    %281 = vector.extract_strided_slice %186 {offsets = [0, 112], sizes = [20, 16], strides = [1, 1]} : vector<20x192xf32> to vector<20x16xf32>
    %282 = vector.shape_cast %281 : vector<20x16xf32> to vector<4x5x16xf32>
    %283 = arith.truncf %282 : vector<4x5x16xf32> to vector<4x5x16xbf16>
    %284 = vector.extract_strided_slice %186 {offsets = [0, 176], sizes = [20, 16], strides = [1, 1]} : vector<20x192xf32> to vector<20x16xf32>
    %285 = vector.shape_cast %284 : vector<20x16xf32> to vector<4x5x16xf32>
    %286 = arith.truncf %285 : vector<4x5x16xf32> to vector<4x5x16xbf16>
    "tpu.trace_start"() <{level = 10 : i32, message = "gqd,gkd->gqk"}> : () -> ()
    %cst_108 = arith.constant dense<0.000000e+00> : vector<4x5x5xf32>
    %287 = tpu.matmul %280, %283, %cst_108 {dimension_numbers = #tpu.dot_dimension_numbers<[2], [2], [1], [1], [0, 0, 0, 1, 1, 1], [0], [0]>} : vector<4x5x16xbf16>, vector<4x5x16xbf16>, vector<4x5x5xf32> -> vector<4x5x5xf32>
    "tpu.trace_stop"() : () -> ()
    %288 = vector.broadcast %183 : vector<4x1x5xf32> to vector<4x5x5xf32>
    %289 = arith.addf %287, %288 : vector<4x5x5xf32>
    %cst_109 = arith.constant dense<0xFF800000> : vector<4x5xf32>
    %290 = vector.multi_reduction <maximumf>, %289, %cst_109 [2] : vector<4x5x5xf32> to vector<4x5xf32>
    %291 = vector.shape_cast %290 : vector<4x5xf32> to vector<4x5x1xf32>
    %292 = vector.broadcast %291 : vector<4x5x1xf32> to vector<4x5x5xf32>
    %293 = arith.subf %289, %292 : vector<4x5x5xf32>
    %294 = math.exp %293 : vector<4x5x5xf32>
    %cst_110 = arith.constant dense<0.000000e+00> : vector<4x5xf32>
    %295 = vector.multi_reduction <add>, %294, %cst_110 [2] : vector<4x5x5xf32> to vector<4x5xf32>
    %296 = vector.shape_cast %295 : vector<4x5xf32> to vector<4x5x1xf32>
    %297 = tpu.reciprocal %296 {approx = true} : vector<4x5x1xf32> -> vector<4x5x1xf32>
    %298 = vector.broadcast %297 : vector<4x5x1xf32> to vector<4x5x5xf32>
    %299 = arith.mulf %294, %298 : vector<4x5x5xf32>
    %300 = arith.truncf %299 : vector<4x5x5xf32> to vector<4x5x5xbf16>
    "tpu.trace_start"() <{level = 10 : i32, message = "gqk,gkd->gqd"}> : () -> ()
    %cst_111 = arith.constant dense<0.000000e+00> : vector<4x5x16xf32>
    %301 = tpu.matmul %300, %286, %cst_111 {dimension_numbers = #tpu.dot_dimension_numbers<[2], [1], [1], [2], [0, 0, 0, 1, 1, 2], [0], [0]>} : vector<4x5x5xbf16>, vector<4x5x16xbf16>, vector<4x5x16xf32> -> vector<4x5x16xf32>
    "tpu.trace_stop"() : () -> ()
    %302 = vector.shape_cast %301 : vector<4x5x16xf32> to vector<20x16xf32>
    %303 = arith.truncf %302 : vector<20x16xf32> to vector<20x16xbf16>
    %c3_112 = arith.constant 3 : index
    %c0_113 = arith.constant 0 : index
    %c0_114 = arith.constant 0 : index
    %304 = vector.load %arg13[%c3_112, %c0_113, %c0_114] : memref<4x16x64xbf16, #tpu.memory_space<vmem>>, vector<1x16x64xbf16>
    %305 = vector.shape_cast %304 : vector<1x16x64xbf16> to vector<16x64xbf16>
    %cst_115 = arith.constant dense<0.000000e+00> : vector<20x64xf32>
    %306 = tpu.matmul %303, %305, %cst_115 {dimension_numbers = #tpu.dot_dimension_numbers<[1], [0], [0], [1], [0, 0, 1, 1], [], []>} : vector<20x16xbf16>, vector<16x64xbf16>, vector<20x64xf32> -> vector<20x64xf32>
    %307 = arith.addf %277, %306 : vector<20x64xf32>
    %c0_116 = arith.constant 0 : index
    %c0_117 = arith.constant 0 : index
    %308 = vector.load %arg14[%c0_116, %c0_117] : memref<1x64xf32, #tpu.memory_space<vmem>>, vector<1x64xf32>
    %309 = vector.broadcast %308 : vector<1x64xf32> to vector<20x64xf32>
    %310 = arith.addf %307, %309 : vector<20x64xf32>
    %311 = arith.addf %159, %310 : vector<20x64xf32>
    %c0_118 = arith.constant 0 : index
    %c0_119 = arith.constant 0 : index
    %312 = vector.load %arg15[%c0_118, %c0_119] : memref<1x64xf32, #tpu.memory_space<vmem>>, vector<1x64xf32>
    %c0_120 = arith.constant 0 : index
    %c0_121 = arith.constant 0 : index
    %313 = vector.load %arg16[%c0_120, %c0_121] : memref<1x64xf32, #tpu.memory_space<vmem>>, vector<1x64xf32>
    %cst_122 = arith.constant dense<0.000000e+00> : vector<20xf32>
    %314 = vector.multi_reduction <add>, %311, %cst_122 [1] : vector<20x64xf32> to vector<20xf32>
    %315 = vector.shape_cast %314 : vector<20xf32> to vector<20x1xf32>
    %cst_123 = arith.constant 6.400000e+01 : f32
    %316 = vector.broadcast %cst_123 : f32 to vector<20x1xf32>
    %317 = arith.divf %315, %316 : vector<20x1xf32>
    %318 = vector.broadcast %317 : vector<20x1xf32> to vector<20x64xf32>
    %319 = arith.subf %311, %318 : vector<20x64xf32>
    %320 = arith.mulf %319, %319 : vector<20x64xf32>
    %cst_124 = arith.constant dense<0.000000e+00> : vector<20xf32>
    %321 = vector.multi_reduction <add>, %320, %cst_124 [1] : vector<20x64xf32> to vector<20xf32>
    %322 = vector.shape_cast %321 : vector<20xf32> to vector<20x1xf32>
    %cst_125 = arith.constant 6.400000e+01 : f32
    %323 = vector.broadcast %cst_125 : f32 to vector<20x1xf32>
    %324 = arith.divf %322, %323 : vector<20x1xf32>
    %cst_126 = arith.constant 9.99999974E-6 : f32
    %325 = vector.broadcast %cst_126 : f32 to vector<20x1xf32>
    %326 = arith.addf %324, %325 : vector<20x1xf32>
    %327 = math.rsqrt %326 : vector<20x1xf32>
    %328 = vector.broadcast %327 : vector<20x1xf32> to vector<20x64xf32>
    %329 = arith.mulf %319, %328 : vector<20x64xf32>
    %330 = vector.broadcast %312 : vector<1x64xf32> to vector<20x64xf32>
    %331 = arith.mulf %329, %330 : vector<20x64xf32>
    %332 = vector.broadcast %313 : vector<1x64xf32> to vector<20x64xf32>
    %333 = arith.addf %331, %332 : vector<20x64xf32>
    %334 = arith.truncf %333 : vector<20x64xf32> to vector<20x64xbf16>
    %c0_127 = arith.constant 0 : index
    %c0_128 = arith.constant 0 : index
    %335 = vector.load %arg17[%c0_127, %c0_128] : memref<64x256xbf16, #tpu.memory_space<vmem>>, vector<64x256xbf16>
    %cst_129 = arith.constant dense<0.000000e+00> : vector<20x256xf32>
    %336 = tpu.matmul %334, %335, %cst_129 {dimension_numbers = #tpu.dot_dimension_numbers<[1], [0], [0], [1], [0, 0, 1, 1], [], []>} : vector<20x64xbf16>, vector<64x256xbf16>, vector<20x256xf32> -> vector<20x256xf32>
    %c0_130 = arith.constant 0 : index
    %c0_131 = arith.constant 0 : index
    %337 = vector.load %arg18[%c0_130, %c0_131] : memref<1x256xf32, #tpu.memory_space<vmem>>, vector<1x256xf32>
    %338 = vector.broadcast %337 : vector<1x256xf32> to vector<20x256xf32>
    %339 = arith.addf %336, %338 : vector<20x256xf32>
    %cst_132 = arith.constant 5.000000e-01 : f32
    %340 = vector.broadcast %cst_132 : f32 to vector<20x256xf32>
    %341 = arith.mulf %340, %339 : vector<20x256xf32>
    %cst_133 = arith.constant 0.707106769 : f32
    %342 = vector.broadcast %cst_133 : f32 to vector<20x256xf32>
    %343 = arith.mulf %339, %342 : vector<20x256xf32>
    %344 = math.absf %343 : vector<20x256xf32>
    %cst_134 = arith.constant 0.327591091 : f32
    %345 = vector.broadcast %cst_134 : f32 to vector<20x256xf32>
    %346 = arith.mulf %345, %344 : vector<20x256xf32>
    %cst_135 = arith.constant 1.000000e+00 : f32
    %347 = vector.broadcast %cst_135 : f32 to vector<20x256xf32>
    %348 = arith.addf %347, %346 : vector<20x256xf32>
    %cst_136 = arith.constant 1.000000e+00 : f32
    %349 = vector.broadcast %cst_136 : f32 to vector<20x256xf32>
    %350 = arith.divf %349, %348 : vector<20x256xf32>
    %cst_137 = arith.constant 1.06140542 : f32
    %351 = vector.broadcast %cst_137 : f32 to vector<20x256xf32>
    %352 = arith.mulf %351, %350 : vector<20x256xf32>
    %cst_138 = arith.constant -1.45315206 : f32
    %353 = vector.broadcast %cst_138 : f32 to vector<20x256xf32>
    %354 = arith.addf %352, %353 : vector<20x256xf32>
    %355 = arith.mulf %354, %350 : vector<20x256xf32>
    %cst_139 = arith.constant 1.42141378 : f32
    %356 = vector.broadcast %cst_139 : f32 to vector<20x256xf32>
    %357 = arith.addf %355, %356 : vector<20x256xf32>
    %358 = arith.mulf %357, %350 : vector<20x256xf32>
    %cst_140 = arith.constant -0.284496725 : f32
    %359 = vector.broadcast %cst_140 : f32 to vector<20x256xf32>
    %360 = arith.addf %358, %359 : vector<20x256xf32>
    %361 = arith.mulf %360, %350 : vector<20x256xf32>
    %cst_141 = arith.constant 0.254829586 : f32
    %362 = vector.broadcast %cst_141 : f32 to vector<20x256xf32>
    %363 = arith.addf %361, %362 : vector<20x256xf32>
    %364 = arith.mulf %363, %350 : vector<20x256xf32>
    %cst_142 = arith.constant 0.000000e+00 : f32
    %365 = vector.broadcast %cst_142 : f32 to vector<20x256xf32>
    %366 = arith.subf %365, %344 : vector<20x256xf32>
    %367 = arith.mulf %366, %344 : vector<20x256xf32>
    %368 = math.exp %367 : vector<20x256xf32>
    %369 = arith.mulf %364, %368 : vector<20x256xf32>
    %cst_143 = arith.constant 1.000000e+00 : f32
    %370 = vector.broadcast %cst_143 : f32 to vector<20x256xf32>
    %371 = arith.subf %370, %369 : vector<20x256xf32>
    %cst_144 = arith.constant 0.000000e+00 : f32
    %372 = vector.broadcast %cst_144 : f32 to vector<20x256xf32>
    %373 = arith.cmpf oge, %343, %372 : vector<20x256xf32>
    %cst_145 = arith.constant 0.000000e+00 : f32
    %374 = vector.broadcast %cst_145 : f32 to vector<20x256xf32>
    %375 = arith.subf %374, %371 : vector<20x256xf32>
    %376 = arith.select %373, %371, %375 : vector<20x256xi1>, vector<20x256xf32>
    %cst_146 = arith.constant 1.000000e+00 : f32
    %377 = vector.broadcast %cst_146 : f32 to vector<20x256xf32>
    %378 = arith.addf %377, %376 : vector<20x256xf32>
    %379 = arith.mulf %341, %378 : vector<20x256xf32>
    %380 = arith.truncf %379 : vector<20x256xf32> to vector<20x256xbf16>
    %c0_147 = arith.constant 0 : index
    %c0_148 = arith.constant 0 : index
    %381 = vector.load %arg19[%c0_147, %c0_148] : memref<256x64xbf16, #tpu.memory_space<vmem>>, vector<256x64xbf16>
    %cst_149 = arith.constant dense<0.000000e+00> : vector<20x64xf32>
    %382 = tpu.matmul %380, %381, %cst_149 {dimension_numbers = #tpu.dot_dimension_numbers<[1], [0], [0], [1], [0, 0, 1, 1], [], []>} : vector<20x256xbf16>, vector<256x64xbf16>, vector<20x64xf32> -> vector<20x64xf32>
    %c0_150 = arith.constant 0 : index
    %c0_151 = arith.constant 0 : index
    %383 = vector.load %arg20[%c0_150, %c0_151] : memref<1x64xf32, #tpu.memory_space<vmem>>, vector<1x64xf32>
    %384 = vector.broadcast %383 : vector<1x64xf32> to vector<20x64xf32>
    %385 = arith.addf %382, %384 : vector<20x64xf32>
    %386 = arith.addf %311, %385 : vector<20x64xf32>
    %c0_152 = arith.constant 0 : index
    %c0_153 = arith.constant 0 : index
    %387 = vector.load %arg22[%c0_152, %c0_153] : memref<20x64xf32, #tpu.memory_space<vmem>>, vector<20x64xf32>
    tpu.vector_store %arg22[%c0_152, %c0_153], %386 {strides = array<i32>} : memref<20x64xf32, #tpu.memory_space<vmem>>, vector<20x64xf32>,
    %c0_154 = arith.constant 0 : index
    %c0_155 = arith.constant 0 : index
    %388 = tpu.strided_load %arg22[%c0_154, %c0_155] {strides = array<i32: 5, 1>} : memref<20x64xf32, #tpu.memory_space<vmem>>, vector<4x64xf32>
    %c0_156 = arith.constant 0 : index
    %c0_157 = arith.constant 0 : index
    %389 = vector.load %arg23[%c0_156, %c0_157] : memref<20x64xf32, #tpu.memory_space<vmem>>, vector<4x64xf32>
    tpu.vector_store %arg23[%c0_156, %c0_157], %388 {strides = array<i32>} : memref<20x64xf32, #tpu.memory_space<vmem>>, vector<4x64xf32>,
    %c1_158 = arith.constant 1 : index
    %c0_159 = arith.constant 0 : index
    %390 = tpu.strided_load %arg22[%c1_158, %c0_159] {strides = array<i32: 5, 1>} : memref<20x64xf32, #tpu.memory_space<vmem>>, vector<4x64xf32>
    %c4 = arith.constant 4 : index
    %c0_160 = arith.constant 0 : index
    %391 = vector.load %arg23[%c4, %c0_160] : memref<20x64xf32, #tpu.memory_space<vmem>>, vector<4x64xf32>
    tpu.vector_store %arg23[%c4, %c0_160], %390 {strides = array<i32>} : memref<20x64xf32, #tpu.memory_space<vmem>>, vector<4x64xf32>,
    %c2_161 = arith.constant 2 : index
    %c0_162 = arith.constant 0 : index
    %392 = tpu.strided_load %arg22[%c2_161, %c0_162] {strides = array<i32: 5, 1>} : memref<20x64xf32, #tpu.memory_space<vmem>>, vector<4x64xf32>
    %c8 = arith.constant 8 : index
    %c0_163 = arith.constant 0 : index
    %393 = vector.load %arg23[%c8, %c0_163] : memref<20x64xf32, #tpu.memory_space<vmem>>, vector<4x64xf32>
    tpu.vector_store %arg23[%c8, %c0_163], %392 {strides = array<i32>} : memref<20x64xf32, #tpu.memory_space<vmem>>, vector<4x64xf32>,
    %c3_164 = arith.constant 3 : index
    %c0_165 = arith.constant 0 : index
    %394 = tpu.strided_load %arg22[%c3_164, %c0_165] {strides = array<i32: 5, 1>} : memref<20x64xf32, #tpu.memory_space<vmem>>, vector<4x64xf32>
    %c12 = arith.constant 12 : index
    %c0_166 = arith.constant 0 : index
    %395 = vector.load %arg23[%c12, %c0_166] : memref<20x64xf32, #tpu.memory_space<vmem>>, vector<4x64xf32>
    tpu.vector_store %arg23[%c12, %c0_166], %394 {strides = array<i32>} : memref<20x64xf32, #tpu.memory_space<vmem>>, vector<4x64xf32>,
    %c4_167 = arith.constant 4 : index
    %c0_168 = arith.constant 0 : index
    %396 = tpu.strided_load %arg22[%c4_167, %c0_168] {strides = array<i32: 5, 1>} : memref<20x64xf32, #tpu.memory_space<vmem>>, vector<4x64xf32>
    %c16 = arith.constant 16 : index
    %c0_169 = arith.constant 0 : index
    %397 = vector.load %arg23[%c16, %c0_169] : memref<20x64xf32, #tpu.memory_space<vmem>>, vector<4x64xf32>
    tpu.vector_store %arg23[%c16, %c0_169], %396 {strides = array<i32>} : memref<20x64xf32, #tpu.memory_space<vmem>>, vector<4x64xf32>,
    %c0_170 = arith.constant 0 : index
    %c0_171 = arith.constant 0 : index
    %398 = vector.load %arg23[%c0_170, %c0_171] : memref<20x64xf32, #tpu.memory_space<vmem>>, vector<20x64xf32>
    %c0_172 = arith.constant 0 : index
    %c0_173 = arith.constant 0 : index
    %c0_174 = arith.constant 0 : index
    %399 = vector.load %arg21[%c0_172, %c0_173, %c0_174] : memref<1x20x64xf32, #tpu.memory_space<vmem>>, vector<1x20x64xf32>
    %400 = vector.shape_cast %399 : vector<1x20x64xf32> to vector<20x64xf32>
    %401 = vector.shape_cast %398 : vector<20x64xf32> to vector<1x20x64xf32>
    tpu.vector_store %arg21[%c0_172, %c0_173, %c0_174], %401 {strides = array<i32>} : memref<1x20x64xf32, #tpu.memory_space<vmem>>, vector<1x20x64xf32>,
    return
  }
  func.func @transform_0(%arg0: i32) -> (i32, i32, i32) {
    %c0_i32 = arith.constant 0 : i32
    %c0_i32_0 = arith.constant 0 : i32
    %c0_i32_1 = arith.constant 0 : i32
    return %arg0, %c0_i32, %c0_i32_0 : i32, i32, i32
  }
  func.func @transform_1(%arg0: i32) -> (i32, i32, i32, i32) {
    %c0_i32 = arith.constant 0 : i32
    %c0_i32_0 = arith.constant 0 : i32
    %c0_i32_1 = arith.constant 0 : i32
    %c0_i32_2 = arith.constant 0 : i32
    return %arg0, %c0_i32, %c0_i32_0, %c0_i32_1 : i32, i32, i32, i32
  }
  func.func @transform_2(%arg0: i32) -> (i32, i32) {
    %c0_i32 = arith.constant 0 : i32
    %c0_i32_0 = arith.constant 0 : i32
    %c0_i32_1 = arith.constant 0 : i32
    return %c0_i32, %c0_i32_0 : i32, i32
  }
  func.func @transform_3(%arg0: i32) -> (i32, i32) {
    %c0_i32 = arith.constant 0 : i32
    %c0_i32_0 = arith.constant 0 : i32
    %c0_i32_1 = arith.constant 0 : i32
    return %c0_i32, %c0_i32_0 : i32, i32
  }
  func.func @transform_4(%arg0: i32) -> (i32, i32) {
    %c0_i32 = arith.constant 0 : i32
    %c0_i32_0 = arith.constant 0 : i32
    %c0_i32_1 = arith.constant 0 : i32
    return %c0_i32, %c0_i32_0 : i32, i32
  }
  func.func @transform_5(%arg0: i32) -> (i32, i32, i32) {
    %c0_i32 = arith.constant 0 : i32
    %c0_i32_0 = arith.constant 0 : i32
    %c0_i32_1 = arith.constant 0 : i32
    %c0_i32_2 = arith.constant 0 : i32
    return %c0_i32, %c0_i32_0, %c0_i32_1 : i32, i32, i32
  }
  func.func @transform_6(%arg0: i32) -> (i32, i32) {
    %c0_i32 = arith.constant 0 : i32
    %c0_i32_0 = arith.constant 0 : i32
    %c0_i32_1 = arith.constant 0 : i32
    return %c0_i32, %c0_i32_0 : i32, i32
  }
  func.func @transform_7(%arg0: i32) -> (i32, i32) {
    %c0_i32 = arith.constant 0 : i32
    %c0_i32_0 = arith.constant 0 : i32
    %c0_i32_1 = arith.constant 0 : i32
    return %c0_i32, %c0_i32_0 : i32, i32
  }
  func.func @transform_8(%arg0: i32) -> (i32, i32) {
    %c0_i32 = arith.constant 0 : i32
    %c0_i32_0 = arith.constant 0 : i32
    %c0_i32_1 = arith.constant 0 : i32
    return %c0_i32, %c0_i32_0 : i32, i32
  }
  func.func @transform_9(%arg0: i32) -> (i32, i32) {
    %c0_i32 = arith.constant 0 : i32
    %c0_i32_0 = arith.constant 0 : i32
    %c0_i32_1 = arith.constant 0 : i32
    return %c0_i32, %c0_i32_0 : i32, i32
  }
  func.func @transform_10(%arg0: i32) -> (i32, i32) {
    %c0_i32 = arith.constant 0 : i32
    %c0_i32_0 = arith.constant 0 : i32
    %c0_i32_1 = arith.constant 0 : i32
    return %c0_i32, %c0_i32_0 : i32, i32
  }
  func.func @transform_11(%arg0: i32) -> (i32, i32) {
    %c0_i32 = arith.constant 0 : i32
    %c0_i32_0 = arith.constant 0 : i32
    %c0_i32_1 = arith.constant 0 : i32
    return %c0_i32, %c0_i32_0 : i32, i32
  }
  func.func @transform_12(%arg0: i32) -> (i32, i32, i32) {
    %c0_i32 = arith.constant 0 : i32
    %c0_i32_0 = arith.constant 0 : i32
    %c0_i32_1 = arith.constant 0 : i32
    %c0_i32_2 = arith.constant 0 : i32
    return %c0_i32, %c0_i32_0, %c0_i32_1 : i32, i32, i32
  }
  func.func @transform_13(%arg0: i32) -> (i32, i32) {
    %c0_i32 = arith.constant 0 : i32
    %c0_i32_0 = arith.constant 0 : i32
    %c0_i32_1 = arith.constant 0 : i32
    return %c0_i32, %c0_i32_0 : i32, i32
  }
  func.func @transform_14(%arg0: i32) -> (i32, i32) {
    %c0_i32 = arith.constant 0 : i32
    %c0_i32_0 = arith.constant 0 : i32
    %c0_i32_1 = arith.constant 0 : i32
    return %c0_i32, %c0_i32_0 : i32, i32
  }
  func.func @transform_15(%arg0: i32) -> (i32, i32) {
    %c0_i32 = arith.constant 0 : i32
    %c0_i32_0 = arith.constant 0 : i32
    %c0_i32_1 = arith.constant 0 : i32
    return %c0_i32, %c0_i32_0 : i32, i32
  }
  func.func @transform_16(%arg0: i32) -> (i32, i32) {
    %c0_i32 = arith.constant 0 : i32
    %c0_i32_0 = arith.constant 0 : i32
    %c0_i32_1 = arith.constant 0 : i32
    return %c0_i32, %c0_i32_0 : i32, i32
  }
  func.func @transform_17(%arg0: i32) -> (i32, i32) {
    %c0_i32 = arith.constant 0 : i32
    %c0_i32_0 = arith.constant 0 : i32
    %c0_i32_1 = arith.constant 0 : i32
    return %c0_i32, %c0_i32_0 : i32, i32
  }
  func.func @transform_18(%arg0: i32) -> (i32, i32) {
    %c0_i32 = arith.constant 0 : i32
    %c0_i32_0 = arith.constant 0 : i32
    %c0_i32_1 = arith.constant 0 : i32
    return %c0_i32, %c0_i32_0 : i32, i32
  }
  func.func @transform_19(%arg0: i32) -> (i32, i32) {
    %c0_i32 = arith.constant 0 : i32
    %c0_i32_0 = arith.constant 0 : i32
    %c0_i32_1 = arith.constant 0 : i32
    return %c0_i32, %c0_i32_0 : i32, i32
  }
  func.func @transform_20(%arg0: i32) -> (i32, i32, i32) {
    %c0_i32 = arith.constant 0 : i32
    %c0_i32_0 = arith.constant 0 : i32
    %c0_i32_1 = arith.constant 0 : i32
    return %arg0, %c0_i32, %c0_i32_0 : i32, i32, i32
  }
}

</mosaic_0001>

<bundles_post_ra>
// kernel: _lambda_.5
= control target key start
LH: loop header
LB: loop body
LE: loop exit
PB: predicated region body
PF: predicated region fallthrough
CT: control target
= control target key end

     0   :  { %s348_s12 = smov 0   ;;  %s387_s0 = inlined_call_operand.vmem [shape: f32[2,20,64], index: 0, kind: input, shape index: {}]   ;;  %s388_s1 = inlined_call_operand.vmem [shape: f32[1,64], index: 1, kind: input, shape index: {}]   ;;  %s389_s2 = inlined_call_operand.vmem [shape: f32[1,64], index: 2, kind: input, shape index: {}]   ;;  %s390_s3 = inlined_call_operand.vmem [shape: f32[2,20,64], index: 3, kind: output, shape index: {}]  }
   0x1 LB: > { %s294_s13 = sadd.s32 4294967295, %s326_s12   ;;  %p298_p0 = scmp.ge.s32.totalorder %s326_s12, 1  ;;  %s326_s12 = sphi %s348_s12, %s13_s12  }
   0x2   : > { %p137_p1 = scmp.lt.s32.totalorder %s326_s12, 3 }
   0x4   : > { %p138_p2 = pnand %p298_p0, %p137_p1 }
   0x5   : > { %p161_p3 = scmp.lt.s32.totalorder (!%p138_p2), %s294_s13, 1  ;;  %vm176_vm0 = vcmask (!%p138_p2), 523264   ;;  %vm183_vm1 = vcmask (!%p138_p2), 519168   ;;  %v301_v31 = vld [vmem:[%s388_s1] ss:$0 sm:$0xff] (!%p138_p2) }
   0x6   : > { %141 = sbr.rel (%p138_p2) target bundleno = 337 (0x151), region = 32  ;;  %v302_v33 = vld [vmem:[%s389_s2] ss:$0 sm:$0xff] (!%p138_p2) }
   0xd   : > { %s392_s13 = smov (!%p161_p3, %s294_s13), 1 }
   0xe   : > { %s305_s14 = smul.u32 24, %s392_s13 }
  0x10   : > { %s165_s17 = scalar_lea.vmem %s387_s0, %s305_s14  ;;  %s170_s24 = scalar_lea.vmem %s390_s3, %s305_s14 }
  0x11   : > { %v171_v0 = vld [vmem:[%s165_s17] sm:$0xff]  ;;  %v173_v1 = vld [vmem:[%s165_s17 + $0x10] sm:$0xf]  ;;  %v172_v2 = vld [vmem:[%s165_s17 + $0x8] sm:$0xff] }
  0x12   : > { %v177_v3 = vsel %vm176_vm0, %v171_v0, 0.0  ;;  %v184_v4 = vsel %vm183_vm1, %v173_v1, 0.0  ;;  %v180_v5 = vsel %vm176_vm0, %v172_v2, 0.0 }
  0x13   : > { %178 = vadd.xlane.f32.xlu0 %v177_v3  ;;  %185 = vadd.xlane.f32.xlu1 %v184_v4 }
  0x17   : > { %181 = vadd.xlane.f32.xlu0 %v180_v5 }
  0xa0   : > { %v179_v6 = vpop.xlane.xlu0 %178  ;;  %v186_v7 = vpop.xlane.xlu1 %185 }
  0xa1   : > { %v188_v8 = vmul.f32 0.015625, %v179_v6  ;;  %v190_v9 = vmul.f32 0.015625, %v186_v7 }
  0xa3   : > { %v191_v10 = vsub.f32 %v171_v0, %v188_v8  ;;  %v193_v11 = vsub.f32 %v173_v1, %v190_v9 }
  0xa4   : > { %v182_v12 = vpop.xlane.xlu0 %181 }
  0xa5   : > { %v189_v13 = vmul.f32 0.015625, %v182_v12  ;;  %v194_v14 = vmul.f32 %v191_v10, %v191_v10  ;;  %v196_v15 = vmul.f32 %v193_v11, %v193_v11 }
  0xa7   : > { %v192_v16 = vsub.f32 %v172_v2, %v189_v13  ;;  %v197_v17 = vsel %vm176_vm0, %v194_v14, 0.0  ;;  %v203_v18 = vsel %vm183_vm1, %v196_v15, 0.0 }
  0xa8   : > { %198 = vadd.xlane.f32.xlu1 %v197_v17 }
  0xa9   : > { %v195_v19 = vmul.f32 %v192_v16, %v192_v16 }
  0xab   : > { %v200_v20 = vsel %vm176_vm0, %v195_v19, 0.0 }
  0xac   : > { %204 = vadd.xlane.f32.xlu1 %v203_v18  ;;  %201 = vadd.xlane.f32.xlu0 %v200_v20 }
 0x135   : > { %v199_v21 = vpop.xlane.xlu1 %198 }
 0x136   : > { %v206_v22 = vmul.f32 0.015625, %v199_v21 }
 0x138   : > { %v209_v23 = vadd.f32 1e-05, %v206_v22 }
 0x139   : > { %v205_v24 = vpop.xlane.xlu1 %204  ;;  %v202_v25 = vpop.xlane.xlu0 %201 }
 0x13a   : > { %314 = vrsqrt.f32 %v209_v23  ;;  %v208_v26 = vmul.f32 0.015625, %v205_v24  ;;  %v207_v27 = vmul.f32 0.015625, %v202_v25 }
 0x13c   : > { %v211_v28 = vadd.f32 1e-05, %v208_v26  ;;  %v210_v29 = vadd.f32 1e-05, %v207_v27 }
 0x13e   : > { %316 = vrsqrt.f32 %v211_v28 }
 0x13f   : > { %318 = vrsqrt.f32 %v210_v29 }
 0x144   : > { %v315_v30 = vpop.eup %314 }
 0x145   : > { %v215_v32 = vmul.f32 %v315_v30, %v191_v10 }
 0x147   : > { %v224_v34 = vmul.f32 %v301_v31, %v215_v32 }
 0x148   : > { %v317_v35 = vpop.eup %316 }
 0x149   : > { %v319_v36 = vpop.eup %318  ;;  %v233_v37 = vadd.f32 %v302_v33, %v224_v34  ;;  %v217_v38 = vmul.f32 %v317_v35, %v193_v11 }
 0x14a   : > { %v216_v39 = vmul.f32 %v319_v36, %v192_v16 }
 0x14b   : > { %236 = vst.msk [vmem:[%s170_s24] sm:$0xff] %vm176_vm0, %v233_v37  ;;  %v226_v40 = vmul.f32 %v301_v31, %v217_v38 }
 0x14c   : > { %v225_v41 = vmul.f32 %v301_v31, %v216_v39 }
 0x14d   : > { %v235_v42 = vadd.f32 %v302_v33, %v226_v40 }
 0x14e   : > { %v234_v43 = vadd.f32 %v302_v33, %v225_v41 }
 0x14f   : > { %238 = vst.msk [vmem:[%s170_s24 + $0x10] sm:$0xf] %vm183_vm1, %v235_v42 }
 0x150   : > { %237 = vst.msk [vmem:[%s170_s24 + $0x8] sm:$0xff] %vm176_vm0, %v234_v43 }
 0x151 PF: > { %s13_s12 = sadd.s32 1, %s326_s12  }
 0x152   : > { %p10_p4 = scmp.ge.s32.totalorder %s13_s12, 4  }
 0x154   :  { %12 = sbr.rel (!%p10_p4) target bundleno = 1 (0x1), region = 62 }

// kernel: _lambda_.3
= control target key start
LH: loop header
LB: loop body
LE: loop exit
PB: predicated region body
PF: predicated region fallthrough
CT: control target
= control target key end

     0   :  { %s10739_s0 = inlined_call_operand.vmem [shape: f32[2,20,64], index: 0, kind: input, shape index: {}]   ;;  %s10740_s1 = inlined_call_operand.vmem [shape: f32[2,4,1,5], index: 1, kind: input, shape index: {}]   ;;  %s10741_s2 = inlined_call_operand.vmem [shape: f32[1,64], index: 2, kind: input, shape index: {}]   ;;  %s10742_s3 = inlined_call_operand.vmem [shape: f32[1,64], index: 3, kind: input, shape index: {}]   ;;  %s10743_s4 = inlined_call_operand.vmem [shape: bf16[64,192], index: 4, kind: input, shape index: {}]   ;;  %s10744_s5 = inlined_call_operand.vmem [shape: bf16[4,16,64], index: 5, kind: input, shape index: {}]   ;;  %s10745_s6 = inlined_call_operand.vmem [shape: f32[1,64], index: 6, kind: input, shape index: {}]   ;;  %s10746_s7 = inlined_call_operand.vmem [shape: bf16[64,64], index: 7, kind: input, shape index: {}]   ;;  %s10747_s8 = inlined_call_operand.vmem [shape: f32[1,64], index: 8, kind: input, shape index: {}]   ;;  %s10748_s9 = inlined_call_operand.vmem [shape: f32[1,64], index: 9, kind: input, shape index: {}]   ;;  %s10749_s10 = inlined_call_operand.vmem [shape: f32[1,64], index: 10, kind: input, shape index: {}]   ;;  %s10750_s11 = inlined_call_operand.vmem [shape: bf16[64,192], index: 11, kind: input, shape index: {}]   ;;  %s10751_s12 = inlined_call_operand.vmem [shape: bf16[4,16,64], index: 12, kind: input, shape index: {}]   ;;  %s10752_s13 = inlined_call_operand.vmem [shape: f32[1,64], index: 13, kind: input, shape index: {}]   ;;  %s10753_s14 = inlined_call_operand.vmem [shape: f32[1,64], index: 14, kind: input, shape index: {}]   ;;  %s10754_s15 = inlined_call_operand.vmem [shape: f32[1,64], index: 15, kind: input, shape index: {}]   ;;  %s10755_s16 = inlined_call_operand.vmem [shape: bf16[64,256], index: 16, kind: input, shape index: {}]   ;;  %s10756_s17 = inlined_call_operand.vmem [shape: f32[1,256], index: 17, kind: input, shape index: {}]   ;;  %s10757_s18 = inlined_call_operand.vmem [shape: bf16[256,64], index: 18, kind: input, shape index: {}]   ;;  %s10758_s19 = inlined_call_operand.vmem [shape: f32[1,64], index: 19, kind: input, shape index: {}]   ;;  %s10759_s20 = inlined_call_operand.vmem [shape: f32[2,20,64], index: 20, kind: output, shape index: {}]  }
   0x1   :  { %10772 = sst [smem:[#allocation4_spill]] %s10739_s0 }
   0x2   :  { %10773 = sst [smem:[#allocation5_spill]] %s10740_s1  ;;  %s9319_s1 = smov 0  }
   0x3   :  { %10774 = sst [smem:[#allocation6_spill]] %s10741_s2 }
   0x4   :  { %10775 = sst [smem:[#allocation7_spill]] %s10742_s3 }
   0x5   :  { %10776 = sst [smem:[#allocation8_spill]] %s10743_s4 }
   0x6 LB: > { %s8023_s22 = sadd.s32 4294967295, %s9200_s1   ;;  %p8027_p0 = scmp.ge.s32.totalorder %s9200_s1, 1  ;;  %s9200_s1 = sphi %s9319_s1, %s30_s1  }
   0x7   : > { %p571_p1 = scmp.lt.s32.totalorder %s9200_s1, 3 }
   0x9   : > { %p572_p2 = pnand %p8027_p0, %p571_p1 }
   0xa   : > { %p633_p3 = scmp.lt.s32.totalorder (!%p572_p2), %s8023_s22, 1  ;;  %vm653_vm0 = vcmask (!%p572_p2), 523264   ;;  %vm660_vm1 = vcmask (!%p572_p2), 519168   ;;  %s10777_s25 = sld [smem:[#allocation4_spill]] (!%p572_p2)  ;;  %v9202_v25 = vmov (!%p572_p2), 0   ;;  %v9203_v55 = vmov (!%p572_p2), 0.0  }
   0xb   : > { %575 = sbr.rel (%p572_p2) target bundleno = 8683 (0x21eb), region = 100  ;;  %s10778_s28 = sld [smem:[#allocation8_spill]] (!%p572_p2)  ;;  %801 = vmatprep.mubr.bf16.mxu0 (!%p572_p2), %v9202_v25  ;;  %8427 = vmatprep.subr.bf16.mxu1 (!%p572_p2), %v9203_v55  ;;  %vm9204_vm2 = vmmov (!%p572_p2), 0   ;;  %vm845_vm3 = vcmask (!%p572_p2), 130048   ;;  %vm1153_vm4 = vcmask (!%p572_p2), 1041408   ;;  %vm1088_vm5 = vcmask (!%p572_p2), 27648  }
   0xc   : > { %s10779_s2 = sld [smem:[#allocation6_spill]] (!%p572_p2)  ;;  %s10780_s27 = sld [smem:[#allocation7_spill]] (!%p572_p2)  ;;  %8429 = vmatprep.mubr.msk.bf16.mxu1 (!%p572_p2), %vm9204_vm2, %v9203_v55  ;;  %vm1149_vm6 = vcmask (!%p572_p2), 31744   ;;  %vm3445_vm7 = vcmask (!%p572_p2), 520192   ;;  %vm4480_vm8 = vcmask (!%p572_p2), 1042432   ;;  %vm4427_vm9 = vcmask (!%p572_p2), 36864  }
   0xd   : > { %s9205_s4 = smov (!%p572_p2), 64   ;;  %s9206_s29 = smov (!%p572_p2), 48   ;;  %vm4476_vm10 = vcmask (!%p572_p2), 39936  }
   0xe   : > { %s10770_s30 = smov (!%p572_p2), 112   ;;  %s10768_s0 = smov (!%p572_p2), 32  }
   0xf   : > { %s10766_s21 = smov (!%p572_p2), 96   ;;  %s10762_s24 = smov (!%p572_p2), 80  }
  0x10   : > { %s10781_s26 = sld [smem:[#allocation5_spill]] (!%p572_p2) }
  0x11   : > { %v8934_v21 = vld [vmem:[%s10778_s28 + $0x4] ss:$8 sps:$4 sm:$0xff] (!%p572_p2)   ;;  %v8936_v22 = vld [vmem:[%s10778_s28] ss:$8 sps:$4 sm:$0xff] (!%p572_p2)   ;;  %v8937_v23 = vld [vmem:[%s10778_s28 + $0x14] ss:$8 sps:$4 sm:$0xff] (!%p572_p2)  }
  0x12   : > { %s10789_s22 = smov (!%p633_p3, %s8023_s22), 1  ;;  %769 = vmatprep.subr.bf16.mxu0 %v8934_v21  ;;  %v8939_v24 = vld [vmem:[%s10778_s28 + $0x10] ss:$8 sps:$4 sm:$0xff]   ;;  %v8940_v26 = vld [vmem:[%s10778_s28 + $0x24] ss:$8 sps:$4 sm:$0xff]  }
  0x13   : > { %s10761_s23 = smul.u32 24, %s10789_s22  ;;  %770 = vmatpush1.bf16.msra.mxu0 %v8936_v22  ;;  %v8942_v27 = vld [vmem:[%s10778_s28 + $0x20] ss:$8 sps:$4 sm:$0xff]   ;;  %v8943_v28 = vld [vmem:[%s10778_s28 + $0x34] ss:$8 sps:$4 sm:$0xff]  }
  0x14   : > { %771 = vmatprep.subr.bf16.mxu0 %v8937_v23  ;;  %v8945_v29 = vld [vmem:[%s10778_s28 + $0x30] ss:$8 sps:$4 sm:$0xff]   ;;  %v8031_v41 = vld [vmem:[%s10779_s2] ss:$0 sm:$0xff] }
  0x15   : > { %s9335_s3 = scalar_lea.vmem %s10777_s25, %s10761_s23  ;;  %v8032_v46 = vld [vmem:[%s10780_s27] ss:$0 sm:$0xff]  ;;  %s10764_s27 = smov 16  }
  0x16   : > { %v648_v0 = vld [vmem:[%s9335_s3] sm:$0xff]  ;;  %v650_v1 = vld [vmem:[%s9335_s3 + $0x10] sm:$0xf]  ;;  %v649_v2 = vld [vmem:[%s9335_s3 + $0x8] sm:$0xff]  ;;  %s10782_s25 = smov 112   ;;  %s10784_s23 = smov 96  }
  0x17   : > { %v654_v3 = vsel %vm653_vm0, %v648_v0, 0.0  ;;  %v661_v4 = vsel %vm660_vm1, %v650_v1, 0.0  ;;  %v657_v5 = vsel %vm653_vm0, %v649_v2, 0.0  ;;  %772 = vmatpush1.bf16.msra.mxu0 %v8939_v24 }
  0x18   : > { %655 = vadd.xlane.f32.xlu0 %v654_v3  ;;  %662 = vadd.xlane.f32.xlu1 %v661_v4 }
  0x19   : > { %773 = vmatprep.subr.bf16.mxu0 %v8940_v26 }
  0x1b   : > { %774 = vmatpush1.bf16.msra.mxu0 %v8942_v27 }
  0x1c   : > { %658 = vadd.xlane.f32.xlu0 %v657_v5  ;;  %775 = vmatprep.subr.bf16.mxu0 %v8943_v28 }
  0x1f   : > { %776 = vmatpush1.bf16.msra.mxu0 %v8945_v29 }
  0x20   : > { %8421 = vmatprep.subr.bf16.mxu0 %v9203_v55 }
  0xa5   : > { %v656_v6 = vpop.xlane.xlu0 %655  ;;  %v663_v7 = vpop.xlane.xlu1 %662 }
  0xa6   : > { %v665_v8 = vmul.f32 0.015625, %v656_v6  ;;  %v667_v9 = vmul.f32 0.015625, %v663_v7 }
  0xa8   : > { %v668_v10 = vsub.f32 %v648_v0, %v665_v8  ;;  %v670_v11 = vsub.f32 %v650_v1, %v667_v9 }
  0xa9   : > { %v659_v12 = vpop.xlane.xlu0 %658 }
  0xaa   : > { %v666_v13 = vmul.f32 0.015625, %v659_v12  ;;  %v671_v14 = vmul.f32 %v668_v10, %v668_v10  ;;  %v673_v15 = vmul.f32 %v670_v11, %v670_v11 }
  0xac   : > { %v669_v16 = vsub.f32 %v649_v2, %v666_v13  ;;  %v674_v17 = vsel %vm653_vm0, %v671_v14, 0.0  ;;  %v680_v18 = vsel %vm660_vm1, %v673_v15, 0.0 }
  0xad   : > { %675 = vadd.xlane.f32.xlu1 %v674_v17 }
  0xae   : > { %v672_v19 = vmul.f32 %v669_v16, %v669_v16 }
  0xb0   : > { %v677_v20 = vsel %vm653_vm0, %v672_v19, 0.0 }
  0xb1   : > { %681 = vadd.xlane.f32.xlu1 %v680_v18  ;;  %678 = vadd.xlane.f32.xlu0 %v677_v20 }
 0x13a   : > { %v676_v30 = vpop.xlane.xlu1 %675 }
 0x13b   : > { %v683_v31 = vmul.f32 0.015625, %v676_v30 }
 0x13d   : > { %v686_v32 = vadd.f32 1e-05, %v683_v31 }
 0x13e   : > { %v682_v33 = vpop.xlane.xlu1 %681  ;;  %v679_v34 = vpop.xlane.xlu0 %678 }
 0x13f   : > { %8998 = vrsqrt.f32 %v686_v32  ;;  %v685_v35 = vmul.f32 0.015625, %v682_v33  ;;  %v684_v36 = vmul.f32 0.015625, %v679_v34 }
 0x141   : > { %v688_v37 = vadd.f32 1e-05, %v685_v35  ;;  %v687_v38 = vadd.f32 1e-05, %v684_v36 }
 0x143   : > { %9000 = vrsqrt.f32 %v688_v37 }
 0x144   : > { %9002 = vrsqrt.f32 %v687_v38 }
 0x149   : > { %v8999_v39 = vpop.eup %8998 }
 0x14a   : > { %v692_v40 = vmul.f32 %v8999_v39, %v668_v10 }
 0x14c   : > { %v701_v45 = vmul.f32 %v8031_v41, %v692_v40 }
 0x14d   : > { %v9001_v42 = vpop.eup %9000 }
 0x14e   : > { %v9003_v43 = vpop.eup %9002  ;;  %v694_v48 = vmul.f32 %v9001_v42, %v670_v11  ;;  %v710_v49 = vadd.f32 %v8032_v46, %v701_v45 }
 0x14f   : > { %v693_v44 = vmul.f32 %v9003_v43, %v669_v16 }
 0x150   : > { %v703_v52 = vmul.f32 %v8031_v41, %v694_v48 }
 0x151   : > { %v702_v47 = vmul.f32 %v8031_v41, %v693_v44 }
 0x152   : > { %v712_v53 = vadd.f32 %v8032_v46, %v703_v52 }
 0x153   : > { %v711_v50 = vadd.f32 %v8032_v46, %v702_v47 }
 0x154   : > { %v714_v54 = vpack.c.bf16 %v712_v53, %v712_v53 }
 0x155   : > { %v713_v51 = vpack.c.bf16 %v711_v50, %v710_v49 }
 0x157   : > { %8041 = vmatmul.mubr.msk.bf16.vlgmr.msra.gmra.mrb[0].mxu0 %vm653_vm0, %v713_v51 }
 0x158   : > { %811 = vmatprep.mubr.bf16.mxu0 %v9202_v25 }
 0x15f   : > { %8042 = vmatmul.mubr.msk.bf16.gmra.mrb[4].mxu0 %vm653_vm0, %v714_v54 }
 0x160   : > { %8423 = vmatprep.mubr.msk.bf16.mxu0 %vm9204_vm2, %v9203_v55 }
 0x22a   : > { %v803_v56 = vpop.f32.mrb[0].mxu0 }
 0x22b   : > { %v822_v57 = vcombine.high %v803_v56, %v803_v56  ;;  %v9386_v58 = vpack.c.bf16 %v803_v56, %v803_v56  ;;  %v805_v59 = vpop.f32.mrb[1].mxu0 }
 0x22c   : > { %v807_v60 = vpop.f32.mrb[2].mxu0  ;;  %v9426_v15 = vpack.c.bf16 %v805_v59, %v805_v59  ;;  %v833_v17 = vcombine.high %v805_v59, %v805_v59 }
 0x22d   : > { %v9388_v61 = vpack.c.bf16 %v822_v57, %v822_v57  ;;  %843 = vrot.lane.b32.xlu0 %v9386_v58, %s9205_s4  ;;  %v9392_v62 = vpop.f32.mrb[3].mxu0  ;;  %v823_v63 = vcombine.high %v807_v60, %v807_v60  ;;  %v9396_v0 = vpack.c.bf16 %v807_v60, %v807_v60 }
 0x22e   : > { %v1155_v19 = vsel %vm1153_vm4, %v9426_v15, 0  ;;  %v9441_v20 = vpack.c.bf16 %v833_v17, %v833_v17 }
 0x22f   : > { %893 = vrot.lane.b32.xlu1 %v9388_v61, %s9205_s4  ;;  %v9404_v5 = vpack.c.bf16 %v823_v63, %v823_v63 }
 0x230   : > { %v1201_v21 = vsel %vm1153_vm4, %v9441_v20, 0 }
 0x232   : > { %v813_v1 = vpop.f32.mrb[4].mxu0 }
 0x233   : > { %v9398_v2 = vpack.c.bf16 %v813_v1, %v813_v1  ;;  %942 = vrot.lane.b32.xlu1 %v9396_v0, %s9205_s4  ;;  %v9402_v3 = vpop.f32.mrb[5].mxu0 }
 0x234   : > { %v817_v4 = vpop.f32.mrb[6].mxu0 }
 0x235   : > { %1040 = vrot.lane.b32.xlu0 %v9398_v2, %s9205_s4  ;;  %v818_v6 = vpop.f32.mrb[7].mxu0 }
 0x237   : > { %991 = vrot.lane.b32.xlu1 %v9404_v5, %s9205_s4 }
 0x29f   : > { %v844_v7 = vpop.permute.xlu0 %843 }
 0x2a0   : > { %v850_v8 = vsel %vm845_vm3, %v844_v7, 0 }
 0x2a1   : > { %8422 = vmatpush3.bf16.xpose.msra.mxu0 %v850_v8  ;;  %v894_v9 = vpop.permute.xlu1 %893 }
 0x2a2   : > { %v899_v10 = vsel %vm845_vm3, %v894_v9, 0  ;;  %8439 = vmatprep.subr.bf16.mxu0 %v9203_v55 }
 0x2a3   : > { %8428 = vmatpush3.bf16.xpose.msra.mxu1 %v899_v10 }
 0x2a4   : > { %8433 = vmatprep.subr.bf16.mxu1 %v9203_v55 }
 0x2a5   : > { %v943_v11 = vpop.permute.xlu1 %942 }
 0x2a6   : > { %v948_v13 = vsel %vm845_vm3, %v943_v11, 0 }
 0x2a7   : > { %v1041_v16 = vpop.permute.xlu0 %1040 }
 0x2a8   : > { %8424 = vmatmul.mubr.msk.bf16.vlgmr.msra.gmra.mrb[8].mxu0 %vm845_vm3, %v9386_v58  ;;  %v1046_v18 = vsel %vm845_vm3, %v1041_v16, 0 }
 0x2a9   : > { %v992_v12 = vpop.permute.xlu1 %991  ;;  %8441 = vmatprep.mubr.msk.bf16.mxu0 %vm9204_vm2, %v9203_v55 }
 0x2aa   : > { %v997_v14 = vsel %vm845_vm3, %v992_v12, 0  ;;  %8430 = vmatmul.mubr.msk.bf16.vlgmr.msra.gmra.mrb[0].mxu1 %vm845_vm3, %v9388_v61 }
 0x2ab   : > { %8434 = vmatpush3.bf16.xpose.msra.mxu1 %v948_v13  ;;  %8440 = vmatpush3.bf16.xpose.msra.mxu0 %v997_v14 }
 0x2ac   : > { %8435 = vmatprep.mubr.msk.bf16.mxu1 %vm9204_vm2, %v9203_v55  ;;  %8445 = vmatprep.subr.bf16.mxu1 %v9203_v55 }
 0x2ad   : > { %8451 = vmatprep.subr.bf16.mxu0 %v9203_v55 }
 0x2b2   : > { %8436 = vmatmul.mubr.msk.bf16.vlgmr.msra.gmra.mrb[4].mxu1 %vm845_vm3, %v9396_v0  ;;  %8442 = vmatmul.mubr.msk.bf16.vlgmr.msra.gmra.mrb[12].mxu0 %vm845_vm3, %v9404_v5 }
 0x2b3   : > { %8446 = vmatpush3.bf16.xpose.msra.mxu1 %v1046_v18  ;;  %8452 = vmatpush3.bf16.msra.mxu0 %v1155_v19 }
 0x2b4   : > { %8447 = vmatprep.mubr.msk.bf16.mxu1 %vm9204_vm2, %v9203_v55  ;;  %8457 = vmatprep.subr.bf16.mxu1 %v9203_v55 }
 0x2b5   : > { %8453 = vmatprep.mubr.msk.bf16.mxu0 %vm9204_vm2, %v9203_v55  ;;  %8463 = vmatprep.subr.bf16.mxu0 %v9203_v55 }
 0x2ba   : > { %8448 = vmatmul.mubr.msk.bf16.vlgmr.msra.gmra.mrb[8].mxu1 %vm845_vm3, %v9398_v2 }
 0x2bb   : > { %8458 = vmatpush3.bf16.msra.mxu1 %v1201_v21  ;;  %8459 = vmatprep.mubr.msk.bf16.mxu1 %vm9204_vm2, %v9203_v55  ;;  %v834_v21 = vcombine.high %v9392_v62, %v9392_v62 }
 0x2bc   : > { %8469 = vmatprep.subr.bf16.mxu1 %v9203_v55 }
 0x37b   : > { %v886_v22 = vpop.f32.mrb[8].mxu0 }
 0x37c   : > { %v8425_v23 = vpop.f32.mrb[9].mxu0  ;;  %v1089_v24 = vsel %vm1088_vm5, %v886_v22, -inf }
 0x37d   : > { %v935_v26 = vpop.f32.mrb[0].mxu1  ;;  %1090 = vmax.xlane.f32.xlu1 %v1089_v24  ;;  %v889_v27 = vpop.f32.mrb[10].mxu0  ;;  %v9484_v24 = vpack.c.bf16 %v9392_v62, %v9392_v62 }
 0x37e   : > { %v8426_v28 = vpop.f32.mrb[11].mxu0  ;;  %v8431_v29 = vpop.f32.mrb[1].mxu1  ;;  %v1092_v30 = vsel %vm1088_vm5, %v935_v26, -inf }
 0x37f   : > { %v938_v31 = vpop.f32.mrb[2].mxu1  ;;  %1093 = vmax.xlane.f32.xlu0 %v1092_v30  ;;  %v9486_v28 = vpack.c.bf16 %v834_v21, %v834_v21 }
 0x380   : > { %v8432_v32 = vpop.f32.mrb[3].mxu1 }
 0x381   : > { %v1247_v32 = vsel %vm1153_vm4, %v9484_v24, 0  ;;  %v1293_v62 = vsel %vm1153_vm4, %v9486_v28, 0 }
 0x385   : > { %v984_v33 = vpop.f32.mrb[4].mxu1  ;;  %v1033_v34 = vpop.f32.mrb[12].mxu0 }
 0x386   : > { %v8437_v35 = vpop.f32.mrb[5].mxu1  ;;  %v8443_v36 = vpop.f32.mrb[13].mxu0  ;;  %v1095_v37 = vsel %vm1088_vm5, %v984_v33, -inf  ;;  %v1098_v42 = vsel %vm1088_vm5, %v1033_v34, -inf }
 0x387   : > { %v987_v38 = vpop.f32.mrb[6].mxu1  ;;  %1096 = vmax.xlane.f32.xlu0 %v1095_v37  ;;  %v1036_v39 = vpop.f32.mrb[14].mxu0  ;;  %v9502_v37 = vpack.c.bf16 %v9402_v3, %v9402_v3 }
 0x388   : > { %v8438_v40 = vpop.f32.mrb[7].mxu1  ;;  %v8444_v41 = vpop.f32.mrb[15].mxu0 }
 0x38b   : > { %1099 = vmax.xlane.f32.xlu0 %v1098_v42  ;;  %v1339_v42 = vsel %vm1153_vm4, %v9502_v37, 0 }
 0x38d   : > { %v1082_v43 = vpop.f32.mrb[8].mxu1 }
 0x38e   : > { %v8449_v44 = vpop.f32.mrb[9].mxu1  ;;  %v1101_v45 = vsel %vm1088_vm5, %v1082_v43, -inf }
 0x38f   : > { %v1085_v46 = vpop.f32.mrb[10].mxu1  ;;  %1102 = vmax.xlane.f32.xlu1 %v1101_v45 }
 0x390   : > { %v8450_v47 = vpop.f32.mrb[11].mxu1 }
 0x40a   : > { %v1091_v48 = vpop.xlane.xlu1 %1090 }
 0x40b   : > { %v1104_v49 = vsub.f32 %v886_v22, %v1091_v48 }
 0x40c   : > { %v1094_v50 = vpop.xlane.xlu0 %1093 }
 0x40d   : > { %v1109_v51 = vmul.f32 1.442695, %v1104_v49  ;;  %v1105_v52 = vsub.f32 %v935_v26, %v1094_v50 }
 0x40f   : > { %9004 = vpow2.f32 %v1109_v51  ;;  %v1111_v53 = vmul.f32 1.442695, %v1105_v52 }
 0x411   : > { %9006 = vpow2.f32 %v1111_v53 }
 0x414   : > { %v1097_v54 = vpop.xlane.xlu0 %1096 }
 0x415   : > { %v1106_v56 = vsub.f32 %v984_v33, %v1097_v54 }
 0x417   : > { %v1113_v57 = vmul.f32 1.442695, %v1106_v56 }
 0x418   : > { %v1100_v59 = vpop.xlane.xlu0 %1099 }
 0x419   : > { %v9005_v60 = vpop.eup %9004  ;;  %9008 = vpow2.f32 %v1113_v57  ;;  %v1107_v63 = vsub.f32 %v1033_v34, %v1100_v59 }
 0x41a   : > { %v1119_v1 = vsel %vm1088_vm5, %v9005_v60, 0.0 }
 0x41b   : > { %v9007_v4 = vpop.eup %9006  ;;  %v1115_v6 = vmul.f32 1.442695, %v1107_v63  ;;  %1120 = vadd.xlane.f32.xlu0 %v1119_v1 }
 0x41c   : > { %v1103_v7 = vpop.xlane.xlu1 %1102  ;;  %v1122_v8 = vsel %vm1088_vm5, %v9007_v4, 0.0 }
 0x41d   : > { %9010 = vpow2.f32 %v1115_v6  ;;  %v1108_v9 = vsub.f32 %v1082_v43, %v1103_v7  ;;  %1123 = vadd.xlane.f32.xlu1 %v1122_v8 }
 0x41f   : > { %v1117_v10 = vmul.f32 1.442695, %v1108_v9 }
 0x421   : > { %9012 = vpow2.f32 %v1117_v10 }
 0x423   : > { %v9009_v11 = vpop.eup %9008 }
 0x424   : > { %v1125_v12 = vsel %vm1088_vm5, %v9009_v11, 0.0 }
 0x425   : > { %1126 = vadd.xlane.f32.xlu0 %v1125_v12 }
 0x427   : > { %v9011_v13 = vpop.eup %9010 }
 0x428   : > { %v1128_v14 = vsel %vm1088_vm5, %v9011_v13, 0.0 }
 0x429   : > { %1129 = vadd.xlane.f32.xlu1 %v1128_v14 }
 0x42b   : > { %v9013_v16 = vpop.eup %9012 }
 0x42c   : > { %v1131_v17 = vsel %vm1088_vm5, %v9013_v16, 0.0 }
 0x42d   : > { %1132 = vadd.xlane.f32.xlu0 %v1131_v17 }
 0x43a   : > { %1395 = vrot.lane.b32.xlu1 %v9386_v58, %s9206_s29 }
 0x43e   : > { %1393 = vrot.lane.b32.xlu1 %v9386_v58, %s10770_s30 }
 0x442   : > { %1495 = vrot.lane.b32.xlu1 %v9396_v0, %s9206_s29 }
 0x443   : > { %1445 = vrot.lane.b32.xlu0 %v9388_v61, %s9206_s29 }
 0x446   : > { %1443 = vrot.lane.b32.xlu1 %v9388_v61, %s10770_s30 }
 0x447   : > { %1545 = vrot.lane.b32.xlu0 %v9404_v5, %s9206_s29 }
 0x44a   : > { %1493 = vrot.lane.b32.xlu1 %v9396_v0, %s10770_s30 }
 0x44b   : > { %1595 = vrot.lane.b32.xlu0 %v9398_v2, %s9206_s29 }
 0x44e   : > { %1543 = vrot.lane.b32.xlu1 %v9404_v5, %s10770_s30 }
 0x44f   : > { %1593 = vrot.lane.b32.xlu0 %v9398_v2, %s10770_s30 }
 0x4a8   : > { %v1121_v18 = vpop.xlane.xlu0 %1120 }
 0x4a9   : > { %9014 = vrcp.f32 %v1121_v18 }
 0x4aa   : > { %v1124_v19 = vpop.xlane.xlu1 %1123 }
 0x4ab   : > { %9016 = vrcp.f32 %v1124_v19 }
 0x4b2   : > { %v1127_v22 = vpop.xlane.xlu0 %1126 }
 0x4b3   : > { %v9015_v23 = vpop.eup %9014  ;;  %9018 = vrcp.f32 %v1127_v22 }
 0x4b4   : > { %v1139_v26 = vmul.f32 %v9015_v23, %v9005_v60 }
 0x4b5   : > { %v9017_v27 = vpop.eup %9016 }
 0x4b6   : > { %v1130_v29 = vpop.xlane.xlu1 %1129  ;;  %v1144_v30 = vpack.c.bf16 %v1139_v26, %v1139_v26  ;;  %v1140_v31 = vmul.f32 %v9017_v27, %v9007_v4 }
 0x4b7   : > { %9020 = vrcp.f32 %v1130_v29 }
 0x4b8   : > { %8454 = vmatmul.mubr.msk.bf16.vlgmr.msra.gmra.mrb[16].mxu0 %vm1149_vm6, %v1144_v30  ;;  %v1145_v33 = vpack.c.bf16 %v1140_v31, %v1140_v31 }
 0x4b9   : > { %8464 = vmatpush3.bf16.msra.mxu0 %v1247_v32  ;;  %8465 = vmatprep.mubr.msk.bf16.mxu0 %vm9204_vm2, %v9203_v55 }
 0x4ba   : > { %8460 = vmatmul.mubr.msk.bf16.vlgmr.msra.gmra.mrb[12].mxu1 %vm1149_vm6, %v1145_v33  ;;  %v1133_v34 = vpop.xlane.xlu0 %1132  ;;  %8475 = vmatprep.subr.bf16.mxu0 %v9203_v55  ;;  %v1396_v35 = vpop.permute.xlu1 %1395 }
 0x4bb   : > { %8470 = vmatpush3.bf16.msra.mxu1 %v1293_v62  ;;  %9022 = vrcp.f32 %v1133_v34  ;;  %8471 = vmatprep.mubr.msk.bf16.mxu1 %vm9204_vm2, %v9203_v55  ;;  %v1401_v3 = vsel %vm845_vm3, %v1396_v35, 0 }
 0x4bc   : > { %8481 = vmatprep.subr.bf16.mxu1 %v9203_v55 }
 0x4bd   : > { %v9019_v36 = vpop.eup %9018 }
 0x4be   : > { %v1141_v38 = vmul.f32 %v9019_v36, %v9009_v11  ;;  %v1394_v41 = vpop.permute.xlu1 %1393  ;;  %v1446_v47 = vpop.permute.xlu0 %1445 }
 0x4bf   : > { %v1451_v50 = vsel %vm845_vm3, %v1446_v47, 0 }
 0x4c0   : > { %v1146_v39 = vpack.c.bf16 %v1141_v38, %v1141_v38 }
 0x4c1   : > { %v9021_v40 = vpop.eup %9020 }
 0x4c2   : > { %8466 = vmatmul.mubr.msk.bf16.vlgmr.msra.gmra.mrb[20].mxu0 %vm1149_vm6, %v1146_v39  ;;  %v1142_v43 = vmul.f32 %v9021_v40, %v9011_v13  ;;  %v1496_v48 = vpop.permute.xlu1 %1495  ;;  %v1546_v51 = vpop.permute.xlu0 %1545 }
 0x4c3   : > { %8476 = vmatpush3.bf16.msra.mxu0 %v1339_v42  ;;  %8477 = vmatprep.mubr.msk.bf16.mxu0 %vm9204_vm2, %v9203_v55  ;;  %v1501_v52 = vsel %vm845_vm3, %v1496_v48, 0  ;;  %v1551_v54 = vsel %vm845_vm3, %v1546_v51, 0 }
 0x4c4   : > { %v1147_v44 = vpack.c.bf16 %v1142_v43, %v1142_v43  ;;  %8487 = vmatprep.subr.bf16.mxu0 %v9203_v55 }
 0x4c5   : > { %v9023_v45 = vpop.eup %9022 }
 0x4c6   : > { %8472 = vmatmul.mubr.msk.bf16.vlgmr.msra.gmra.mrb[16].mxu1 %vm1149_vm6, %v1147_v44  ;;  %v1143_v46 = vmul.f32 %v9023_v45, %v9013_v16  ;;  %v1444_v53 = vpop.permute.xlu1 %1443  ;;  %v1596_v56 = vpop.permute.xlu0 %1595 }
 0x4c7   : > { %8482 = vmatpush3.bf16.xpose.msra.mxu1 %v1401_v3  ;;  %8483 = vmatprep.mubr.msk.bf16.mxu1 %vm9204_vm2, %v9203_v55  ;;  %v1601_v59 = vsel %vm845_vm3, %v1596_v56, 0 }
 0x4c8   : > { %v1148_v49 = vpack.c.bf16 %v1143_v46, %v1143_v46  ;;  %8493 = vmatprep.subr.bf16.mxu1 %v9203_v55 }
 0x4ca   : > { %8478 = vmatmul.mubr.msk.bf16.vlgmr.msra.gmra.mrb[24].mxu0 %vm1149_vm6, %v1148_v49  ;;  %v1494_v57 = vpop.permute.xlu1 %1493  ;;  %v1594_v63 = vpop.permute.xlu0 %1593 }
 0x4cb   : > { %8489 = vmatprep.mubr.msk.bf16.mxu0 %vm9204_vm2, %v9203_v55 }
 0x4cc   : > { %8488 = vmatpush3.bf16.xpose.msra.mxu0 %v1451_v50 }
 0x4cd   : > { %8499 = vmatprep.subr.bf16.mxu0 %v9203_v55 }
 0x4ce   : > { %8484 = vmatmul.mubr.msk.bf16.vlgmr.msra.gmra.mrb[20].mxu1 %vm845_vm3, %v1394_v41  ;;  %v1544_v60 = vpop.permute.xlu1 %1543 }
 0x4cf   : > { %8494 = vmatpush3.bf16.xpose.msra.mxu1 %v1501_v52  ;;  %8495 = vmatprep.mubr.msk.bf16.mxu1 %vm9204_vm2, %v9203_v55 }
 0x4d0   : > { %8505 = vmatprep.subr.bf16.mxu1 %v9203_v55 }
 0x4d3   : > { %8490 = vmatmul.mubr.msk.bf16.vlgmr.msra.gmra.mrb[28].mxu0 %vm845_vm3, %v1444_v53 }
 0x4d4   : > { %8500 = vmatpush3.bf16.xpose.msra.mxu0 %v1551_v54  ;;  %8501 = vmatprep.mubr.msk.bf16.mxu0 %vm9204_vm2, %v9203_v55 }
 0x4d5   : > { %8511 = vmatprep.subr.bf16.mxu0 %v9203_v55 }
 0x4d6   : > { %8496 = vmatmul.mubr.msk.bf16.vlgmr.msra.gmra.mrb[24].mxu1 %vm845_vm3, %v1494_v57 }
 0x4d7   : > { %8506 = vmatpush3.bf16.xpose.msra.mxu1 %v1601_v59  ;;  %8507 = vmatprep.mubr.msk.bf16.mxu1 %vm9204_vm2, %v9203_v55 }
 0x4d8   : > { %8517 = vmatprep.subr.bf16.mxu1 %v9203_v55 }
 0x4db   : > { %8502 = vmatmul.mubr.msk.bf16.vlgmr.msra.gmra.mrb[32].mxu0 %vm845_vm3, %v1544_v60 }
 0x4dc   : > { %8513 = vmatprep.mubr.msk.bf16.mxu0 %vm9204_vm2, %v9203_v55 }
 0x4de   : > { %8508 = vmatmul.mubr.msk.bf16.vlgmr.msra.gmra.mrb[28].mxu1 %vm845_vm3, %v1594_v63 }
 0x4df   : > { %8519 = vmatprep.mubr.msk.bf16.mxu1 %vm9204_vm2, %v9203_v55 }
 0x58b   : > { %v1191_v1 = vpop.f32.mrb[16].mxu0 }
 0x58c   : > { %v8455_v4 = vpop.f32.mrb[17].mxu0 }
 0x58d   : > { %v1194_v6 = vpop.f32.mrb[18].mxu0  ;;  %v1237_v7 = vpop.f32.mrb[12].mxu1 }
 0x58e   : > { %v1385_v8 = vcombine.low %v1191_v1, %v1237_v7  ;;  %v8456_v9 = vpop.f32.mrb[19].mxu0  ;;  %v8461_v10 = vpop.f32.mrb[13].mxu1 }
 0x58f   : > { %v1240_v11 = vpop.f32.mrb[14].mxu1 }
 0x590   : > { %v8462_v12 = vpop.f32.mrb[15].mxu1 }
 0x595   : > { %v1283_v13 = vpop.f32.mrb[20].mxu0 }
 0x596   : > { %v8467_v14 = vpop.f32.mrb[21].mxu0 }
 0x597   : > { %v1286_v16 = vpop.f32.mrb[22].mxu0 }
 0x598   : > { %v8468_v17 = vpop.f32.mrb[23].mxu0 }
 0x599   : > { %v1329_v18 = vpop.f32.mrb[16].mxu1 }
 0x59a   : > { %v1386_v19 = vcombine.low %v1283_v13, %v1329_v18  ;;  %v8473_v21 = vpop.f32.mrb[17].mxu1 }
 0x59b   : > { %v1332_v22 = vpop.f32.mrb[18].mxu1 }
 0x59c   : > { %v9541_v23 = vpack.c.bf16 %v1386_v19, %v1385_v8  ;;  %v8474_v26 = vpop.f32.mrb[19].mxu1 }
 0x59d   : > { %v9543_v27 = vpop.f32.mrb[24].mxu0 }
 0x59e   : > { %v8479_v29 = vpop.f32.mrb[25].mxu0 }
 0x59f   : > { %v1378_v30 = vpop.f32.mrb[26].mxu0 }
 0x5a0   : > { %v8480_v31 = vpop.f32.mrb[27].mxu0 }
 0x5a1   : > { %v1437_v32 = vpop.f32.mrb[20].mxu1 }
 0x5a2   : > { %v8485_v33 = vpop.f32.mrb[21].mxu1  ;;  %v1643_v62 = vsel %vm1088_vm5, %v1437_v32, -inf }
 0x5a3   : > { %1644 = vmax.xlane.f32.xlu1 %v1643_v62  ;;  %v1440_v34 = vpop.f32.mrb[22].mxu1 }
 0x5a4   : > { %v8486_v35 = vpop.f32.mrb[23].mxu1 }
 0x5a6   : > { %v1487_v36 = vpop.f32.mrb[28].mxu0 }
 0x5a7   : > { %v8491_v38 = vpop.f32.mrb[29].mxu0  ;;  %v1646_v39 = vsel %vm1088_vm5, %v1487_v36, -inf }
 0x5a8   : > { %1647 = vmax.xlane.f32.xlu0 %v1646_v39  ;;  %v1490_v40 = vpop.f32.mrb[30].mxu0 }
 0x5a9   : > { %v8492_v41 = vpop.f32.mrb[31].mxu0  ;;  %v1537_v42 = vpop.f32.mrb[24].mxu1 }
 0x5aa   : > { %v8497_v43 = vpop.f32.mrb[25].mxu1  ;;  %v1649_v44 = vsel %vm1088_vm5, %v1537_v42, -inf }
 0x5ab   : > { %v1540_v45 = vpop.f32.mrb[26].mxu1 }
 0x5ac   : > { %1650 = vmax.xlane.f32.xlu0 %v1649_v44  ;;  %v8498_v3 = vpop.f32.mrb[27].mxu1 }
 0x5ae   : > { %v1587_v46 = vpop.f32.mrb[32].mxu0 }
 0x5af   : > { %v8503_v47 = vpop.f32.mrb[33].mxu0  ;;  %v1652_v48 = vsel %vm1088_vm5, %v1587_v46, -inf }
 0x5b0   : > { %1653 = vmax.xlane.f32.xlu0 %v1652_v48  ;;  %v1590_v49 = vpop.f32.mrb[34].mxu0 }
 0x5b1   : > { %v8504_v50 = vpop.f32.mrb[35].mxu0  ;;  %v1637_v51 = vpop.f32.mrb[28].mxu1 }
 0x5b2   : > { %v8509_v52 = vpop.f32.mrb[29].mxu1  ;;  %v1655_v53 = vsel %vm1088_vm5, %v1637_v51, -inf }
 0x5b3   : > { %1656 = vmax.xlane.f32.xlu1 %v1655_v53  ;;  %v1640_v54 = vpop.f32.mrb[30].mxu1  ;;  %v8946_v53 = vld [vmem:[%s10744_s5] sm:$0xff]  }
 0x5b4   : > { %v8510_v56 = vpop.f32.mrb[31].mxu1 }
 0x5c4   : > { %1704 = vrot.lane.b32.xlu1 %v9426_v15, %s10770_s30 }
 0x630   : > { %v1645_v57 = vpop.xlane.xlu1 %1644 }
 0x631   : > { %v1658_v59 = vsub.f32 %v1437_v32, %v1645_v57 }
 0x633   : > { %v1663_v60 = vmul.f32 1.442695, %v1658_v59 }
 0x635   : > { %9024 = vpow2.f32 %v1663_v60  ;;  %v1648_v63 = vpop.xlane.xlu0 %1647 }
 0x636   : > { %v1659_v1 = vsub.f32 %v1487_v36, %v1648_v63 }
 0x638   : > { %v1665_v4 = vmul.f32 1.442695, %v1659_v1 }
 0x639   : > { %v1651_v6 = vpop.xlane.xlu0 %1650 }
 0x63a   : > { %9026 = vpow2.f32 %v1665_v4  ;;  %v1660_v7 = vsub.f32 %v1537_v42, %v1651_v6 }
 0x63c   : > { %v1667_v8 = vmul.f32 1.442695, %v1660_v7 }
 0x63d   : > { %v1654_v9 = vpop.xlane.xlu0 %1653 }
 0x63e   : > { %9028 = vpow2.f32 %v1667_v8  ;;  %v1661_v10 = vsub.f32 %v1587_v46, %v1654_v9  ;;  %v1390_v8 = vpack.c.bf16 %v9543_v27, %v9543_v27 }
 0x63f   : > { %v9025_v11 = vpop.eup %9024 }
 0x640   : > { %v1669_v12 = vmul.f32 1.442695, %v1661_v10  ;;  %v1657_v13 = vpop.xlane.xlu1 %1656  ;;  %v1673_v14 = vsel %vm1088_vm5, %v9025_v11, 0.0 }
 0x641   : > { %v1662_v16 = vsub.f32 %v1637_v51, %v1657_v13  ;;  %1674 = vadd.xlane.f32.xlu0 %v1673_v14 }
 0x642   : > { %9030 = vpow2.f32 %v1669_v12 }
 0x643   : > { %v1671_v17 = vmul.f32 1.442695, %v1662_v16  ;;  %v8947_v16 = vld [vmem:[%s10744_s5 + $0x8] sm:$0xff]  }
 0x644   : > { %v9027_v18 = vpop.eup %9026  ;;  %v1705_v19 = vpop.permute.xlu1 %1704 }
 0x645   : > { %9032 = vpow2.f32 %v1671_v17  ;;  %v1710_v21 = vsel %vm1153_vm4, %v1705_v19, 0  ;;  %v1676_v22 = vsel %vm1088_vm5, %v9027_v18, 0.0 }
 0x646   : > { %1677 = vadd.xlane.f32.xlu1 %v1676_v22  ;;  %8512 = vmatpush3.bf16.msra.mxu0 %v1710_v21 }
 0x647   : > { %8523 = vmatprep.subr.bf16.mxu0 %v9203_v55 }
 0x648   : > { %v9029_v26 = vpop.eup %9028 }
 0x649   : > { %v1679_v29 = vsel %vm1088_vm5, %v9029_v26, 0.0 }
 0x64a   : > { %1680 = vadd.xlane.f32.xlu0 %v1679_v29 }
 0x64c   : > { %v9557_v30 = vpop.eup %9030 }
 0x64d   : > { %v1682_v31 = vsel %vm1088_vm5, %v9557_v30, 0.0 }
 0x64e   : > { %1683 = vadd.xlane.f32.xlu1 %v1682_v31 }
 0x64f   : > { %v9561_v32 = vpop.eup %9032 }
 0x650   : > { %v1685_v33 = vsel %vm1088_vm5, %v9561_v32, 0.0 }
 0x651   : > { %1686 = vadd.xlane.f32.xlu0 %v1685_v33 }
 0x65f   : > { %1802 = vrot.lane.b32.xlu1 %v9484_v24, %s10770_s30 }
 0x663   : > { %1851 = vrot.lane.b32.xlu1 %v9486_v28, %s10770_s30 }
 0x667   : > { %1900 = vrot.lane.b32.xlu1 %v9502_v37, %s10770_s30  ;;  %1753 = vrot.lane.b32.xlu0 %v9441_v20, %s10770_s30 }
 0x66b   : > { %2133 = vrot.lane.b32.xlu1 %v9388_v61, %s10768_s0  ;;  %2083 = vrot.lane.b32.xlu0 %v9386_v58, %s10768_s0 }
 0x66f   : > { %2183 = vrot.lane.b32.xlu1 %v9396_v0, %s10768_s0  ;;  %2081 = vrot.lane.b32.xlu0 %v9386_v58, %s10766_s21 }
 0x673   : > { %2233 = vrot.lane.b32.xlu1 %v9404_v5, %s10768_s0  ;;  %2131 = vrot.lane.b32.xlu0 %v9388_v61, %s10766_s21 }
 0x677   : > { %2283 = vrot.lane.b32.xlu1 %v9398_v2, %s10768_s0  ;;  %2181 = vrot.lane.b32.xlu0 %v9396_v0, %s10766_s21 }
 0x67b   : > { %2281 = vrot.lane.b32.xlu1 %v9398_v2, %s10766_s21  ;;  %2231 = vrot.lane.b32.xlu0 %v9404_v5, %s10766_s21 }
 0x6ce   : > { %v1675_v62 = vpop.xlane.xlu0 %1674 }
 0x6cf   : > { %9034 = vrcp.f32 %v1675_v62 }
 0x6d3   : > { %v1678_v34 = vpop.xlane.xlu1 %1677 }
 0x6d4   : > { %9036 = vrcp.f32 %v1678_v34 }
 0x6d7   : > { %v1681_v35 = vpop.xlane.xlu0 %1680 }
 0x6d8   : > { %9038 = vrcp.f32 %v1681_v35 }
 0x6d9   : > { %v9035_v36 = vpop.eup %9034 }
 0x6da   : > { %v1693_v38 = vmul.f32 %v9035_v36, %v9025_v11 }
 0x6db   : > { %v1684_v39 = vpop.xlane.xlu1 %1683 }
 0x6dc   : > { %9040 = vrcp.f32 %v1684_v39  ;;  %v1698_v40 = vpack.c.bf16 %v1693_v38, %v1693_v38 }
 0x6de   : > { %v9037_v41 = vpop.eup %9036  ;;  %8514 = vmatmul.mubr.msk.bf16.vlgmr.msra.gmra.mrb[36].mxu0 %vm1149_vm6, %v1698_v40  ;;  %v1687_v42 = vpop.xlane.xlu0 %1686 }
 0x6df   : > { %v1803_v43 = vpop.permute.xlu1 %1802  ;;  %9042 = vrcp.f32 %v1687_v42  ;;  %8525 = vmatprep.mubr.msk.bf16.mxu0 %vm9204_vm2, %v9203_v55  ;;  %v1694_v45 = vmul.f32 %v9037_v41, %v9027_v18 }
 0x6e0   : > { %v1808_v44 = vsel %vm1153_vm4, %v1803_v43, 0 }
 0x6e1   : > { %8524 = vmatpush3.bf16.msra.mxu0 %v1808_v44  ;;  %v1699_v51 = vpack.c.bf16 %v1694_v45, %v1694_v45 }
 0x6e2   : > { %v9039_v3 = vpop.eup %9038  ;;  %v1754_v46 = vpop.permute.xlu0 %1753  ;;  %8535 = vmatprep.subr.bf16.mxu0 %v9203_v55 }
 0x6e3   : > { %v1852_v47 = vpop.permute.xlu1 %1851  ;;  %v1759_v48 = vsel %vm1153_vm4, %v1754_v46, 0  ;;  %v1695_v49 = vmul.f32 %v9039_v3, %v9029_v26 }
 0x6e4   : > { %8518 = vmatpush3.bf16.msra.mxu1 %v1759_v48  ;;  %v1857_v54 = vsel %vm1153_vm4, %v1852_v47, 0 }
 0x6e5   : > { %v1700_v50 = vpack.c.bf16 %v1695_v49, %v1695_v49  ;;  %8529 = vmatprep.subr.bf16.mxu1 %v9203_v55 }
 0x6e6   : > { %v9041_v52 = vpop.eup %9040  ;;  %v2084_v6 = vpop.permute.xlu0 %2083 }
 0x6e7   : > { %v1901_v56 = vpop.permute.xlu1 %1900  ;;  %8526 = vmatmul.mubr.msk.bf16.vlgmr.msra.gmra.mrb[40].mxu0 %vm1149_vm6, %v1700_v50  ;;  %8520 = vmatmul.mubr.msk.bf16.vlgmr.msra.gmra.mrb[32].mxu1 %vm1149_vm6, %v1699_v51  ;;  %v1696_v60 = vmul.f32 %v9041_v52, %v9557_v30  ;;  %v2089_v46 = vsel %vm845_vm3, %v2084_v6, 0 }
 0x6e8   : > { %v1906_v57 = vsel %vm1153_vm4, %v1901_v56, 0  ;;  %8530 = vmatpush3.bf16.msra.mxu1 %v1857_v54  ;;  %8537 = vmatprep.mubr.msk.bf16.mxu0 %vm9204_vm2, %v9203_v55 }
 0x6e9   : > { %v9043_v59 = vpop.eup %9042  ;;  %8536 = vmatpush3.bf16.msra.mxu0 %v1906_v57  ;;  %8531 = vmatprep.mubr.msk.bf16.mxu1 %vm9204_vm2, %v9203_v55  ;;  %v1701_v4 = vpack.c.bf16 %v1696_v60, %v1696_v60 }
 0x6ea   : > { %8547 = vmatprep.subr.bf16.mxu0 %v8946_v53  ;;  %v1697_v63 = vmul.f32 %v9043_v59, %v9561_v32  ;;  %v2082_v9 = vpop.permute.xlu0 %2081  ;;  %8541 = vmatprep.subr.bf16.mxu1 %v8947_v16 }
 0x6eb   : > { %v2134_v7 = vpop.permute.xlu1 %2133 }
 0x6ec   : > { %v1702_v1 = vpack.c.bf16 %v1697_v63, %v1697_v63  ;;  %v2139_v11 = vsel %vm845_vm3, %v2134_v7, 0 }
 0x6ee   : > { %v2132_v12 = vpop.permute.xlu0 %2131 }
 0x6ef   : > { %8538 = vmatmul.mubr.msk.bf16.vlgmr.msra.gmra.mrb[44].mxu0 %vm1149_vm6, %v1702_v1  ;;  %8532 = vmatmul.mubr.msk.bf16.vlgmr.msra.gmra.mrb[36].mxu1 %vm1149_vm6, %v1701_v4  ;;  %v2184_v10 = vpop.permute.xlu1 %2183 }
 0x6f0   : > { %8548 = vmatpush3.bf16.msra.mxu0 %v8946_v53  ;;  %8549 = vmatprep.mubr.msk.bf16.mxu0 %vm845_vm3, %v9541_v23  ;;  %v2189_v51 = vsel %vm845_vm3, %v2184_v10, 0 }
 0x6f1   : > { %8559 = vmatprep.subr.bf16.mxu0 %v9203_v55  ;;  %8542 = vmatpush3.bf16.msra.mxu1 %v8947_v16 }
 0x6f2   : > { %v2182_v14 = vpop.permute.xlu0 %2181  ;;  %8553 = vmatprep.subr.bf16.mxu1 %v9203_v55 }
 0x6f3   : > { %v2234_v23 = vpop.permute.xlu1 %2233 }
 0x6f4   : > { %v2239_v13 = vsel %vm845_vm3, %v2234_v23, 0 }
 0x6f6   : > { %v2232_v27 = vpop.permute.xlu0 %2231 }
 0x6f7   : > { %8550 = vmatmul.mubr.msk.bf16.vlgmr.msra.gmra.mrb[48].mxu0 %vm845_vm3, %v1390_v8  ;;  %v2284_v56 = vpop.permute.xlu1 %2283 }
 0x6f8   : > { %8561 = vmatprep.mubr.msk.bf16.mxu0 %vm9204_vm2, %v9203_v55  ;;  %v2289_v60 = vsel %vm845_vm3, %v2284_v56, 0 }
 0x6f9   : > { %8560 = vmatpush3.bf16.xpose.msra.mxu0 %v2139_v11 }
 0x6fa   : > { %8571 = vmatprep.subr.bf16.mxu0 %v9203_v55 }
 0x6fb   : > { %v2282_v7 = vpop.permute.xlu1 %2281 }
 0x700   : > { %8562 = vmatmul.mubr.msk.bf16.vlgmr.msra.gmra.mrb[52].mxu0 %vm845_vm3, %v2132_v12 }
 0x701   : > { %8572 = vmatpush3.bf16.xpose.msra.mxu0 %v2239_v13  ;;  %8573 = vmatprep.mubr.msk.bf16.mxu0 %vm9204_vm2, %v9203_v55 }
 0x702   : > { %8583 = vmatprep.subr.bf16.mxu0 %v9203_v55 }
 0x708   : > { %8574 = vmatmul.mubr.msk.bf16.vlgmr.msra.gmra.mrb[56].mxu0 %vm845_vm3, %v2232_v27 }
 0x709   : > { %8585 = vmatprep.mubr.msk.bf16.mxu0 %vm9204_vm2, %v9203_v55 }
 0x7b1   : > { %v1746_v17 = vpop.f32.mrb[36].mxu0 }
 0x7b2   : > { %v8515_v18 = vpop.f32.mrb[37].mxu0 }
 0x7b3   : > { %v1749_v19 = vpop.f32.mrb[38].mxu0 }
 0x7b4   : > { %v8516_v21 = vpop.f32.mrb[39].mxu0 }
 0x7ba   : > { %v1844_v22 = vpop.f32.mrb[40].mxu0  ;;  %v1795_v26 = vpop.f32.mrb[32].mxu1 }
 0x7bb   : > { %v1952_v29 = vcombine.low %v1746_v17, %v1795_v26  ;;  %v8527_v30 = vpop.f32.mrb[41].mxu0  ;;  %v8521_v31 = vpop.f32.mrb[33].mxu1 }
 0x7bc   : > { %v1847_v32 = vpop.f32.mrb[42].mxu0  ;;  %v1798_v33 = vpop.f32.mrb[34].mxu1 }
 0x7bd   : > { %v8528_v62 = vpop.f32.mrb[43].mxu0  ;;  %v8522_v34 = vpop.f32.mrb[35].mxu1 }
 0x7c2   : > { %v1942_v35 = vpop.f32.mrb[44].mxu0  ;;  %v1893_v36 = vpop.f32.mrb[36].mxu1 }
 0x7c3   : > { %v1953_v38 = vcombine.low %v1844_v22, %v1893_v36  ;;  %v8539_v39 = vpop.f32.mrb[45].mxu0  ;;  %v8533_v40 = vpop.f32.mrb[37].mxu1  ;;  %v1957_v3 = vpack.c.bf16 %v1942_v35, %v1942_v35 }
 0x7c4   : > { %v1945_v41 = vpop.f32.mrb[46].mxu0  ;;  %v1896_v42 = vpop.f32.mrb[38].mxu1 }
 0x7c5   : > { %v1956_v43 = vpack.c.bf16 %v1953_v38, %v1952_v29  ;;  %v8540_v44 = vpop.f32.mrb[47].mxu0  ;;  %v8534_v45 = vpop.f32.mrb[39].mxu1 }
 0x7c7   : > { %8543 = vmatprep.mubr.msk.bf16.mxu1 %vm845_vm3, %v1956_v43 }
 0x7c8   : > { %8544 = vmatmul.mubr.msk.bf16.vlgmr.msra.gmra.mrb[40].mxu1 %vm845_vm3, %v1957_v3 }
 0x7c9   : > { %8554 = vmatpush3.bf16.xpose.msra.mxu1 %v2089_v46  ;;  %8555 = vmatprep.mubr.msk.bf16.mxu1 %vm9204_vm2, %v9203_v55 }
 0x7ca   : > { %v8551_v47 = vpop.f32.mrb[48].mxu0  ;;  %8565 = vmatprep.subr.bf16.mxu1 %v9203_v55 }
 0x7cb   : > { %v2067_v48 = vpop.f32.mrb[49].mxu0 }
 0x7cc   : > { %v8552_v49 = vpop.f32.mrb[50].mxu0 }
 0x7cd   : > { %v2070_v50 = vpop.f32.mrb[51].mxu0 }
 0x7d0   : > { %8556 = vmatmul.mubr.msk.bf16.vlgmr.msra.gmra.mrb[44].mxu1 %vm845_vm3, %v2082_v9 }
 0x7d1   : > { %8566 = vmatpush3.bf16.xpose.msra.mxu1 %v2189_v51  ;;  %8567 = vmatprep.mubr.msk.bf16.mxu1 %vm9204_vm2, %v9203_v55 }
 0x7d2   : > { %8577 = vmatprep.subr.bf16.mxu1 %v9203_v55 }
 0x7d3   : > { %v2175_v52 = vpop.f32.mrb[52].mxu0 }
 0x7d4   : > { %v8563_v53 = vpop.f32.mrb[53].mxu0  ;;  %v2334_v54 = vsel %vm1088_vm5, %v2175_v52, -inf }
 0x7d5   : > { %2335 = vmax.xlane.f32.xlu1 %v2334_v54  ;;  %v2178_v57 = vpop.f32.mrb[54].mxu0 }
 0x7d6   : > { %v8564_v59 = vpop.f32.mrb[55].mxu0 }
 0x7d8   : > { %8568 = vmatmul.mubr.msk.bf16.vlgmr.msra.gmra.mrb[48].mxu1 %vm845_vm3, %v2182_v14 }
 0x7d9   : > { %8578 = vmatpush3.bf16.xpose.msra.mxu1 %v2289_v60  ;;  %8579 = vmatprep.mubr.msk.bf16.mxu1 %vm9204_vm2, %v9203_v55 }
 0x7da   : > { %8589 = vmatprep.subr.bf16.mxu1 %v9203_v55 }
 0x7db   : > { %v2275_v63 = vpop.f32.mrb[56].mxu0 }
 0x7dc   : > { %v8575_v1 = vpop.f32.mrb[57].mxu0  ;;  %v2340_v34 = vsel %vm1088_vm5, %v2275_v63, -inf }
 0x7dd   : > { %v2278_v4 = vpop.f32.mrb[58].mxu0 }
 0x7de   : > { %v8576_v6 = vpop.f32.mrb[59].mxu0 }
 0x7e0   : > { %8580 = vmatmul.mubr.msk.bf16.vlgmr.msra.gmra.mrb[52].mxu1 %vm845_vm3, %v2282_v7 }
 0x7e1   : > { %8591 = vmatprep.mubr.msk.bf16.mxu1 %vm9204_vm2, %v9203_v55 }
 0x7e6   : > { %2439 = vrot.lane.b32.xlu1 %v9441_v20, %s10766_s21 }
 0x7ea   : > { %2487 = vrot.lane.b32.xlu1 %v9484_v24, %s10766_s21 }
 0x862   : > { %v2336_v8 = vpop.xlane.xlu1 %2335 }
 0x863   : > { %v2347_v17 = vsub.f32 %v2175_v52, %v2336_v8 }
 0x865   : > { %v2353_v29 = vmul.f32 1.442695, %v2347_v17 }
 0x866   : > { %v2440_v9 = vpop.permute.xlu1 %2439 }
 0x867   : > { %v2445_v10 = vsel %vm1153_vm4, %v2440_v9, 0  ;;  %9044 = vpow2.f32 %v2353_v29 }
 0x868   : > { %8590 = vmatpush3.bf16.msra.mxu1 %v2445_v10 }
 0x869   : > { %8601 = vmatprep.subr.bf16.mxu1 %v9203_v55 }
 0x871   : > { %v9045_v39 = vpop.eup %9044 }
 0x872   : > { %v2364_v42 = vsel %vm1088_vm5, %v9045_v39, 0.0 }
 0x89b   : > { %v8545_v11 = vpop.f32.mrb[40].mxu1 }
 0x89c   : > { %v9663_v12 = vadd.f32 %v8551_v47, %v8545_v11  ;;  %v2007_v23 = vpop.f32.mrb[41].mxu1 }
 0x89d   : > { %v9665_v13 = vadd.f32 %v2067_v48, %v2007_v23  ;;  %v8546_v14 = vpop.f32.mrb[42].mxu1 }
 0x89e   : > { %v2010_v27 = vpop.f32.mrb[43].mxu1 }
 0x89f   : > { %v9667_v16 = vadd.f32 %v2070_v50, %v2010_v27 }
 0x8a3   : > { %v2125_v18 = vpop.f32.mrb[44].mxu1 }
 0x8a4   : > { %v8557_v19 = vpop.f32.mrb[45].mxu1  ;;  %v2331_v21 = vsel %vm1088_vm5, %v2125_v18, -inf }
 0x8a5   : > { %2332 = vmax.xlane.f32.xlu0 %v2331_v21  ;;  %v2128_v22 = vpop.f32.mrb[46].mxu1 }
 0x8a6   : > { %v8558_v26 = vpop.f32.mrb[47].mxu1 }
 0x8ab   : > { %v2225_v30 = vpop.f32.mrb[48].mxu1 }
 0x8ac   : > { %v8569_v31 = vpop.f32.mrb[49].mxu1  ;;  %v2337_v32 = vsel %vm1088_vm5, %v2225_v30, -inf }
 0x8ad   : > { %2338 = vmax.xlane.f32.xlu0 %v2337_v32  ;;  %v2228_v33 = vpop.f32.mrb[50].mxu1 }
 0x8ae   : > { %v8570_v62 = vpop.f32.mrb[51].mxu1 }
 0x8b1   : > { %2341 = vmax.xlane.f32.xlu0 %v2340_v34 }
 0x8b3   : > { %v2325_v35 = vpop.f32.mrb[52].mxu1 }
 0x8b4   : > { %v8581_v36 = vpop.f32.mrb[53].mxu1  ;;  %v2343_v38 = vsel %vm1088_vm5, %v2325_v35, -inf }
 0x8b5   : > { %v2328_v40 = vpop.f32.mrb[54].mxu1  ;;  %2344 = vmax.xlane.f32.xlu0 %v2343_v38 }
 0x8b6   : > { %v8582_v41 = vpop.f32.mrb[55].mxu1 }
 0x8b9   : > { %2365 = vadd.xlane.f32.xlu0 %v2364_v42 }
 0x932   : > { %v2333_v43 = vpop.xlane.xlu0 %2332 }
 0x933   : > { %v2346_v44 = vsub.f32 %v2125_v18, %v2333_v43 }
 0x935   : > { %v2351_v45 = vmul.f32 1.442695, %v2346_v44 }
 0x937   : > { %9046 = vpow2.f32 %v2351_v45 }
 0x93a   : > { %v2339_v3 = vpop.xlane.xlu0 %2338 }
 0x93b   : > { %v2348_v46 = vsub.f32 %v2225_v30, %v2339_v3 }
 0x93d   : > { %v2355_v47 = vmul.f32 1.442695, %v2348_v46 }
 0x93e   : > { %v2342_v48 = vpop.xlane.xlu0 %2341 }
 0x93f   : > { %9048 = vpow2.f32 %v2355_v47  ;;  %v2349_v49 = vsub.f32 %v2275_v63, %v2342_v48 }
 0x941   : > { %v9047_v50 = vpop.eup %9046  ;;  %v2357_v51 = vmul.f32 1.442695, %v2349_v49 }
 0x942   : > { %v2345_v52 = vpop.xlane.xlu0 %2344  ;;  %v2361_v53 = vsel %vm1088_vm5, %v9047_v50, 0.0 }
 0x943   : > { %9050 = vpow2.f32 %v2357_v51  ;;  %v2350_v54 = vsub.f32 %v2325_v35, %v2345_v52  ;;  %2362 = vadd.xlane.f32.xlu1 %v2361_v53  ;;  %v8948_v52 = vld [vmem:[%s10744_s5 + $0x10] sm:$0xff]  }
 0x945   : > { %v2359_v56 = vmul.f32 1.442695, %v2350_v54 }
 0x946   : > { %v2366_v57 = vpop.xlane.xlu0 %2365 }
 0x947   : > { %9052 = vpow2.f32 %v2359_v56 }
 0x948   : > { %9054 = vrcp.f32 %v2366_v57 }
 0x949   : > { %v9049_v59 = vpop.eup %9048 }
 0x94a   : > { %v2367_v60 = vsel %vm1088_vm5, %v9049_v59, 0.0 }
 0x94b   : > { %2368 = vadd.xlane.f32.xlu1 %v2367_v60 }
 0x94d   : > { %v9051_v1 = vpop.eup %9050 }
 0x94e   : > { %v2370_v4 = vsel %vm1088_vm5, %v9051_v1, 0.0 }
 0x94f   : > { %2371 = vadd.xlane.f32.xlu0 %v2370_v4 }
 0x951   : > { %v9053_v63 = vpop.eup %9052 }
 0x952   : > { %v9055_v6 = vpop.eup %9054  ;;  %v2373_v7 = vsel %vm1088_vm5, %v9053_v63, 0.0 }
 0x953   : > { %2374 = vadd.xlane.f32.xlu1 %v2373_v7  ;;  %v2382_v8 = vmul.f32 %v9055_v6, %v9045_v39 }
 0x955   : > { %v2387_v9 = vpack.c.bf16 %v2382_v8, %v2382_v8 }
 0x957   : > { %8592 = vmatmul.mubr.msk.bf16.vlgmr.msra.gmra.mrb[56].mxu1 %vm1149_vm6, %v2387_v9 }
 0x958   : > { %8603 = vmatprep.mubr.msk.bf16.mxu1 %vm9204_vm2, %v9203_v55 }
 0x964   : > { %2535 = vrot.lane.b32.xlu1 %v9486_v28, %s10766_s21 }
 0x965   : > { %2391 = vrot.lane.b32.xlu0 %v9426_v15, %s10766_s21 }
 0x968   : > { %2709 = vrot.lane.b32.xlu1 %v9386_v58, %s10764_s27 }
 0x969   : > { %2583 = vrot.lane.b32.xlu0 %v9502_v37, %s10766_s21 }
 0x96c   : > { %2707 = vrot.lane.b32.xlu1 %v9386_v58, %s10762_s24  ;;  %v2488_v58 = vpop.permute.xlu1 %2487 }
 0x96d   : > { %2759 = vrot.lane.b32.xlu0 %v9388_v61, %s10764_s27  ;;  %v2493_v19 = vsel %vm1153_vm4, %v2488_v58, 0 }
 0x970   : > { %2757 = vrot.lane.b32.xlu1 %v9388_v61, %s10762_s24 }
 0x971   : > { %2809 = vrot.lane.b32.xlu0 %v9396_v0, %s10764_s27 }
 0x974   : > { %2807 = vrot.lane.b32.xlu1 %v9396_v0, %s10762_s24 }
 0x975   : > { %2859 = vrot.lane.b32.xlu0 %v9404_v5, %s10764_s27 }
 0x978   : > { %2857 = vrot.lane.b32.xlu1 %v9404_v5, %s10762_s24 }
 0x979   : > { %2909 = vrot.lane.b32.xlu0 %v9398_v2, %s10764_s27 }
 0x97d   : > { %2907 = vrot.lane.b32.xlu0 %v9398_v2, %s10762_s24 }
 0x9d0   : > { %v2363_v61 = vpop.xlane.xlu1 %2362 }
 0x9d1   : > { %9056 = vrcp.f32 %v2363_v61 }
 0x9d8   : > { %v2369_v10 = vpop.xlane.xlu1 %2368 }
 0x9d9   : > { %9058 = vrcp.f32 %v2369_v10 }
 0x9db   : > { %v9057_v11 = vpop.eup %9056 }
 0x9dc   : > { %v2372_v23 = vpop.xlane.xlu0 %2371  ;;  %v2381_v0 = vmul.f32 %v9057_v11, %v9047_v50 }
 0x9dd   : > { %9060 = vrcp.f32 %v2372_v23 }
 0x9de   : > { %v2386_v5 = vpack.c.bf16 %v2381_v0, %v2381_v0 }
 0x9e0   : > { %v2375_v14 = vpop.xlane.xlu1 %2374  ;;  %v2392_v27 = vpop.permute.xlu0 %2391 }
 0x9e1   : > { %v2397_v17 = vsel %vm1153_vm4, %v2392_v27, 0  ;;  %9062 = vrcp.f32 %v2375_v14 }
 0x9e2   : > { %8584 = vmatpush3.bf16.msra.mxu0 %v2397_v17 }
 0x9e3   : > { %8595 = vmatprep.subr.bf16.mxu0 %v9203_v55  ;;  %v9059_v18 = vpop.eup %9058 }
 0x9e4   : > { %v2536_v2 = vpop.permute.xlu1 %2535  ;;  %v2383_v26 = vmul.f32 %v9059_v18, %v9049_v59  ;;  %v2584_v30 = vpop.permute.xlu0 %2583 }
 0x9e5   : > { %v2541_v21 = vsel %vm1153_vm4, %v2536_v2, 0  ;;  %8586 = vmatmul.mubr.msk.bf16.vlgmr.msra.gmra.mrb[60].mxu0 %vm1149_vm6, %v2386_v5  ;;  %v2589_v62 = vsel %vm1153_vm4, %v2584_v30, 0 }
 0x9e6   : > { %8596 = vmatpush3.bf16.msra.mxu0 %v2493_v19  ;;  %8602 = vmatpush3.bf16.msra.mxu1 %v2541_v21  ;;  %v2388_v32 = vpack.c.bf16 %v2383_v26, %v2383_v26 }
 0x9e7   : > { %v9061_v22 = vpop.eup %9060  ;;  %8597 = vmatprep.mubr.msk.bf16.mxu0 %vm9204_vm2, %v9203_v55  ;;  %8607 = vmatprep.subr.bf16.mxu0 %v9203_v55 }
 0x9e8   : > { %v2384_v29 = vmul.f32 %v9061_v22, %v9051_v1  ;;  %v2760_v35 = vpop.permute.xlu0 %2759  ;;  %v2710_v36 = vpop.permute.xlu1 %2709  ;;  %8613 = vmatprep.subr.bf16.mxu1 %v8948_v52 }
 0x9e9   : > { %v2715_v39 = vsel %vm845_vm3, %v2710_v36, 0  ;;  %v2765_v14 = vsel %vm845_vm3, %v2760_v35, 0 }
 0x9ea   : > { %v2389_v31 = vpack.c.bf16 %v2384_v29, %v2384_v29 }
 0x9eb   : > { %v9063_v33 = vpop.eup %9062 }
 0x9ec   : > { %8604 = vmatmul.mubr.msk.bf16.vlgmr.msra.gmra.mrb[60].mxu1 %vm1149_vm6, %v2389_v31  ;;  %v2385_v34 = vmul.f32 %v9063_v33, %v9053_v63  ;;  %v2810_v40 = vpop.permute.xlu0 %2809  ;;  %v2708_v41 = vpop.permute.xlu1 %2707 }
 0x9ed   : > { %8598 = vmatmul.mubr.msk.bf16.vlgmr.msra.gmra.mrb[64].mxu0 %vm1149_vm6, %v2388_v32  ;;  %v2815_v43 = vsel %vm845_vm3, %v2810_v40, 0  ;;  %8614 = vmatpush3.bf16.msra.mxu1 %v8948_v52 }
 0x9ee   : > { %8608 = vmatpush3.bf16.msra.mxu0 %v2589_v62  ;;  %8609 = vmatprep.mubr.msk.bf16.mxu0 %vm9204_vm2, %v9203_v55  ;;  %v2390_v38 = vpack.c.bf16 %v2385_v34, %v2385_v34 }
 0x9ef   : > { %8619 = vmatprep.subr.bf16.mxu0 %v9203_v55  ;;  %8625 = vmatprep.subr.bf16.mxu1 %v9203_v55 }
 0x9f0   : > { %v2860_v42 = vpop.permute.xlu0 %2859  ;;  %v2758_v44 = vpop.permute.xlu1 %2757 }
 0x9f1   : > { %v2865_v2 = vsel %vm845_vm3, %v2860_v42, 0 }
 0x9f4   : > { %v2910_v45 = vpop.permute.xlu0 %2909  ;;  %v2808_v3 = vpop.permute.xlu1 %2807 }
 0x9f5   : > { %8610 = vmatmul.mubr.msk.bf16.vlgmr.msra.gmra.mrb[68].mxu0 %vm1149_vm6, %v2390_v38  ;;  %v2915_v46 = vsel %vm845_vm3, %v2910_v45, 0 }
 0x9f6   : > { %8621 = vmatprep.mubr.msk.bf16.mxu0 %vm9204_vm2, %v9203_v55 }
 0x9f7   : > { %8620 = vmatpush3.bf16.xpose.msra.mxu0 %v2715_v39 }
 0x9f8   : > { %8631 = vmatprep.subr.bf16.mxu0 %v9203_v55  ;;  %v2908_v47 = vpop.permute.xlu0 %2907  ;;  %v2858_v26 = vpop.permute.xlu1 %2857 }
 0x9fe   : > { %8622 = vmatmul.mubr.msk.bf16.vlgmr.msra.gmra.mrb[72].mxu0 %vm845_vm3, %v2708_v41 }
 0x9ff   : > { %8632 = vmatpush3.bf16.xpose.msra.mxu0 %v2815_v43  ;;  %8633 = vmatprep.mubr.msk.bf16.mxu0 %vm9204_vm2, %v9203_v55 }
 0xa00   : > { %8643 = vmatprep.subr.bf16.mxu0 %v9203_v55 }
 0xa06   : > { %8634 = vmatmul.mubr.msk.bf16.vlgmr.msra.gmra.mrb[76].mxu0 %vm845_vm3, %v2808_v3 }
 0xa07   : > { %8644 = vmatpush3.bf16.xpose.msra.mxu0 %v2915_v46  ;;  %8645 = vmatprep.mubr.msk.bf16.mxu0 %vm9204_vm2, %v9203_v55 }
 0xa08   : > { %8655 = vmatprep.subr.bf16.mxu0 %v9203_v55 }
 0xa0e   : > { %8646 = vmatmul.mubr.msk.bf16.vlgmr.msra.gmra.mrb[80].mxu0 %vm845_vm3, %v2908_v47 }
 0xa0f   : > { %8657 = vmatprep.mubr.msk.bf16.mxu0 %vm9204_vm2, %v9203_v55 }
 0xa2a   : > { %v2481_v48 = vpop.f32.mrb[56].mxu1 }
 0xa2b   : > { %v8593_v49 = vpop.f32.mrb[57].mxu1 }
 0xa2c   : > { %v2484_v50 = vpop.f32.mrb[58].mxu1 }
 0xa2d   : > { %v8594_v51 = vpop.f32.mrb[59].mxu1 }
 0xab8   : > { %v2433_v53 = vpop.f32.mrb[60].mxu0 }
 0xab9   : > { %v2635_v54 = vcombine.low %v2433_v53, %v2481_v48  ;;  %v8587_v56 = vpop.f32.mrb[61].mxu0 }
 0xaba   : > { %v2436_v57 = vpop.f32.mrb[62].mxu0 }
 0xabb   : > { %v8588_v59 = vpop.f32.mrb[63].mxu0 }
 0xabf   : > { %v2577_v60 = vpop.f32.mrb[60].mxu1 }
 0xac0   : > { %v2529_v1 = vpop.f32.mrb[64].mxu0  ;;  %v8605_v4 = vpop.f32.mrb[61].mxu1 }
 0xac1   : > { %v2636_v63 = vcombine.low %v2529_v1, %v2577_v60  ;;  %v8599_v6 = vpop.f32.mrb[65].mxu0  ;;  %v2580_v7 = vpop.f32.mrb[62].mxu1 }
 0xac2   : > { %v2532_v8 = vpop.f32.mrb[66].mxu0  ;;  %v8606_v9 = vpop.f32.mrb[63].mxu1 }
 0xac3   : > { %v2639_v58 = vpack.c.bf16 %v2636_v63, %v2635_v54  ;;  %v8600_v61 = vpop.f32.mrb[67].mxu0 }
 0xac5   : > { %8615 = vmatprep.mubr.msk.bf16.mxu1 %vm845_vm3, %v2639_v58 }
 0xac8   : > { %v2625_v10 = vpop.f32.mrb[68].mxu0 }
 0xac9   : > { %v2640_v11 = vpack.c.bf16 %v2625_v10, %v2625_v10  ;;  %v8611_v23 = vpop.f32.mrb[69].mxu0 }
 0xaca   : > { %v2628_v0 = vpop.f32.mrb[70].mxu0 }
 0xacb   : > { %v8612_v27 = vpop.f32.mrb[71].mxu0  ;;  %8616 = vmatmul.mubr.msk.bf16.vlgmr.msra.gmra.mrb[64].mxu1 %vm845_vm3, %v2640_v11 }
 0xacc   : > { %8626 = vmatpush3.bf16.xpose.msra.mxu1 %v2765_v14  ;;  %8627 = vmatprep.mubr.msk.bf16.mxu1 %vm9204_vm2, %v9203_v55 }
 0xacd   : > { %8637 = vmatprep.subr.bf16.mxu1 %v9203_v55 }
 0xad1   : > { %v2751_v17 = vpop.f32.mrb[72].mxu0 }
 0xad2   : > { %v8623_v5 = vpop.f32.mrb[73].mxu0  ;;  %v2957_v18 = vsel %vm1088_vm5, %v2751_v17, -inf }
 0xad3   : > { %2958 = vmax.xlane.f32.xlu1 %v2957_v18  ;;  %v2754_v19 = vpop.f32.mrb[74].mxu0  ;;  %8628 = vmatmul.mubr.msk.bf16.vlgmr.msra.gmra.mrb[68].mxu1 %vm845_vm3, %v2758_v44 }
 0xad4   : > { %v8624_v21 = vpop.f32.mrb[75].mxu0  ;;  %8638 = vmatpush3.bf16.xpose.msra.mxu1 %v2865_v2  ;;  %8639 = vmatprep.mubr.msk.bf16.mxu1 %vm9204_vm2, %v9203_v55 }
 0xad5   : > { %8649 = vmatprep.subr.bf16.mxu1 %v9203_v55 }
 0xad9   : > { %v2851_v22 = vpop.f32.mrb[76].mxu0 }
 0xada   : > { %v8635_v29 = vpop.f32.mrb[77].mxu0 }
 0xadb   : > { %v2854_v30 = vpop.f32.mrb[78].mxu0  ;;  %8640 = vmatmul.mubr.msk.bf16.vlgmr.msra.gmra.mrb[72].mxu1 %vm845_vm3, %v2858_v26 }
 0xadc   : > { %v8636_v31 = vpop.f32.mrb[79].mxu0  ;;  %8651 = vmatprep.mubr.msk.bf16.mxu1 %vm9204_vm2, %v9203_v55 }
 0xae1   : > { %v2951_v32 = vpop.f32.mrb[80].mxu0 }
 0xae2   : > { %v8647_v33 = vpop.f32.mrb[81].mxu0  ;;  %v2969_v62 = vsel %vm1088_vm5, %v2951_v32, -inf }
 0xae3   : > { %2970 = vmax.xlane.f32.xlu1 %v2969_v62  ;;  %v2954_v34 = vpop.f32.mrb[82].mxu0 }
 0xae4   : > { %v8648_v35 = vpop.f32.mrb[83].mxu0 }
 0xaf4   : > { %3017 = vrot.lane.b32.xlu1 %v9426_v15, %s10762_s24 }
 0xaf8   : > { %3113 = vrot.lane.b32.xlu1 %v9484_v24, %s10762_s24 }
 0xafc   : > { %3161 = vrot.lane.b32.xlu1 %v9486_v28, %s10762_s24 }
 0xb60   : > { %v2959_v36 = vpop.xlane.xlu1 %2958 }
 0xb61   : > { %v2972_v42 = vsub.f32 %v2751_v17, %v2959_v36 }
 0xb63   : > { %v2977_v3 = vmul.f32 1.442695, %v2972_v42 }
 0xb65   : > { %9064 = vpow2.f32 %v2977_v3 }
 0xb6f   : > { %v9065_v54 = vpop.eup %9064 }
 0xb70   : > { %v2971_v38 = vpop.xlane.xlu1 %2970  ;;  %v2987_v57 = vsel %vm1088_vm5, %v9065_v54, 0.0 }
 0xb71   : > { %v2976_v39 = vsub.f32 %v2951_v32, %v2971_v38 }
 0xb73   : > { %v2985_v6 = vmul.f32 1.442695, %v2976_v39 }
 0xb74   : > { %v3018_v40 = vpop.permute.xlu1 %3017 }
 0xb75   : > { %v3023_v41 = vsel %vm1153_vm4, %v3018_v40, 0 }
 0xb76   : > { %8650 = vmatpush3.bf16.msra.mxu1 %v3023_v41 }
 0xb77   : > { %8661 = vmatprep.subr.bf16.mxu1 %v9203_v55 }
 0xb78   : > { %v3114_v19 = vpop.permute.xlu1 %3113 }
 0xb7c   : > { %v3162_v26 = vpop.permute.xlu1 %3161 }
 0xb7d   : > { %v3167_v38 = vsel %vm1153_vm4, %v3162_v26, 0 }
 0xb9e   : > { %v8617_v43 = vpop.f32.mrb[64].mxu1 }
 0xb9f   : > { %v9768_v44 = vadd.f32 %v8617_v43, %v9663_v12  ;;  %v2690_v15 = vpop.f32.mrb[65].mxu1  ;;  %v2963_v12 = vsel %vm1088_vm5, %v2851_v22, -inf }
 0xba0   : > { %v9771_v24 = vadd.f32 %v2690_v15, %v9665_v13  ;;  %v8618_v45 = vpop.f32.mrb[66].mxu1 }
 0xba1   : > { %v2693_v28 = vpop.f32.mrb[67].mxu1 }
 0xba2   : > { %v9774_v46 = vadd.f32 %v2693_v28, %v9667_v16 }
 0xba6   : > { %v2801_v47 = vpop.f32.mrb[68].mxu1 }
 0xba7   : > { %v8629_v48 = vpop.f32.mrb[69].mxu1  ;;  %v2960_v49 = vsel %vm1088_vm5, %v2801_v47, -inf }
 0xba8   : > { %2961 = vmax.xlane.f32.xlu0 %v2960_v49  ;;  %v2804_v50 = vpop.f32.mrb[70].mxu1 }
 0xba9   : > { %v8630_v51 = vpop.f32.mrb[71].mxu1 }
 0xbaa   : > { %v8949_v51 = vld [vmem:[%s10744_s5 + $0x18] sm:$0xff]  }
 0xbac   : > { %2964 = vmax.xlane.f32.xlu0 %v2963_v12  ;;  %v8950_v12 = vld [vmem:[%s10746_s7] sm:$0xff]  }
 0xbae   : > { %v2901_v52 = vpop.f32.mrb[72].mxu1 }
 0xbaf   : > { %v8641_v13 = vpop.f32.mrb[73].mxu1  ;;  %v2966_v53 = vsel %vm1088_vm5, %v2901_v52, -inf }
 0xbb0   : > { %v2904_v56 = vpop.f32.mrb[74].mxu1  ;;  %2967 = vmax.xlane.f32.xlu0 %v2966_v53 }
 0xbb1   : > { %v8642_v16 = vpop.f32.mrb[75].mxu1 }
 0xbb4   : > { %2988 = vadd.xlane.f32.xlu0 %v2987_v57 }
 0xc35   : > { %v2962_v59 = vpop.xlane.xlu0 %2961 }
 0xc36   : > { %v2973_v60 = vsub.f32 %v2801_v47, %v2962_v59 }
 0xc38   : > { %v2979_v1 = vmul.f32 1.442695, %v2973_v60 }
 0xc39   : > { %v2965_v4 = vpop.xlane.xlu0 %2964 }
 0xc3a   : > { %9066 = vpow2.f32 %v2979_v1  ;;  %v2974_v63 = vsub.f32 %v2851_v22, %v2965_v4  ;;  %v3119_v22 = vsel %vm1153_vm4, %v3114_v19, 0 }
 0xc3c   : > { %v2981_v7 = vmul.f32 1.442695, %v2974_v63 }
 0xc3d   : > { %v2968_v8 = vpop.xlane.xlu0 %2967 }
 0xc3e   : > { %9068 = vpow2.f32 %v2981_v7  ;;  %v2975_v9 = vsub.f32 %v2901_v52, %v2968_v8  ;;  %v8951_v52 = vld [vmem:[%s10746_s7 + $0x8] sm:$0xff]  }
 0xc3f   : > { %9070 = vpow2.f32 %v2985_v6 }
 0xc40   : > { %v2983_v58 = vmul.f32 1.442695, %v2975_v9 }
 0xc41   : > { %v2989_v61 = vpop.xlane.xlu0 %2988 }
 0xc42   : > { %9072 = vpow2.f32 %v2983_v58 }
 0xc43   : > { %9074 = vrcp.f32 %v2989_v61 }
 0xc44   : > { %v9067_v10 = vpop.eup %9066 }
 0xc45   : > { %v2990_v11 = vsel %vm1088_vm5, %v9067_v10, 0.0 }
 0xc46   : > { %2991 = vadd.xlane.f32.xlu1 %v2990_v11 }
 0xc48   : > { %v9069_v23 = vpop.eup %9068 }
 0xc49   : > { %v2993_v0 = vsel %vm1088_vm5, %v9069_v23, 0.0  ;;  %v9071_v14 = vpop.eup %9070 }
 0xc4a   : > { %2994 = vadd.xlane.f32.xlu0 %v2993_v0  ;;  %v2999_v18 = vsel %vm1088_vm5, %v9071_v14, 0.0  ;;  %v8952_v0 = vld [vmem:[%s10746_s7 + $0x10] sm:$0xff]  }
 0xc4c   : > { %v9073_v27 = vpop.eup %9072 }
 0xc4d   : > { %v9075_v17 = vpop.eup %9074  ;;  %v2996_v5 = vsel %vm1088_vm5, %v9073_v27, 0.0 }
 0xc4e   : > { %v3007_v2 = vmul.f32 %v9075_v17, %v9065_v54  ;;  %2997 = vadd.xlane.f32.xlu1 %v2996_v5  ;;  %3000 = vadd.xlane.f32.xlu0 %v2999_v18  ;;  %v8101_v18 = vld [vmem:[%s10745_s6] ss:$0 sm:$0xff] }
 0xc50   : > { %v3012_v21 = vpack.c.bf16 %v3007_v2, %v3007_v2 }
 0xc52   : > { %8652 = vmatmul.mubr.msk.bf16.vlgmr.msra.gmra.mrb[76].mxu1 %vm1149_vm6, %v3012_v21 }
 0xc53   : > { %8662 = vmatpush3.bf16.msra.mxu1 %v3119_v22  ;;  %8663 = vmatprep.mubr.msk.bf16.mxu1 %vm9204_vm2, %v9203_v55 }
 0xc54   : > { %8673 = vmatprep.subr.bf16.mxu1 %v9203_v55 }
 0xc5f   : > { %3209 = vrot.lane.b32.xlu1 %v9502_v37, %s10762_s24 }
 0xc64   : > { %3065 = vrot.lane.b32.xlu0 %v9441_v20, %s10762_s24 }
 0xcd3   : > { %v2992_v29 = vpop.xlane.xlu1 %2991 }
 0xcd4   : > { %9076 = vrcp.f32 %v2992_v29 }
 0xcd7   : > { %v2995_v30 = vpop.xlane.xlu0 %2994 }
 0xcd8   : > { %9078 = vrcp.f32 %v2995_v30 }
 0xcdb   : > { %v3001_v31 = vpop.xlane.xlu0 %3000  ;;  %v2998_v32 = vpop.xlane.xlu1 %2997 }
 0xcdc   : > { %9080 = vrcp.f32 %v3001_v31 }
 0xcdd   : > { %9082 = vrcp.f32 %v2998_v32 }
 0xcde   : > { %v9077_v33 = vpop.eup %9076 }
 0xcdf   : > { %v3008_v62 = vmul.f32 %v9077_v33, %v9067_v10  ;;  %v3066_v34 = vpop.permute.xlu0 %3065  ;;  %v3210_v39 = vpop.permute.xlu1 %3209 }
 0xce0   : > { %v3071_v35 = vsel %vm1153_vm4, %v3066_v34, 0  ;;  %v3215_v43 = vsel %vm1153_vm4, %v3210_v39, 0 }
 0xce1   : > { %8656 = vmatpush3.bf16.msra.mxu0 %v3071_v35  ;;  %v3013_v36 = vpack.c.bf16 %v3008_v62, %v3008_v62  ;;  %v9184_v35 = vld [vmem:[%s9335_s3 + $0x10] sm:$0xf] }
 0xce2   : > { %v9079_v37 = vpop.eup %9078  ;;  %8667 = vmatprep.subr.bf16.mxu0 %v9203_v55 }
 0xce3   : > { %v3009_v20 = vmul.f32 %v9079_v37, %v9069_v23 }
 0xce4   : > { %8658 = vmatmul.mubr.msk.bf16.vlgmr.msra.gmra.mrb[84].mxu0 %vm1149_vm6, %v3013_v36 }
 0xce5   : > { %8668 = vmatpush3.bf16.msra.mxu0 %v3167_v38  ;;  %v3014_v40 = vpack.c.bf16 %v3009_v20, %v3009_v20  ;;  %8669 = vmatprep.mubr.msk.bf16.mxu0 %vm9204_vm2, %v9203_v55  ;;  %v9185_v20 = vld [vmem:[%s9335_s3] sm:$0xff] }
 0xce6   : > { %v9081_v41 = vpop.eup %9080  ;;  %8679 = vmatprep.subr.bf16.mxu0 %v8949_v51 }
 0xce7   : > { %v9083_v42 = vpop.eup %9082  ;;  %8664 = vmatmul.mubr.msk.bf16.vlgmr.msra.gmra.mrb[80].mxu1 %vm1149_vm6, %v3014_v40  ;;  %v3011_v45 = vmul.f32 %v9081_v41, %v9071_v14  ;;  %v8953_v14 = vld [vmem:[%s10746_s7 + $0x18] sm:$0xff]   ;;  %v9186_v40 = vld [vmem:[%s9335_s3 + $0x8] sm:$0xff]  ;;  %s10786_s3 = smov 80  }
 0xce8   : > { %v3010_v15 = vmul.f32 %v9083_v42, %v9073_v27  ;;  %8674 = vmatpush3.bf16.msra.mxu1 %v3215_v43  ;;  %8675 = vmatprep.mubr.msk.bf16.mxu1 %vm9204_vm2, %v9203_v55 }
 0xce9   : > { %v3016_v3 = vpack.c.bf16 %v3011_v45, %v3011_v45  ;;  %8685 = vmatprep.subr.bf16.mxu1 %v8950_v12 }
 0xcea   : > { %v3015_v28 = vpack.c.bf16 %v3010_v15, %v3010_v15 }
 0xcec   : > { %8670 = vmatmul.mubr.msk.bf16.vlgmr.msra.gmra.mrb[88].mxu0 %vm1149_vm6, %v3015_v28 }
 0xced   : > { %8680 = vmatpush3.bf16.msra.mxu0 %v8949_v51 }
 0xcef   : > { %8676 = vmatmul.mubr.msk.bf16.vlgmr.msra.gmra.mrb[84].mxu1 %vm1149_vm6, %v3016_v3 }
 0xcf0   : > { %8686 = vmatpush3.bf16.msra.mxu1 %v8950_v12 }
 0xcf1   : > { %8687 = vmatprep.subr.bf16.mxu1 %v8951_v52 }
 0xcf4   : > { %8688 = vmatpush3.bf16.msra.mxu1 %v8951_v52 }
 0xcf5   : > { %8689 = vmatprep.subr.bf16.mxu1 %v8952_v0 }
 0xcf8   : > { %8690 = vmatpush3.bf16.msra.mxu1 %v8952_v0 }
 0xcf9   : > { %8691 = vmatprep.subr.bf16.mxu1 %v8953_v14 }
 0xcfc   : > { %8692 = vmatpush3.bf16.msra.mxu1 %v8953_v14 }
 0xcfd   : > { %8697 = vmatprep.subr.bf16.mxu1 %v9203_v55 }
 0xd25   : > { %v3059_v47 = vpop.f32.mrb[76].mxu1 }
 0xd26   : > { %v8653_v48 = vpop.f32.mrb[77].mxu1 }
 0xd27   : > { %v3062_v49 = vpop.f32.mrb[78].mxu1 }
 0xd28   : > { %v8654_v50 = vpop.f32.mrb[79].mxu1 }
 0xdb7   : > { %v3107_v13 = vpop.f32.mrb[84].mxu0 }
 0xdb8   : > { %v3261_v53 = vcombine.low %v3059_v47, %v3107_v13  ;;  %v8659_v54 = vpop.f32.mrb[85].mxu0 }
 0xdb9   : > { %v3110_v56 = vpop.f32.mrb[86].mxu0 }
 0xdba   : > { %v8660_v16 = vpop.f32.mrb[87].mxu0  ;;  %v3155_v57 = vpop.f32.mrb[80].mxu1 }
 0xdbb   : > { %v8665_v59 = vpop.f32.mrb[81].mxu1 }
 0xdbc   : > { %v3158_v60 = vpop.f32.mrb[82].mxu1 }
 0xdbd   : > { %v8666_v1 = vpop.f32.mrb[83].mxu1 }
 0xdbf   : > { %v3203_v4 = vpop.f32.mrb[88].mxu0 }
 0xdc0   : > { %v3262_v63 = vcombine.low %v3155_v57, %v3203_v4  ;;  %v8671_v6 = vpop.f32.mrb[89].mxu0 }
 0xdc1   : > { %v3206_v7 = vpop.f32.mrb[90].mxu0 }
 0xdc2   : > { %v3265_v8 = vpack.c.bf16 %v3262_v63, %v3261_v53  ;;  %v8672_v9 = vpop.f32.mrb[91].mxu0  ;;  %v3251_v58 = vpop.f32.mrb[84].mxu1  ;;  %v8956_v7 = vld [vmem:[%s10750_s11 + $0x4] ss:$8 sps:$4 sm:$0xff]  }
 0xdc3   : > { %v3266_v61 = vpack.c.bf16 %v3251_v58, %v3251_v58  ;;  %v8677_v10 = vpop.f32.mrb[85].mxu1  ;;  %3578 = vmatprep.subr.bf16.mxu0 %v8956_v7  ;;  %v8959_v9 = vld [vmem:[%s10750_s11 + $0x14] ss:$8 sps:$4 sm:$0xff]   ;;  %v8957_v58 = vld [vmem:[%s10750_s11 + $0x10] ss:$8 sps:$4 sm:$0xff]  }
 0xdc4   : > { %v3254_v11 = vpop.f32.mrb[86].mxu1  ;;  %8681 = vmatprep.mubr.msk.bf16.mxu0 %vm845_vm3, %v3265_v8  ;;  %v8954_v8 = vld [vmem:[%s10750_s11] ss:$8 sps:$4 sm:$0xff]  }
 0xdc5   : > { %v8678_v23 = vpop.f32.mrb[87].mxu1  ;;  %8682 = vmatmul.mubr.msk.bf16.vlgmr.msra.gmra.mrb[92].mxu0 %vm845_vm3, %v3266_v61  ;;  %v8962_v61 = vld [vmem:[%s10750_s11 + $0x24] ss:$8 sps:$4 sm:$0xff]   ;;  %v8960_v10 = vld [vmem:[%s10750_s11 + $0x20] ss:$8 sps:$4 sm:$0xff]  }
 0xdc6   : > { %3610 = vmatprep.mubr.bf16.mxu0 %v9202_v25  ;;  %3579 = vmatpush1.bf16.msra.mxu0 %v8954_v8  ;;  %v8963_v11 = vld [vmem:[%s10750_s11 + $0x30] ss:$8 sps:$4 sm:$0xff]   ;;  %v8965_v23 = vld [vmem:[%s10750_s11 + $0x34] ss:$8 sps:$4 sm:$0xff]  }
 0xdc7   : > { %3580 = vmatprep.subr.bf16.mxu0 %v8959_v9 }
 0xdca   : > { %3581 = vmatpush1.bf16.msra.mxu0 %v8957_v58 }
 0xdcb   : > { %3582 = vmatprep.subr.bf16.mxu0 %v8962_v61 }
 0xdce   : > { %3583 = vmatpush1.bf16.msra.mxu0 %v8960_v10 }
 0xdcf   : > { %3584 = vmatprep.subr.bf16.mxu0 %v8965_v23 }
 0xdd2   : > { %3585 = vmatpush1.bf16.msra.mxu0 %v8963_v11 }
 0xdd3   : > { %8709 = vmatprep.subr.bf16.mxu0 %v9203_v55 }
 0xe98   : > { %v8683_v27 = vpop.f32.mrb[92].mxu0 }
 0xe99   : > { %v3332_v17 = vadd.f32 %v8683_v27, %v9768_v44  ;;  %v3316_v5 = vpop.f32.mrb[93].mxu0  ;;  %v8102_v44 = vld [vmem:[%s10747_s8] ss:$0 sm:$0xff] }
 0xe9a   : > { %v3330_v2 = vadd.f32 %v3316_v5, %v9771_v24  ;;  %v8684_v19 = vpop.f32.mrb[94].mxu0 }
 0xe9b   : > { %v3319_v21 = vpop.f32.mrb[95].mxu0  ;;  %v3342_v26 = vadd.f32 %v8101_v18, %v3332_v17 }
 0xe9c   : > { %v3331_v22 = vadd.f32 %v3319_v21, %v9774_v46  ;;  %v3340_v29 = vadd.f32 %v8101_v18, %v3330_v2 }
 0xe9d   : > { %v3344_v32 = vpack.c.bf16 %v3342_v26, %v3342_v26 }
 0xe9e   : > { %v3341_v30 = vadd.f32 %v8101_v18, %v3331_v22 }
 0xea0   : > { %v3343_v31 = vpack.c.bf16 %v3341_v30, %v3340_v29  ;;  %v8109_v29 = vld [vmem:[%s10748_s9] ss:$0 sm:$0xff] }
 0xea2   : > { %8693 = vmatprep.mubr.msk.bf16.mxu1 %vm653_vm0, %v3343_v31 }
 0xea3   : > { %8694 = vmatmul.mubr.msk.bf16.vlgmr.msra.gmra.mrb[88].mxu1 %vm653_vm0, %v3344_v32 }
 0xea4   : > { %8699 = vmatprep.mubr.msk.bf16.mxu1 %vm9204_vm2, %v9203_v55 }
 0xf76   : > { %v8695_v24 = vpop.f32.mrb[88].mxu1 }
 0xf77   : > { %v3433_v46 = vadd.f32 %v8695_v24, %v8102_v44  ;;  %v3424_v33 = vpop.f32.mrb[89].mxu1  ;;  %v8110_v24 = vld [vmem:[%s10749_s10] ss:$0 sm:$0xff] }
 0xf78   : > { %v3425_v62 = vadd.f32 %v8102_v44, %v3424_v33  ;;  %v8696_v34 = vpop.f32.mrb[90].mxu1 }
 0xf79   : > { %v3440_v36 = vadd.f32 %v9184_v35, %v3433_v46  ;;  %v3427_v37 = vpop.f32.mrb[91].mxu1 }
 0xf7a   : > { %v3438_v38 = vadd.f32 %v9185_v20, %v3425_v62  ;;  %v3428_v39 = vadd.f32 %v8102_v44, %v3427_v37 }
 0xf7b   : > { %3443 = vst.msk [vmem:[#allocation2 + $0x10] sm:$0xf] %vm660_vm1, %v3440_v36 }
 0xf7c   : > { %3441 = vst.msk [vmem:[#allocation2] sm:$0xff] %vm653_vm0, %v3438_v38  ;;  %v3439_v41 = vadd.f32 %v9186_v40, %v3428_v39  ;;  %v9212_v38 = vmov 1966171168   ;;  %v3636_v40 = vlaneseq }
 0xf7d   : > { %v3634_v39 = vunpack.c.l.s4 %v9212_v38 }
 0xf7e   : > { %3442 = vst.msk [vmem:[#allocation2 + $0x8] sm:$0xff] %vm653_vm0, %v3439_v41 }
 0xf7f   : > { %v3635_v41 = vunpack.c.0.s8 %v3634_v39 }
 0xf85   : > { %v3444_v42 = vld [vmem:[#allocation2] ss:$4 sm:$0x1f]  ;;  %v3448_v43 = vld [vmem:[#allocation2 + $0x1] ss:$4 sm:$0x1f] }
 0xf86   : > { %v3451_v15 = vld [vmem:[#allocation2 + $0x2] ss:$4 sm:$0x1f]  ;;  %v3454_v45 = vld [vmem:[#allocation2 + $0x3] ss:$4 sm:$0x1f] }
 0xf87   : > { %3449 = vst.msk [vmem:[#allocation3 + $0x5] sm:$0x1f] %vm3445_vm7, %v3448_v43  ;;  %3446 = vst.msk [vmem:[#allocation3] sm:$0x1f] %vm3445_vm7, %v3444_v42  ;;  %v9885_v42 = vshrl.u32 %v3636_v40, 7 }
 0xf88   : > { %3452 = vst.msk [vmem:[#allocation3 + $0xa] sm:$0x1f] %vm3445_vm7, %v3451_v15  ;;  %3455 = vst.msk [vmem:[#allocation3 + $0xf] sm:$0x1f] %vm3445_vm7, %v3454_v45 }
 0xf89   : > { %v9888_v43 = vsub.s32 %v3635_v41, %v9885_v42 }
 0xf8e   : > { %v3456_v28 = vld [vmem:[#allocation3] sm:$0xff] }
 0xf8f   : > { %v3457_v3 = vld [vmem:[#allocation3 + $0x8] sm:$0xff]  ;;  %v3461_v47 = vsel %vm653_vm0, %v3456_v28, 0.0  ;;  %v3458_v49 = vld [vmem:[#allocation3 + $0x10] sm:$0xf] }
 0xf90   : > { %v3464_v48 = vsel %vm653_vm0, %v3457_v3, 0.0  ;;  %3462 = vadd.xlane.f32.xlu0 %v3461_v47  ;;  %v3467_v50 = vsel %vm660_vm1, %v3458_v49, 0.0 }
 0xf91   : > { %3465 = vadd.xlane.f32.xlu1 %v3464_v48 }
 0xf94   : > { %3468 = vadd.xlane.f32.xlu0 %v3467_v50 }
0x101d   : > { %v3463_v51 = vpop.xlane.xlu0 %3462 }
0x101e   : > { %v3466_v12 = vpop.xlane.xlu1 %3465  ;;  %v3470_v52 = vmul.f32 0.015625, %v3463_v51 }
0x101f   : > { %v3471_v13 = vmul.f32 0.015625, %v3466_v12 }
0x1020   : > { %v3473_v53 = vsub.f32 %v3456_v28, %v3470_v52 }
0x1021   : > { %v3474_v54 = vsub.f32 %v3457_v3, %v3471_v13  ;;  %v3469_v56 = vpop.xlane.xlu0 %3468 }
0x1022   : > { %v3472_v16 = vmul.f32 0.015625, %v3469_v56  ;;  %v3476_v57 = vmul.f32 %v3473_v53, %v3473_v53 }
0x1023   : > { %v3477_v1 = vmul.f32 %v3474_v54, %v3474_v54 }
0x1024   : > { %v3475_v59 = vsub.f32 %v3458_v49, %v3472_v16  ;;  %v3479_v60 = vsel %vm653_vm0, %v3476_v57, 0.0 }
0x1025   : > { %3480 = vadd.xlane.f32.xlu0 %v3479_v60  ;;  %v3482_v63 = vsel %vm653_vm0, %v3477_v1, 0.0 }
0x1026   : > { %v3478_v4 = vmul.f32 %v3475_v59, %v3475_v59 }
0x1028   : > { %v3485_v6 = vsel %vm660_vm1, %v3478_v4, 0.0 }
0x1029   : > { %3483 = vadd.xlane.f32.xlu0 %v3482_v63  ;;  %3486 = vadd.xlane.f32.xlu1 %v3485_v6 }
0x10b2   : > { %v3481_v0 = vpop.xlane.xlu0 %3480 }
0x10b3   : > { %v3488_v14 = vmul.f32 0.015625, %v3481_v0 }
0x10b5   : > { %v3491_v27 = vadd.f32 1e-05, %v3488_v14 }
0x10b6   : > { %v3487_v17 = vpop.xlane.xlu1 %3486  ;;  %v3484_v5 = vpop.xlane.xlu0 %3483 }
0x10b7   : > { %9084 = vrsqrt.f32 %v3491_v27  ;;  %v3490_v18 = vmul.f32 0.015625, %v3487_v17  ;;  %v3489_v2 = vmul.f32 0.015625, %v3484_v5 }
0x10b9   : > { %v3493_v19 = vadd.f32 1e-05, %v3490_v18  ;;  %v3492_v21 = vadd.f32 1e-05, %v3489_v2 }
0x10bb   : > { %9086 = vrsqrt.f32 %v3493_v19 }
0x10bc   : > { %9088 = vrsqrt.f32 %v3492_v21 }
0x10c1   : > { %v9085_v22 = vpop.eup %9084 }
0x10c2   : > { %v3497_v26 = vmul.f32 %v9085_v22, %v3473_v53 }
0x10c4   : > { %v3506_v32 = vmul.f32 %v8109_v29, %v3497_v26 }
0x10c5   : > { %v9087_v30 = vpop.eup %9086 }
0x10c6   : > { %v9089_v31 = vpop.eup %9088  ;;  %v3499_v33 = vmul.f32 %v9087_v30, %v3475_v59  ;;  %v3515_v62 = vadd.f32 %v8110_v24, %v3506_v32 }
0x10c7   : > { %v3498_v44 = vmul.f32 %v9089_v31, %v3474_v54 }
0x10c8   : > { %v3508_v36 = vmul.f32 %v8109_v29, %v3499_v33 }
0x10c9   : > { %v3507_v46 = vmul.f32 %v8109_v29, %v3498_v44 }
0x10ca   : > { %v3517_v37 = vadd.f32 %v8110_v24, %v3508_v36 }
0x10cb   : > { %v3516_v34 = vadd.f32 %v8110_v24, %v3507_v46 }
0x10cc   : > { %v3523_v20 = vpack.c.bf16 %v3517_v37, %v3517_v37 }
0x10cd   : > { %v3522_v35 = vpack.c.bf16 %v3516_v34, %v3515_v62 }
0x10cf   : > { %8119 = vmatmul.mubr.msk.bf16.vlgmr.msra.gmra.mrb[96].mxu0 %vm653_vm0, %v3522_v35 }
0x10d0   : > { %3620 = vmatprep.mubr.bf16.mxu0 %v9202_v25 }
0x10d7   : > { %8120 = vmatmul.mubr.msk.bf16.gmra.mrb[100].mxu0 %vm653_vm0, %v3523_v20 }
0x10d8   : > { %8711 = vmatprep.mubr.msk.bf16.mxu0 %vm9204_vm2, %v9203_v55 }
0x11a2   : > { %v3612_v15 = vpop.f32.mrb[96].mxu0 }
0x11a3   : > { %v3632_v45 = vcombine.high %v3612_v15, %v3612_v15  ;;  %v3639_v28 = vrot.slane %v3612_v15, %v9888_v43  ;;  %v9891_v3 = vpop.f32.mrb[97].mxu0 }
0x11a4   : > { %v3921_v47 = vcombine.high %v9891_v3, %v9891_v3  ;;  %v3616_v48 = vpop.f32.mrb[98].mxu0 }
0x11a5   : > { %v3646_v49 = vrot.slane %v3632_v45, %v9888_v43  ;;  %v3647_v50 = vcombine.high %v3639_v28, %v3639_v28  ;;  %v3681_v51 = vcombine.high %v3616_v48, %v3616_v48  ;;  %v3618_v12 = vpop.f32.mrb[99].mxu0  ;;  %v3688_v13 = vrot.slane %v3616_v48, %v9888_v43 }
0x11a6   : > { %v3935_v52 = vrot.slane %v3921_v47, %v9888_v43  ;;  %v3655_v54 = vrot.slane %v3639_v28, %v9888_v43  ;;  %v3970_v39 = vcombine.high %v3618_v12, %v3618_v12  ;;  %v3977_v45 = vrot.slane %v3618_v12, %v9888_v43 }
0x11a7   : > { %v3648_v53 = vcombine.high %v3646_v49, %v3646_v49  ;;  %v3662_v56 = vrot.slane %v3646_v49, %v9888_v43  ;;  %v3669_v16 = vrot.slane %v3647_v50, %v9888_v43  ;;  %v3695_v59 = vrot.slane %v3681_v51, %v9888_v43 }
0x11a8   : > { %v3937_v57 = vcombine.high %v3935_v52, %v3935_v52  ;;  %v9904_v63 = vrot.slane %v3935_v52, %v9888_v43  ;;  %v3696_v7 = vcombine.high %v3688_v13, %v3688_v13  ;;  %v3704_v2 = vrot.slane %v3688_v13, %v9888_v43 }
0x11a9   : > { %v3676_v60 = vrot.slane %v3648_v53, %v9888_v43  ;;  %v3754_v1 = vcombine.low %v3655_v54, %v3669_v16  ;;  %v8121_v4 = vcombine.high %v3655_v54, %v3669_v16  ;;  %v3678_v6 = vcombine.high %v3662_v56, %v3662_v56 }
0x11aa   : > { %v3622_v8 = vpop.f32.mrb[100].mxu0  ;;  %v3776_v61 = vrot.slane %v3662_v56, %v9888_v43  ;;  %v3965_v11 = vrot.slane %v3937_v57, %v9888_v43  ;;  %v3967_v14 = vcombine.high %v9904_v63, %v9904_v63  ;;  %v3697_v17 = vcombine.high %v3695_v59, %v3695_v59 }
0x11ab   : > { %v3762_v9 = vrot.slane %v3754_v1, %v9888_v43  ;;  %v3769_v58 = vrot.slane %v8121_v4, %v9888_v43  ;;  %v3624_v10 = vpop.f32.mrb[101].mxu0  ;;  %v3680_v27 = vcombine.high %v3676_v60, %v3676_v60  ;;  %v3793_v18 = vcombine.low %v3676_v60, %v3678_v6 }
0x11ac   : > { %v3626_v23 = vpop.f32.mrb[102].mxu0  ;;  %v3711_v19 = vrot.slane %v3695_v59, %v9888_v43  ;;  %v3718_v21 = vrot.slane %v3696_v7, %v9888_v43  ;;  %v3791_v26 = vrot.slane %v3776_v61, %v9888_v43  ;;  %v3725_v29 = vrot.slane %v3697_v17, %v9888_v43 }
0x11ad   : > { %v3777_v0 = vcombine.low %v3762_v9, %v3769_v58  ;;  %v3627_v5 = vpop.f32.mrb[103].mxu0  ;;  %v3794_v31 = vcombine.low %v3680_v27, %v3704_v2  ;;  %v4082_v46 = vcombine.low %v3965_v11, %v3967_v14  ;;  %v3801_v62 = vrot.slane %v3793_v18, %v9888_v43 }
0x11ae   : > { %v3727_v30 = vcombine.high %v3711_v19, %v3711_v19  ;;  %v3815_v32 = vrot.slane %v3718_v21, %v9888_v43  ;;  %v8122_v44 = vcombine.high %v3704_v2, %v3718_v21  ;;  %v3833_v33 = vcombine.low %v3711_v19, %v3725_v29 }
0x11af   : > { %v3784_v22 = vrot.slane %v3777_v0, %v9888_v43  ;;  %v3808_v34 = vrot.slane %v3794_v31, %v9888_v43  ;;  %v3969_v36 = vcombine.high %v3965_v11, %v3965_v11  ;;  %v3984_v47 = vrot.slane %v3970_v39, %v9888_v43 }
0x11b0   : > { %v3854_v35 = vrot.slane %v3727_v30, %v9888_v43  ;;  %v3840_v20 = vrot.slane %v8122_v44, %v9888_v43  ;;  %v3847_v38 = vrot.slane %v3833_v33, %v9888_v43  ;;  %v3830_v41 = vrot.slane %v3815_v32, %v9888_v43 }
0x11b1   : > { %v3792_v24 = vcombine.low %v3784_v22, %v3791_v26  ;;  %v3816_v40 = vcombine.low %v3801_v62, %v3808_v34  ;;  %v4090_v48 = vrot.slane %v4082_v46, %v9888_v43  ;;  %v3729_v49 = vcombine.high %v3725_v29, %v3725_v29 }
0x11b2   : > { %v3869_v15 = vrot.slane %v3854_v35, %v9888_v43  ;;  %v3855_v28 = vcombine.low %v3840_v20, %v3847_v38  ;;  %v3985_v51 = vcombine.high %v3977_v45, %v3977_v45  ;;  %v3993_v52 = vrot.slane %v3977_v45, %v9888_v43 }
0x11b3   : > { %v9922_v37 = vpack.c.bf16 %v3792_v24, %v3792_v24  ;;  %v3823_v50 = vrot.slane %v3816_v40, %v9888_v43  ;;  %v3736_v13 = vrot.slane %v3622_v8, %v9888_v43  ;;  %v3986_v54 = vcombine.high %v3984_v47, %v3984_v47 }
0x11b4   : > { %v3862_v53 = vrot.slane %v3855_v28, %v9888_v43  ;;  %v4000_v12 = vrot.slane %v3984_v47, %v9888_v43  ;;  %v4025_v56 = vrot.slane %v3624_v10, %v9888_v43  ;;  %v4007_v57 = vrot.slane %v3985_v51, %v9888_v43 }
0x11b5   : > { %4232 = vrot.lane.b32.xlu0 %v9922_v37, %s9205_s4  ;;  %v3831_v16 = vcombine.low %v3823_v50, %v3830_v41  ;;  %v4083_v59 = vcombine.low %v3969_v36, %v3993_v52  ;;  %v3737_v60 = vcombine.high %v3736_v13, %v3736_v13  ;;  %v4014_v4 = vrot.slane %v3986_v54, %v9888_v43 }
0x11b6   : > { %v3870_v1 = vcombine.low %v3862_v53, %v3869_v15  ;;  %v4016_v6 = vcombine.high %v4000_v12, %v4000_v12  ;;  %v3744_v7 = vrot.slane %v3736_v13, %v9888_v43  ;;  %v4104_v58 = vrot.slane %v4007_v57, %v9888_v43 }
0x11b7   : > { %v9942_v9 = vpack.c.bf16 %v3831_v16, %v3831_v16  ;;  %v4097_v8 = vrot.slane %v4083_v59, %v9888_v43  ;;  %v8124_v61 = vcombine.high %v3993_v52, %v4007_v57  ;;  %v4122_v10 = vcombine.low %v4000_v12, %v4014_v4 }
0x11b8   : > { %v9946_v11 = vpack.c.bf16 %v3870_v1, %v3870_v1  ;;  %v3751_v23 = vrot.slane %v3737_v60, %v9888_v43  ;;  %v4119_v14 = vrot.slane %v4104_v58, %v9888_v43  ;;  %v4143_v27 = vrot.slane %v4016_v6, %v9888_v43 }
0x11b9   : > { %v4105_v0 = vcombine.low %v4090_v48, %v4097_v8  ;;  %v3752_v17 = vcombine.high %v3744_v7, %v3744_v7  ;;  %4281 = vrot.lane.b32.xlu1 %v9942_v9, %s9205_s4  ;;  %v4129_v5 = vrot.slane %v8124_v61, %v9888_v43  ;;  %v4136_v18 = vrot.slane %v4122_v10, %v9888_v43 }
0x11ba   : > { %v3753_v2 = vcombine.high %v3751_v23, %v3751_v23  ;;  %v3871_v19 = vcombine.low %v3729_v49, %v3744_v7  ;;  %v4018_v26 = vcombine.high %v4014_v4, %v4014_v4  ;;  %v4026_v29 = vcombine.high %v4025_v56, %v4025_v56 }
0x11bb   : > { %v4112_v21 = vrot.slane %v4105_v0, %v9888_v43  ;;  %v3872_v22 = vcombine.low %v3751_v23, %v3752_v17  ;;  %v4144_v30 = vcombine.low %v4129_v5, %v4136_v18  ;;  %v4033_v32 = vrot.slane %v4025_v56, %v9888_v43 }
0x11bc   : > { %v3879_v31 = vrot.slane %v3871_v19, %v9888_v43  ;;  %v3893_v46 = vrot.slane %v3753_v2, %v9888_v43  ;;  %v4040_v33 = vrot.slane %v4026_v29, %v9888_v43  ;;  %v4158_v34 = vrot.slane %v4143_v27, %v9888_v43 }
0x11bd   : > { %v9958_v44 = vcombine.low %v4112_v21, %v4119_v14  ;;  %v3886_v24 = vrot.slane %v3872_v22, %v9888_v43  ;;  %4330 = vrot.lane.b32.xlu1 %v9946_v11, %s9205_s4  ;;  %v4151_v62 = vrot.slane %v4144_v30, %v9888_v43  ;;  %v4041_v35 = vcombine.high %v4033_v32, %v4033_v32 }
0x11be   : > { %v4160_v36 = vcombine.low %v4018_v26, %v4033_v32  ;;  %v4042_v38 = vcombine.high %v4040_v33, %v4040_v33  ;;  %v3908_v15 = vrot.slane %v3893_v46, %v9888_v43  ;;  %v3928_v53 = vrot.slane %v9891_v3, %v9888_v43 }
0x11bf   : > { %v3894_v20 = vcombine.low %v3879_v31, %v3886_v24  ;;  %v9967_v39 = vcombine.low %v4151_v62, %v4158_v34  ;;  %v4161_v40 = vcombine.low %v4040_v33, %v4041_v35  ;;  %v4065_v3 = vrot.slane %v9904_v63, %v9888_v43 }
0x11c0   : > { %v4168_v45 = vrot.slane %v4160_v36, %v9888_v43  ;;  %v4182_v47 = vrot.slane %v4042_v38, %v9888_v43  ;;  %v3936_v54 = vcombine.high %v3928_v53, %v3928_v53  ;;  %v3944_v56 = vrot.slane %v3928_v53, %v9888_v43 }
0x11c1   : > { %v3901_v41 = vrot.slane %v3894_v20, %v9888_v43  ;;  %v4175_v28 = vrot.slane %v4161_v40, %v9888_v43  ;;  %v4080_v58 = vrot.slane %v4065_v3, %v9888_v43  ;;  %v9213_v0 = vmov 65535  }
0x11c2   : > { %v4197_v52 = vrot.slane %v4182_v47, %v9888_v43  ;;  %v3958_v12 = vrot.slane %v3936_v54, %v9888_v43  ;;  %v4481_v14 = vsel %vm1153_vm4, 4294967295, %v9213_v0  ;;  %v10022_v19 = vpack.c.bf16 %v9958_v44, %v9958_v44 }
0x11c3   : > { %v3909_v48 = vcombine.low %v3901_v41, %v3908_v15  ;;  %v4183_v49 = vcombine.low %v4168_v45, %v4175_v28  ;;  %v10005_v17 = vsel %vm4480_vm8, %v4481_v14, 0 }
0x11c4   : > { %v4043_v16 = vcombine.low %v3944_v56, %v3958_v12  ;;  %v8123_v57 = vcombine.high %v3944_v56, %v3958_v12  ;;  %v4530_v21 = vand.u32 %v10005_v17, %v10022_v19 }
0x11c5   : > { %v9974_v50 = vpack.c.bf16 %v3909_v48, %v3909_v48  ;;  %v4190_v51 = vrot.slane %v4183_v49, %v9888_v43 }
0x11c6   : > { %v4051_v59 = vrot.slane %v4043_v16, %v9888_v43  ;;  %v4058_v60 = vrot.slane %v8123_v57, %v9888_v43 }
0x11c7   : > { %4379 = vrot.lane.b32.xlu1 %v9974_v50, %s9205_s4  ;;  %v9980_v13 = vcombine.low %v4190_v51, %v4197_v52  ;;  %s8029_s4 = sshll.u32 %s10789_s22, 2 }
0x11c8   : > { %v4066_v6 = vcombine.low %v4051_v59, %v4058_v60  ;;  %s10035_s2 = scalar_lea.vmem %s10781_s26, %s8029_s4  ;;  %s10785_s4 = smov 16  }
0x11c9   : > { %v10038_v22 = vld [vmem:[%s10035_s2] ss:$0 sm:$0xff]  ;;  %v10043_v24 = vld [vmem:[%s10035_s2 + $0x1] ss:$0 sm:$0xff]  ;;  %v10047_v62 = vld [vmem:[%s10035_s2 + $0x2] ss:$0 sm:$0xff] }
0x11ca   : > { %v4073_v7 = vrot.slane %v4066_v6, %v9888_v43  ;;  %v10053_v47 = vld [vmem:[%s10035_s2 + $0x3] ss:$0 sm:$0xff] }
0x11cc   : > { %v4081_v10 = vcombine.low %v4073_v7, %v4080_v58 }
0x11ce   : > { %v10003_v27 = vpack.c.bf16 %v4081_v10, %v4081_v10 }
0x11d0   : > { %v4484_v5 = vand.u32 %v10005_v17, %v10003_v27 }
0x1227   : > { %v4233_v1 = vpop.permute.xlu0 %4232 }
0x1228   : > { %v4238_v4 = vsel %vm845_vm3, %v4233_v1, 0 }
0x1229   : > { %8698 = vmatpush3.bf16.xpose.msra.mxu1 %v4238_v4 }
0x122a   : > { %8703 = vmatprep.subr.bf16.mxu1 %v9203_v55 }
0x122b   : > { %v4282_v8 = vpop.permute.xlu1 %4281 }
0x122c   : > { %v4287_v61 = vsel %vm845_vm3, %v4282_v8, 0 }
0x122f   : > { %v4331_v23 = vpop.permute.xlu1 %4330 }
0x1230   : > { %8700 = vmatmul.mubr.msk.bf16.vlgmr.msra.gmra.mrb[92].mxu1 %vm845_vm3, %v9922_v37  ;;  %v4336_v63 = vsel %vm845_vm3, %v4331_v23, 0 }
0x1231   : > { %8704 = vmatpush3.bf16.xpose.msra.mxu1 %v4287_v61  ;;  %8705 = vmatprep.mubr.msk.bf16.mxu1 %vm9204_vm2, %v9203_v55 }
0x1232   : > { %8715 = vmatprep.subr.bf16.mxu1 %v9203_v55  ;;  %8710 = vmatpush3.bf16.xpose.msra.mxu0 %v4336_v63 }
0x1233   : > { %8721 = vmatprep.subr.bf16.mxu0 %v9203_v55 }
0x1238   : > { %8706 = vmatmul.mubr.msk.bf16.vlgmr.msra.gmra.mrb[96].mxu1 %vm845_vm3, %v9942_v9 }
0x1239   : > { %8717 = vmatprep.mubr.msk.bf16.mxu1 %vm9204_vm2, %v9203_v55  ;;  %8712 = vmatmul.mubr.msk.bf16.vlgmr.msra.gmra.mrb[104].mxu0 %vm845_vm3, %v9946_v11  ;;  %v4380_v18 = vpop.permute.xlu1 %4379 }
0x123a   : > { %8722 = vmatpush3.bf16.msra.mxu0 %v4484_v5  ;;  %8723 = vmatprep.mubr.msk.bf16.mxu0 %vm9204_vm2, %v9203_v55  ;;  %v4385_v2 = vsel %vm845_vm3, %v4380_v18, 0 }
0x123b   : > { %8733 = vmatprep.subr.bf16.mxu0 %v9203_v55  ;;  %8716 = vmatpush3.bf16.xpose.msra.mxu1 %v4385_v2 }
0x123c   : > { %8727 = vmatprep.subr.bf16.mxu1 %v9203_v55 }
0x1242   : > { %8718 = vmatmul.mubr.msk.bf16.vlgmr.msra.gmra.mrb[100].mxu1 %vm845_vm3, %v9974_v50 }
0x1243   : > { %8728 = vmatpush3.bf16.msra.mxu1 %v4530_v21  ;;  %8729 = vmatprep.mubr.msk.bf16.mxu1 %vm9204_vm2, %v9203_v55 }
0x1244   : > { %8739 = vmatprep.subr.bf16.mxu1 %v9203_v55 }
0x1303   : > { %v4274_v26 = vpop.f32.mrb[92].mxu1 }
0x1304   : > { %v4275_v29 = vadd.f32 %v10038_v22, %v4274_v26  ;;  %v8701_v30 = vpop.f32.mrb[93].mxu1 }
0x1305   : > { %v4277_v31 = vpop.f32.mrb[94].mxu1 }
0x1306   : > { %v8702_v32 = vpop.f32.mrb[95].mxu1  ;;  %v4428_v44 = vsel %vm4427_vm9, %v4275_v29, -inf }
0x1307   : > { %4429 = vmax.xlane.f32.xlu0 %v4428_v44 }
0x130b   : > { %v4323_v46 = vpop.f32.mrb[96].mxu1 }
0x130c   : > { %v4324_v33 = vadd.f32 %v10043_v24, %v4323_v46  ;;  %v8707_v34 = vpop.f32.mrb[97].mxu1  ;;  %v4372_v36 = vpop.f32.mrb[104].mxu0 }
0x130d   : > { %v4326_v35 = vpop.f32.mrb[98].mxu1  ;;  %v4373_v40 = vadd.f32 %v10047_v62, %v4372_v36  ;;  %v8713_v41 = vpop.f32.mrb[105].mxu0 }
0x130e   : > { %v8708_v20 = vpop.f32.mrb[99].mxu1  ;;  %v4431_v38 = vsel %vm4427_vm9, %v4324_v33, -inf  ;;  %v4375_v15 = vpop.f32.mrb[106].mxu0 }
0x130f   : > { %4432 = vmax.xlane.f32.xlu1 %v4431_v38  ;;  %v8714_v45 = vpop.f32.mrb[107].mxu0  ;;  %v4434_v28 = vsel %vm4427_vm9, %v4373_v40, -inf }
0x1310   : > { %4435 = vmax.xlane.f32.xlu0 %v4434_v28 }
0x1315   : > { %v4421_v48 = vpop.f32.mrb[100].mxu1 }
0x1316   : > { %v4422_v49 = vadd.f32 %v10053_v47, %v4421_v48  ;;  %v8719_v51 = vpop.f32.mrb[101].mxu1 }
0x1317   : > { %v4424_v52 = vpop.f32.mrb[102].mxu1 }
0x1318   : > { %v8720_v53 = vpop.f32.mrb[103].mxu1  ;;  %v4437_v54 = vsel %vm4427_vm9, %v4422_v49, -inf }
0x1319   : > { %4438 = vmax.xlane.f32.xlu0 %v4437_v54 }
0x1320   : > { %5005 = vrot.lane.b32.xlu1 %v9942_v9, %s9206_s29 }
0x1394   : > { %v4430_v12 = vpop.xlane.xlu0 %4429 }
0x1395   : > { %v4440_v56 = vsub.f32 %v4275_v29, %v4430_v12  ;;  %v10079_v29 = vpack.c.bf16 %v9967_v39, %v9967_v39  ;;  %v10089_v39 = vpack.c.bf16 %v9980_v13, %v9980_v13 }
0x1397   : > { %v4444_v16 = vmul.f32 1.442695, %v4440_v56  ;;  %v4576_v44 = vand.u32 %v10005_v17, %v10079_v29  ;;  %v4622_v20 = vand.u32 %v10005_v17, %v10089_v39 }
0x1399   : > { %9090 = vpow2.f32 %v4444_v16 }
0x139c   : > { %v4433_v57 = vpop.xlane.xlu1 %4432 }
0x139d   : > { %v4441_v59 = vsub.f32 %v4324_v33, %v4433_v57  ;;  %v4436_v1 = vpop.xlane.xlu0 %4435 }
0x139e   : > { %v4442_v4 = vsub.f32 %v4373_v40, %v4436_v1 }
0x139f   : > { %v4446_v60 = vmul.f32 1.442695, %v4441_v59 }
0x13a0   : > { %v4448_v6 = vmul.f32 1.442695, %v4442_v4  ;;  %v5006_v2 = vpop.permute.xlu1 %5005 }
0x13a1   : > { %9092 = vpow2.f32 %v4446_v60  ;;  %v5011_v54 = vsel %vm845_vm3, %v5006_v2, 0 }
0x13a2   : > { %9094 = vpow2.f32 %v4448_v6 }
0x13a3   : > { %v9091_v3 = vpop.eup %9090 }
0x13a4   : > { %v4452_v7 = vsel %vm4427_vm9, %v9091_v3, 0.0 }
0x13a5   : > { %4453 = vadd.xlane.f32.xlu0 %v4452_v7 }
0x13a6   : > { %v4439_v23 = vpop.xlane.xlu0 %4438 }
0x13a7   : > { %v4443_v63 = vsub.f32 %v4422_v49, %v4439_v23 }
0x13a9   : > { %v4450_v0 = vmul.f32 1.442695, %v4443_v63 }
0x13ab   : > { %v9093_v8 = vpop.eup %9092  ;;  %9096 = vpow2.f32 %v4450_v0 }
0x13ac   : > { %v4455_v58 = vsel %vm4427_vm9, %v9093_v8, 0.0  ;;  %v9095_v61 = vpop.eup %9094 }
0x13ad   : > { %4456 = vadd.xlane.f32.xlu1 %v4455_v58  ;;  %v4458_v10 = vsel %vm4427_vm9, %v9095_v61, 0.0 }
0x13ae   : > { %4459 = vadd.xlane.f32.xlu0 %v4458_v10 }
0x13b5   : > { %v9097_v14 = vpop.eup %9096 }
0x13b6   : > { %v4461_v5 = vsel %vm4427_vm9, %v9097_v14, 0.0 }
0x13be   : > { %4953 = vrot.lane.b32.xlu1 %v9922_v37, %s10782_s25 }
0x13c4   : > { %4955 = vrot.lane.b32.xlu0 %v9922_v37, %s9206_s29 }
0x13c8   : > { %5003 = vrot.lane.b32.xlu0 %v9942_v9, %s10782_s25 }
0x13cc   : > { %5053 = vrot.lane.b32.xlu0 %v9946_v11, %s10782_s25 }
0x13e2   : > { %4462 = vadd.xlane.f32.xlu1 %v4461_v5 }
0x13f3   : > { %5055 = vrot.lane.b32.xlu1 %v9946_v11, %s9206_s29 }
0x13f7   : > { %5105 = vrot.lane.b32.xlu1 %v9974_v50, %s9206_s29  ;;  %s10783_s29 = smov 32  }
0x13fb   : > { %5103 = vrot.lane.b32.xlu1 %v9974_v50, %s10782_s25 }
0x1432   : > { %v4454_v18 = vpop.xlane.xlu0 %4453 }
0x1433   : > { %9098 = vrcp.f32 %v4454_v18 }
0x143a   : > { %v4457_v21 = vpop.xlane.xlu1 %4456 }
0x143b   : > { %9100 = vrcp.f32 %v4457_v21  ;;  %v4460_v30 = vpop.xlane.xlu0 %4459 }
0x143c   : > { %9102 = vrcp.f32 %v4460_v30 }
0x143d   : > { %v9099_v26 = vpop.eup %9098 }
0x143e   : > { %v4468_v31 = vmul.f32 %v9099_v26, %v9091_v3  ;;  %v4954_v41 = vpop.permute.xlu1 %4953 }
0x143f   : > { %v4956_v38 = vpop.permute.xlu0 %4955 }
0x1440   : > { %v4472_v32 = vpack.c.bf16 %v4468_v31, %v4468_v31  ;;  %v4961_v13 = vsel %vm845_vm3, %v4956_v38, 0 }
0x1442   : > { %8724 = vmatmul.mubr.msk.bf16.vlgmr.msra.gmra.mrb[108].mxu0 %vm4476_vm10, %v4472_v32 }
0x1443   : > { %8734 = vmatpush3.bf16.msra.mxu0 %v4576_v44  ;;  %8735 = vmatprep.mubr.msk.bf16.mxu0 %vm9204_vm2, %v9203_v55  ;;  %v5004_v48 = vpop.permute.xlu0 %5003 }
0x1444   : > { %8745 = vmatprep.subr.bf16.mxu0 %v9203_v55 }
0x1445   : > { %v9101_v46 = vpop.eup %9100 }
0x1446   : > { %v4469_v33 = vmul.f32 %v9101_v46, %v9093_v8  ;;  %v9103_v34 = vpop.eup %9102 }
0x1447   : > { %v4470_v36 = vmul.f32 %v9103_v34, %v9095_v61  ;;  %v5054_v51 = vpop.permute.xlu0 %5053 }
0x1448   : > { %v4473_v35 = vpack.c.bf16 %v4469_v33, %v4469_v33 }
0x1449   : > { %v4474_v40 = vpack.c.bf16 %v4470_v36, %v4470_v36 }
0x144a   : > { %8730 = vmatmul.mubr.msk.bf16.vlgmr.msra.gmra.mrb[104].mxu1 %vm4476_vm10, %v4473_v35 }
0x144b   : > { %8740 = vmatpush3.bf16.msra.mxu1 %v4622_v20  ;;  %8741 = vmatprep.mubr.msk.bf16.mxu1 %vm9204_vm2, %v9203_v55 }
0x144c   : > { %8751 = vmatprep.subr.bf16.mxu1 %v9203_v55  ;;  %8736 = vmatmul.mubr.msk.bf16.vlgmr.msra.gmra.mrb[112].mxu0 %vm4476_vm10, %v4474_v40 }
0x144d   : > { %8746 = vmatpush3.bf16.xpose.msra.mxu0 %v4961_v13  ;;  %8747 = vmatprep.mubr.msk.bf16.mxu0 %vm9204_vm2, %v9203_v55 }
0x144e   : > { %8757 = vmatprep.subr.bf16.mxu0 %v9203_v55 }
0x1454   : > { %8748 = vmatmul.mubr.msk.bf16.vlgmr.msra.gmra.mrb[116].mxu0 %vm845_vm3, %v4954_v41 }
0x1455   : > { %8759 = vmatprep.mubr.msk.bf16.mxu0 %vm9204_vm2, %v9203_v55 }
0x146f   : > { %v4463_v15 = vpop.xlane.xlu1 %4462 }
0x1470   : > { %9104 = vrcp.f32 %v4463_v15 }
0x1473   : > { %v5056_v45 = vpop.permute.xlu1 %5055 }
0x1474   : > { %v5061_v28 = vsel %vm845_vm3, %v5056_v45, 0 }
0x1475   : > { %8758 = vmatpush3.bf16.xpose.msra.mxu0 %v5061_v28 }
0x1476   : > { %8769 = vmatprep.subr.bf16.mxu0 %v9203_v55 }
0x1477   : > { %v5106_v12 = vpop.permute.xlu1 %5105 }
0x1478   : > { %v5111_v56 = vsel %vm845_vm3, %v5106_v12, 0 }
0x147a   : > { %v9105_v49 = vpop.eup %9104 }
0x147b   : > { %v4471_v52 = vmul.f32 %v9105_v49, %v9097_v14  ;;  %v5104_v16 = vpop.permute.xlu1 %5103 }
0x147c   : > { %8760 = vmatmul.mubr.msk.bf16.vlgmr.msra.gmra.mrb[120].mxu0 %vm845_vm3, %v5054_v51 }
0x147d   : > { %v4475_v53 = vpack.c.bf16 %v4471_v52, %v4471_v52  ;;  %8771 = vmatprep.mubr.msk.bf16.mxu0 %vm9204_vm2, %v9203_v55 }
0x147f   : > { %8742 = vmatmul.mubr.msk.bf16.vlgmr.msra.gmra.mrb[108].mxu1 %vm4476_vm10, %v4475_v53 }
0x1480   : > { %8752 = vmatpush3.bf16.xpose.msra.mxu1 %v5011_v54  ;;  %8753 = vmatprep.mubr.msk.bf16.mxu1 %vm9204_vm2, %v9203_v55 }
0x1481   : > { %8763 = vmatprep.subr.bf16.mxu1 %v9203_v55 }
0x1487   : > { %8754 = vmatmul.mubr.msk.bf16.vlgmr.msra.gmra.mrb[112].mxu1 %vm845_vm3, %v5004_v48 }
0x1488   : > { %8764 = vmatpush3.bf16.xpose.msra.mxu1 %v5111_v56  ;;  %8765 = vmatprep.mubr.msk.bf16.mxu1 %vm9204_vm2, %v9203_v55 }
0x1489   : > { %8775 = vmatprep.subr.bf16.mxu1 %v9203_v55 }
0x148f   : > { %8766 = vmatmul.mubr.msk.bf16.vlgmr.msra.gmra.mrb[116].mxu1 %vm845_vm3, %v5104_v16 }
0x1490   : > { %8777 = vmatprep.mubr.msk.bf16.mxu1 %vm9204_vm2, %v9203_v55 }
0x1515   : > { %v4520_v57 = vpop.f32.mrb[108].mxu0 }
0x1516   : > { %v4675_v59 = vrot.slane %v4520_v57, %v9888_v43  ;;  %v8725_v60 = vpop.f32.mrb[109].mxu0  ;;  %v4668_v4 = vcombine.high %v4520_v57, %v4520_v57 }
0x1517   : > { %v4523_v1 = vpop.f32.mrb[110].mxu0 }
0x1518   : > { %v4683_v6 = vcombine.high %v4675_v59, %v4675_v59  ;;  %v8726_v3 = vpop.f32.mrb[111].mxu0  ;;  %v4690_v8 = vrot.slane %v4675_v59, %v9888_v43  ;;  %v4682_v58 = vrot.slane %v4668_v4, %v9888_v43 }
0x151a   : > { %v4704_v7 = vrot.slane %v4683_v6, %v9888_v43  ;;  %v4697_v18 = vrot.slane %v4682_v58, %v9888_v43 }
0x151c   : > { %v4824_v61 = vcombine.low %v4690_v8, %v4704_v7  ;;  %v8137_v23 = vcombine.high %v4690_v8, %v4704_v7 }
0x151d   : > { %v4566_v10 = vpop.f32.mrb[104].mxu1 }
0x151e   : > { %v4707_v63 = vcombine.high %v4566_v10, %v4566_v10  ;;  %v4714_v0 = vrot.slane %v4566_v10, %v9888_v43  ;;  %v8731_v14 = vpop.f32.mrb[105].mxu1  ;;  %v4834_v32 = vrot.slane %v4824_v61, %v9888_v43  ;;  %v4841_v33 = vrot.slane %v8137_v23, %v9888_v43 }
0x151f   : > { %v4569_v5 = vpop.f32.mrb[106].mxu1  ;;  %v4612_v30 = vpop.f32.mrb[112].mxu0 }
0x1520   : > { %v4721_v2 = vrot.slane %v4707_v63, %v9888_v43  ;;  %v4722_v21 = vcombine.high %v4714_v0, %v4714_v0  ;;  %v4729_v26 = vrot.slane %v4714_v0, %v9888_v43  ;;  %v8732_v31 = vpop.f32.mrb[107].mxu1  ;;  %v4753_v44 = vrot.slane %v4612_v30, %v9888_v43  ;;  %v8737_v46 = vpop.f32.mrb[113].mxu0 }
0x1521   : > { %v4615_v20 = vpop.f32.mrb[114].mxu0  ;;  %v4856_v48 = vcombine.low %v4834_v32, %v4841_v33  ;;  %v4746_v58 = vcombine.high %v4612_v30, %v4612_v30 }
0x1522   : > { %v4743_v34 = vrot.slane %v4722_v21, %v9888_v43  ;;  %v4744_v35 = vcombine.high %v4729_v26, %v4729_v26  ;;  %v4826_v36 = vcombine.low %v4697_v18, %v4729_v26  ;;  %v4761_v38 = vcombine.high %v4753_v44, %v4753_v44  ;;  %v8738_v40 = vpop.f32.mrb[115].mxu0 }
0x1523   : > { %v4736_v13 = vrot.slane %v4721_v2, %v9888_v43  ;;  %v4768_v45 = vrot.slane %v4753_v44, %v9888_v43  ;;  %v4864_v1 = vrot.slane %v4856_v48, %v9888_v43  ;;  %v4760_v63 = vrot.slane %v4746_v58, %v9888_v43 }
0x1524   : > { %v4745_v41 = vcombine.high %v4743_v34, %v4743_v34  ;;  %v4827_v15 = vcombine.low %v4743_v34, %v4744_v35  ;;  %v4782_v28 = vrot.slane %v4761_v38, %v9888_v43  ;;  %v4848_v49 = vrot.slane %v4826_v36, %v9888_v43 }
0x1525   : > { %v4775_v30 = vrot.slane %v4760_v63, %v9888_v43 }
0x1526   : > { %v4855_v51 = vrot.slane %v4827_v15, %v9888_v43  ;;  %v4873_v52 = vcombine.low %v4745_v41, %v4736_v13  ;;  %v4874_v53 = vcombine.low %v4768_v45, %v4782_v28  ;;  %v8138_v31 = vcombine.high %v4768_v45, %v4782_v28 }
0x1527   : > { %v4997_v56 = vpop.f32.mrb[116].mxu0 }
0x1528   : > { %v4857_v54 = vcombine.low %v4848_v49, %v4855_v51  ;;  %v4883_v12 = vrot.slane %v4873_v52, %v9888_v43  ;;  %v4890_v16 = vrot.slane %v4874_v53, %v9888_v43  ;;  %v4998_v57 = vadd.f32 %v10038_v22, %v4997_v56  ;;  %v8749_v59 = vpop.f32.mrb[117].mxu0 }
0x1529   : > { %v5000_v60 = vpop.f32.mrb[118].mxu0  ;;  %v4897_v33 = vrot.slane %v8138_v31, %v9888_v43 }
0x152a   : > { %v4871_v4 = vrot.slane %v4857_v54, %v9888_v43  ;;  %v4905_v6 = vcombine.low %v4883_v12, %v4890_v16  ;;  %v8750_v3 = vpop.f32.mrb[119].mxu0  ;;  %v5153_v7 = vsel %vm4427_vm9, %v4998_v57, -inf }
0x152b   : > { %5154 = vmax.xlane.f32.xlu0 %v5153_v7 }
0x152c   : > { %v10146_v8 = vcombine.low %v4864_v1, %v4871_v4  ;;  %v4913_v15 = vrot.slane %v4905_v6, %v9888_v43 }
0x154f   : > { %v5097_v61 = vpop.f32.mrb[120].mxu0 }
0x1550   : > { %v5098_v10 = vadd.f32 %v10047_v62, %v5097_v61  ;;  %v8761_v23 = vpop.f32.mrb[121].mxu0 }
0x1551   : > { %v5100_v0 = vpop.f32.mrb[122].mxu0 }
0x1552   : > { %v10150_v14 = vpop.f32.mrb[108].mxu1  ;;  %v8762_v5 = vpop.f32.mrb[123].mxu0  ;;  %v5159_v18 = vsel %vm4427_vm9, %v5098_v10, -inf }
0x1553   : > { %v10155_v2 = vrot.slane %v10150_v14, %v9888_v43  ;;  %v8743_v21 = vpop.f32.mrb[109].mxu1  ;;  %5160 = vmax.xlane.f32.xlu0 %v5159_v18 }
0x1554   : > { %v4661_v26 = vpop.f32.mrb[110].mxu1 }
0x1555   : > { %v10160_v32 = vrot.slane %v10155_v2, %v9888_v43  ;;  %v8744_v44 = vpop.f32.mrb[111].mxu1 }
0x1557   : > { %v4876_v46 = vcombine.low %v4775_v30, %v10160_v32 }
0x1559   : > { %v4904_v34 = vrot.slane %v4876_v46, %v9888_v43 }
0x155a   : > { %v5047_v35 = vpop.f32.mrb[112].mxu1 }
0x155b   : > { %v4906_v36 = vcombine.low %v4897_v33, %v4904_v34  ;;  %v5048_v20 = vadd.f32 %v10043_v24, %v5047_v35  ;;  %v8755_v38 = vpop.f32.mrb[113].mxu1 }
0x155c   : > { %v5050_v40 = vpop.f32.mrb[114].mxu1 }
0x155d   : > { %v8756_v13 = vpop.f32.mrb[115].mxu1  ;;  %v5156_v41 = vsel %vm4427_vm9, %v5048_v20, -inf  ;;  %v4920_v45 = vrot.slane %v4906_v36, %v9888_v43 }
0x155e   : > { %5157 = vmax.xlane.f32.xlu1 %v5156_v41 }
0x155f   : > { %v10169_v28 = vcombine.low %v4913_v15, %v4920_v45 }
0x1561   : > { %v4949_v48 = vpack.c.bf16 %v10169_v28, %v10146_v8 }
0x1562   : > { %v5147_v49 = vpop.f32.mrb[116].mxu1 }
0x1563   : > { %v5148_v51 = vadd.f32 %v10053_v47, %v5147_v49  ;;  %v8767_v52 = vpop.f32.mrb[117].mxu1 }
0x1564   : > { %v5150_v53 = vpop.f32.mrb[118].mxu1 }
0x1565   : > { %v8768_v54 = vpop.f32.mrb[119].mxu1  ;;  %v5162_v12 = vsel %vm4427_vm9, %v5148_v51, -inf  ;;  %v4800_v53 = vcombine.high %v10155_v2, %v10155_v2  ;;  %v8966_v2 = vld [vmem:[%s10751_s12] sm:$0xff]  }
0x1566   : > { %5163 = vmax.xlane.f32.xlu0 %v5162_v12  ;;  %v4785_v54 = vcombine.high %v10150_v14, %v10150_v14 }
0x1567   : > { %v4821_v12 = vrot.slane %v4800_v53, %v9888_v43 }
0x15b8   : > { %v5155_v56 = vpop.xlane.xlu0 %5154 }
0x15b9   : > { %v5165_v16 = vsub.f32 %v4998_v57, %v5155_v56  ;;  %v4799_v56 = vrot.slane %v4785_v54, %v9888_v43 }
0x15bb   : > { %v5169_v59 = vmul.f32 1.442695, %v5165_v16 }
0x15bd   : > { %9106 = vpow2.f32 %v5169_v59  ;;  %v4823_v59 = vcombine.high %v4821_v12, %v4821_v12 }
0x15c7   : > { %v9107_v60 = vpop.eup %9106 }
0x15c8   : > { %v5177_v1 = vsel %vm4427_vm9, %v9107_v60, 0.0 }
0x15c9   : > { %5178 = vadd.xlane.f32.xlu0 %v5177_v1  ;;  %v4822_v1 = vcombine.high %v10160_v32, %v10160_v32 }
0x15e0   : > { %v5161_v4 = vpop.xlane.xlu0 %5160 }
0x15e1   : > { %v5167_v6 = vsub.f32 %v5098_v10, %v5161_v4 }
0x15e3   : > { %v5173_v3 = vmul.f32 1.442695, %v5167_v6 }
0x15e5   : > { %9108 = vpow2.f32 %v5173_v3  ;;  %v4922_v3 = vcombine.low %v4821_v12, %v4822_v1 }
0x15eb   : > { %v5158_v7 = vpop.xlane.xlu1 %5157 }
0x15ec   : > { %v5166_v58 = vsub.f32 %v5048_v20, %v5158_v7 }
0x15ee   : > { %v5171_v61 = vmul.f32 1.442695, %v5166_v58 }
0x15ef   : > { %v9109_v23 = vpop.eup %9108 }
0x15f0   : > { %9110 = vpow2.f32 %v5171_v61  ;;  %v5183_v63 = vsel %vm4427_vm9, %v9109_v23, 0.0  ;;  %v4930_v61 = vrot.slane %v4922_v3, %v9888_v43 }
0x15f1   : > { %5184 = vadd.xlane.f32.xlu0 %v5183_v63 }
0x15f3   : > { %v5164_v10 = vpop.xlane.xlu0 %5163 }
0x15f4   : > { %v5168_v5 = vsub.f32 %v5148_v51, %v5164_v10 }
0x15f6   : > { %v5175_v18 = vmul.f32 1.442695, %v5168_v5 }
0x15f8   : > { %9112 = vpow2.f32 %v5175_v18 }
0x15fa   : > { %v9111_v0 = vpop.eup %9110 }
0x15fb   : > { %v5180_v57 = vsel %vm4427_vm9, %v9111_v0, 0.0 }
0x15fc   : > { %5181 = vadd.xlane.f32.xlu1 %v5180_v57 }
0x1602   : > { %v9113_v21 = vpop.eup %9112 }
0x1603   : > { %v5186_v26 = vsel %vm4427_vm9, %v9113_v21, 0.0 }
0x1607   : > { %5202 = vrot.lane.b32.xlu0 %v10003_v27, %s10782_s25 }
0x160b   : > { %5809 = vrot.lane.b32.xlu0 %v9922_v37, %s10783_s29 }
0x160d   : > { %5251 = vrot.lane.b32.xlu1 %v10022_v19, %s10782_s25 }
0x160f   : > { %5807 = vrot.lane.b32.xlu0 %v9922_v37, %s10784_s23 }
0x1611   : > { %5300 = vrot.lane.b32.xlu1 %v10079_v29, %s10782_s25 }
0x1613   : > { %5857 = vrot.lane.b32.xlu0 %v9942_v9, %s10784_s23 }
0x1617   : > { %5907 = vrot.lane.b32.xlu0 %v9946_v11, %s10784_s23 }
0x1635   : > { %5187 = vadd.xlane.f32.xlu1 %v5186_v26 }
0x1646   : > { %5349 = vrot.lane.b32.xlu1 %v10089_v39, %s10782_s25 }
0x164a   : > { %5859 = vrot.lane.b32.xlu1 %v9942_v9, %s10783_s29 }
0x164e   : > { %5909 = vrot.lane.b32.xlu1 %v9946_v11, %s10783_s29 }
0x1652   : > { %5959 = vrot.lane.b32.xlu1 %v9974_v50, %s10783_s29 }
0x1656   : > { %5957 = vrot.lane.b32.xlu1 %v9974_v50, %s10784_s23  ;;  %v5179_v30 = vpop.xlane.xlu0 %5178 }
0x1657   : > { %9114 = vrcp.f32 %v5179_v30 }
0x1661   : > { %v9115_v44 = vpop.eup %9114 }
0x1662   : > { %v5193_v46 = vmul.f32 %v9115_v44, %v9107_v60  ;;  %v4814_v60 = vrot.slane %v4799_v56, %v9888_v43 }
0x1664   : > { %v5197_v35 = vpack.c.bf16 %v5193_v46, %v5193_v46  ;;  %v4923_v14 = vcombine.low %v4823_v59, %v4814_v60 }
0x1666   : > { %v4937_v7 = vrot.slane %v4923_v14, %v9888_v43 }
0x1668   : > { %v4938_v63 = vcombine.low %v4930_v61, %v4937_v7 }
0x166a   : > { %v4945_v57 = vrot.slane %v4938_v63, %v9888_v43 }
0x166c   : > { %v4950_v5 = vpack.c.bf16 %v4945_v57, %v4945_v57 }
0x167e   : > { %v5185_v31 = vpop.xlane.xlu0 %5184 }
0x167f   : > { %9116 = vrcp.f32 %v5185_v31  ;;  %v8967_v31 = vld [vmem:[%s10751_s12 + $0x8] sm:$0xff]  }
0x1682   : > { %v5203_v33 = vpop.permute.xlu0 %5202 }
0x1683   : > { %v5208_v34 = vand.u32 %v5203_v33, %v10005_v17 }
0x1685   : > { %8770 = vmatpush3.bf16.msra.mxu0 %v5208_v34 }
0x1686   : > { %8781 = vmatprep.subr.bf16.mxu0 %v9203_v55  ;;  %v10237_v10 = vpop.permute.xlu0 %5809 }
0x1688   : > { %8772 = vmatmul.mubr.msk.bf16.vlgmr.msra.gmra.mrb[124].mxu0 %vm4476_vm10, %v5197_v35 }
0x1689   : > { %v5182_v36 = vpop.xlane.xlu1 %5181  ;;  %8783 = vmatprep.mubr.msk.bf16.mxu0 %vm9204_vm2, %v9203_v55  ;;  %v9117_v38 = vpop.eup %9116 }
0x168a   : > { %9118 = vrcp.f32 %v5182_v36  ;;  %v5195_v13 = vmul.f32 %v9117_v38, %v9109_v23  ;;  %v10245_v8 = vpop.permute.xlu0 %5807 }
0x168c   : > { %v5199_v51 = vpack.c.bf16 %v5195_v13, %v5195_v13 }
0x168d   : > { %v5252_v20 = vpop.permute.xlu1 %5251 }
0x168e   : > { %v5257_v40 = vand.u32 %v5252_v20, %v10005_v17 }
0x1690   : > { %8776 = vmatpush3.bf16.msra.mxu1 %v5257_v40 }
0x1691   : > { %v5301_v41 = vpop.permute.xlu1 %5300  ;;  %8787 = vmatprep.subr.bf16.mxu1 %v9203_v55 }
0x1692   : > { %v5306_v15 = vand.u32 %v5301_v41, %v10005_v17 }
0x1694   : > { %v9119_v45 = vpop.eup %9118  ;;  %8782 = vmatpush3.bf16.msra.mxu0 %v5306_v15 }
0x1695   : > { %v5194_v49 = vmul.f32 %v9119_v45, %v9111_v0  ;;  %8793 = vmatprep.subr.bf16.mxu0 %v8967_v31 }
0x1697   : > { %8784 = vmatmul.mubr.msk.bf16.vlgmr.msra.gmra.mrb[128].mxu0 %vm4476_vm10, %v5199_v51  ;;  %v5198_v52 = vpack.c.bf16 %v5194_v49, %v5194_v49 }
0x1698   : > { %8794 = vmatpush3.bf16.msra.mxu0 %v8967_v31 }
0x1699   : > { %8778 = vmatmul.mubr.msk.bf16.vlgmr.msra.gmra.mrb[120].mxu1 %vm4476_vm10, %v5198_v52  ;;  %8805 = vmatprep.subr.bf16.mxu0 %v9203_v55 }
0x169a   : > { %8789 = vmatprep.mubr.msk.bf16.mxu1 %vm9204_vm2, %v9203_v55 }
0x16c2   : > { %v5188_v16 = vpop.xlane.xlu1 %5187 }
0x16c3   : > { %9120 = vrcp.f32 %v5188_v16 }
0x16c6   : > { %v5350_v4 = vpop.permute.xlu1 %5349 }
0x16c7   : > { %v5355_v6 = vand.u32 %v5350_v4, %v10005_v17 }
0x16c9   : > { %8788 = vmatpush3.bf16.msra.mxu1 %v5355_v6 }
0x16ca   : > { %8799 = vmatprep.subr.bf16.mxu1 %v8966_v2  ;;  %v5860_v32 = vpop.permute.xlu1 %5859 }
0x16cd   : > { %v9121_v58 = vpop.eup %9120 }
0x16ce   : > { %v5196_v23 = vmul.f32 %v9121_v58, %v9113_v21  ;;  %v10239_v18 = vpop.permute.xlu1 %5909  ;;  %v5865_v21 = vsel %vm845_vm3, %v5860_v32, 0 }
0x16d0   : > { %v5200_v0 = vpack.c.bf16 %v5196_v23, %v5196_v23 }
0x16d2   : > { %8790 = vmatmul.mubr.msk.bf16.vlgmr.msra.gmra.mrb[124].mxu1 %vm4476_vm10, %v5200_v0  ;;  %v5960_v28 = vpop.permute.xlu1 %5959 }
0x16d3   : > { %8800 = vmatpush3.bf16.msra.mxu1 %v8966_v2  ;;  %8801 = vmatprep.mubr.msk.bf16.mxu1 %vm845_vm3, %v4949_v48  ;;  %v5858_v48 = vpop.permute.xlu0 %5857  ;;  %v5965_v26 = vsel %vm845_vm3, %v5960_v28, 0 }
0x16d4   : > { %8811 = vmatprep.subr.bf16.mxu1 %v9203_v55 }
0x16d6   : > { %v5958_v30 = vpop.permute.xlu1 %5957 }
0x16da   : > { %8802 = vmatmul.mubr.msk.bf16.vlgmr.msra.gmra.mrb[128].mxu1 %vm845_vm3, %v4950_v5 }
0x16db   : > { %8813 = vmatprep.mubr.msk.bf16.mxu1 %vm9204_vm2, %v9203_v55 }
0x16dc   : > { %8812 = vmatpush3.bf16.xpose.msra.mxu1 %v5865_v21 }
0x16dd   : > { %8823 = vmatprep.subr.bf16.mxu1 %v9203_v55 }
0x16e3   : > { %8814 = vmatmul.mubr.msk.bf16.vlgmr.msra.gmra.mrb[132].mxu1 %vm845_vm3, %v5858_v48 }
0x16e4   : > { %8824 = vmatpush3.bf16.xpose.msra.mxu1 %v5965_v26  ;;  %8825 = vmatprep.mubr.msk.bf16.mxu1 %vm9204_vm2, %v9203_v55 }
0x16e5   : > { %8835 = vmatprep.subr.bf16.mxu1 %v9203_v55 }
0x16eb   : > { %8826 = vmatmul.mubr.msk.bf16.vlgmr.msra.gmra.mrb[136].mxu1 %vm845_vm3, %v5958_v30 }
0x16ec   : > { %8837 = vmatprep.mubr.msk.bf16.mxu1 %vm9204_vm2, %v9203_v55 }
0x175b   : > { %v5244_v44 = vpop.f32.mrb[124].mxu0 }
0x175c   : > { %v8773_v46 = vpop.f32.mrb[125].mxu0  ;;  %v5408_v35 = vrot.slane %v5244_v44, %v9888_v43  ;;  %v5401_v20 = vcombine.high %v5244_v44, %v5244_v44 }
0x175d   : > { %v5247_v33 = vpop.f32.mrb[126].mxu0 }
0x175e   : > { %v8774_v34 = vpop.f32.mrb[127].mxu0  ;;  %v5416_v36 = vcombine.high %v5408_v35, %v5408_v35  ;;  %v5415_v13 = vrot.slane %v5401_v20, %v9888_v43  ;;  %v5423_v41 = vrot.slane %v5408_v35, %v9888_v43 }
0x1760   : > { %v5437_v38 = vrot.slane %v5416_v36, %v9888_v43  ;;  %v5430_v1 = vrot.slane %v5415_v13, %v9888_v43 }
0x1762   : > { %v5557_v52 = vcombine.low %v5423_v41, %v5437_v38  ;;  %v8147_v53 = vcombine.high %v5423_v41, %v5437_v38 }
0x1764   : > { %v5567_v7 = vrot.slane %v5557_v52, %v9888_v43  ;;  %v5574_v58 = vrot.slane %v8147_v53, %v9888_v43 }
0x1766   : > { %v5589_v28 = vcombine.low %v5567_v7, %v5574_v58 }
0x1768   : > { %v5597_v34 = vrot.slane %v5589_v28, %v9888_v43 }
0x176a   : > { %v5342_v40 = vpop.f32.mrb[128].mxu0 }
0x176b   : > { %v5486_v15 = vrot.slane %v5342_v40, %v9888_v43  ;;  %v8785_v45 = vpop.f32.mrb[129].mxu0  ;;  %v5479_v20 = vcombine.high %v5342_v40, %v5342_v40 }
0x176c   : > { %v5293_v49 = vpop.f32.mrb[120].mxu1  ;;  %v5345_v51 = vpop.f32.mrb[130].mxu0 }
0x176d   : > { %v5494_v54 = vcombine.high %v5486_v15, %v5486_v15  ;;  %v5440_v12 = vcombine.high %v5293_v49, %v5293_v49  ;;  %v8779_v56 = vpop.f32.mrb[121].mxu1  ;;  %v8786_v16 = vpop.f32.mrb[131].mxu0  ;;  %v5447_v59 = vrot.slane %v5293_v49, %v9888_v43  ;;  %v5501_v61 = vrot.slane %v5486_v15, %v9888_v43 }
0x176e   : > { %v5296_v60 = vpop.f32.mrb[122].mxu1  ;;  %v5493_v38 = vrot.slane %v5479_v20, %v9888_v43 }
0x176f   : > { %v8780_v4 = vpop.f32.mrb[123].mxu1  ;;  %v5515_v2 = vrot.slane %v5494_v54, %v9888_v43  ;;  %v5454_v6 = vrot.slane %v5440_v12, %v9888_v43  ;;  %v5455_v14 = vcombine.high %v5447_v59, %v5447_v59  ;;  %v5462_v3 = vrot.slane %v5447_v59, %v9888_v43 }
0x1770   : > { %v5508_v52 = vrot.slane %v5493_v38, %v9888_v43 }
0x1771   : > { %v5476_v23 = vrot.slane %v5455_v14, %v9888_v43  ;;  %v5477_v63 = vcombine.high %v5462_v3, %v5462_v3  ;;  %v5559_v0 = vcombine.low %v5430_v1, %v5462_v3  ;;  %v5607_v32 = vcombine.low %v5501_v61, %v5515_v2 }
0x1772   : > { %v5469_v57 = vrot.slane %v5454_v6, %v9888_v43  ;;  %v8148_v49 = vcombine.high %v5501_v61, %v5515_v2 }
0x1773   : > { %v5478_v5 = vcombine.high %v5476_v23, %v5476_v23  ;;  %v5560_v21 = vcombine.low %v5476_v23, %v5477_v63  ;;  %v5581_v48 = vrot.slane %v5559_v0, %v9888_v43  ;;  %v5623_v31 = vrot.slane %v5607_v32, %v9888_v43 }
0x1774   : > { %v5630_v60 = vrot.slane %v8148_v49, %v9888_v43 }
0x1775   : > { %v5588_v26 = vrot.slane %v5560_v21, %v9888_v43  ;;  %v5606_v30 = vcombine.low %v5478_v5, %v5469_v57 }
0x1777   : > { %v5590_v44 = vcombine.low %v5581_v48, %v5588_v26  ;;  %v5616_v46 = vrot.slane %v5606_v30, %v9888_v43 }
0x1779   : > { %v5638_v33 = vcombine.low %v5616_v46, %v5623_v31  ;;  %v5604_v35 = vrot.slane %v5590_v44, %v9888_v43  ;;  %v5815_v46 = vsel %vm845_vm3, %v10237_v10, 0 }
0x177b   : > { %v5605_v36 = vcombine.low %v5597_v34, %v5604_v35  ;;  %v5646_v32 = vrot.slane %v5638_v33, %v9888_v43 }
0x17a5   : > { %v5391_v13 = vpop.f32.mrb[124].mxu1 }
0x17a6   : > { %v5518_v41 = vcombine.high %v5391_v13, %v5391_v13  ;;  %v5525_v15 = vrot.slane %v5391_v13, %v9888_v43  ;;  %v8791_v45 = vpop.f32.mrb[125].mxu1  ;;  %v5908_v13 = vpop.permute.xlu0 %5907 }
0x17a7   : > { %v5394_v51 = vpop.f32.mrb[126].mxu1 }
0x17a8   : > { %v5532_v53 = vrot.slane %v5518_v41, %v9888_v43  ;;  %v5533_v54 = vcombine.high %v5525_v15, %v5525_v15  ;;  %v5540_v12 = vrot.slane %v5525_v15, %v9888_v43  ;;  %v8792_v56 = vpop.f32.mrb[127].mxu1 }
0x17aa   : > { %v5554_v16 = vrot.slane %v5533_v54, %v9888_v43  ;;  %v5555_v40 = vcombine.high %v5540_v12, %v5540_v12  ;;  %v5609_v59 = vcombine.low %v5508_v52, %v5540_v12  ;;  %v5547_v1 = vrot.slane %v5532_v53, %v9888_v43 }
0x17ac   : > { %v5556_v4 = vcombine.high %v5554_v16, %v5554_v16  ;;  %v5637_v2 = vrot.slane %v5609_v59, %v9888_v43  ;;  %v5655_v6 = vcombine.low %v5554_v16, %v5555_v40 }
0x17ad   : > { %v8803_v14 = vpop.f32.mrb[128].mxu1 }
0x17ae   : > { %v5639_v3 = vcombine.low %v5630_v60, %v5637_v2  ;;  %v5656_v7 = vcombine.low %v5556_v4, %v5547_v1  ;;  %v5793_v58 = vpop.f32.mrb[129].mxu1  ;;  %v5663_v23 = vrot.slane %v5655_v6, %v9888_v43 }
0x17af   : > { %v8804_v61 = vpop.f32.mrb[130].mxu1 }
0x17b0   : > { %v5670_v63 = vrot.slane %v5656_v7, %v9888_v43  ;;  %v5796_v0 = vpop.f32.mrb[131].mxu1  ;;  %v5653_v57 = vrot.slane %v5639_v3, %v9888_v43 }
0x17b2   : > { %v5671_v5 = vcombine.low %v5663_v23, %v5670_v63  ;;  %v5654_v21 = vcombine.low %v5646_v32, %v5653_v57 }
0x17b4   : > { %v5682_v28 = vpack.c.bf16 %v5654_v21, %v5605_v36  ;;  %v5678_v48 = vrot.slane %v5671_v5, %v9888_v43 }
0x17b6   : > { %v5901_v26 = vpop.f32.mrb[132].mxu1  ;;  %8795 = vmatprep.mubr.msk.bf16.mxu0 %vm845_vm3, %v5682_v28  ;;  %v5683_v30 = vpack.c.bf16 %v5678_v48, %v5678_v48 }
0x17b7   : > { %v5902_v31 = vadd.f32 %v10043_v24, %v5901_v26  ;;  %v8815_v44 = vpop.f32.mrb[133].mxu1  ;;  %v5915_v24 = vsel %vm845_vm3, %v10239_v18, 0 }
0x17b8   : > { %v5904_v34 = vpop.f32.mrb[134].mxu1  ;;  %8796 = vmatmul.mubr.msk.bf16.vlgmr.msra.gmra.mrb[132].mxu0 %vm845_vm3, %v5683_v30 }
0x17b9   : > { %8806 = vmatpush3.bf16.xpose.msra.mxu0 %v5815_v46  ;;  %v8816_v33 = vpop.f32.mrb[135].mxu1  ;;  %v6010_v35 = vsel %vm4427_vm9, %v5902_v31, -inf  ;;  %8807 = vmatprep.mubr.msk.bf16.mxu0 %vm9204_vm2, %v9203_v55 }
0x17ba   : > { %6011 = vmax.xlane.f32.xlu1 %v6010_v35  ;;  %8817 = vmatprep.subr.bf16.mxu0 %v9203_v55 }
0x17be   : > { %v6001_v36 = vpop.f32.mrb[136].mxu1 }
0x17bf   : > { %v8827_v20 = vpop.f32.mrb[137].mxu1  ;;  %v6002_v7 = vadd.f32 %v10053_v47, %v6001_v36 }
0x17c0   : > { %v6004_v38 = vpop.f32.mrb[138].mxu1  ;;  %8808 = vmatmul.mubr.msk.bf16.vlgmr.msra.gmra.mrb[136].mxu0 %vm845_vm3, %v10245_v8 }
0x17c1   : > { %8818 = vmatpush3.bf16.xpose.msra.mxu0 %v5915_v24  ;;  %v8828_v10 = vpop.f32.mrb[139].mxu1  ;;  %8819 = vmatprep.mubr.msk.bf16.mxu0 %vm9204_vm2, %v9203_v55  ;;  %v6016_v23 = vsel %vm4427_vm9, %v6002_v7, -inf }
0x17c2   : > { %8829 = vmatprep.subr.bf16.mxu0 %v9203_v55 }
0x17c8   : > { %8820 = vmatmul.mubr.msk.bf16.vlgmr.msra.gmra.mrb[140].mxu0 %vm845_vm3, %v5908_v13 }
0x17c9   : > { %8831 = vmatprep.mubr.msk.bf16.mxu0 %vm9204_vm2, %v9203_v55 }
0x1847   : > { %v6012_v41 = vpop.xlane.xlu1 %6011 }
0x1848   : > { %v6020_v15 = vsub.f32 %v5902_v31, %v6012_v41 }
0x184a   : > { %v6025_v18 = vmul.f32 1.442695, %v6020_v15 }
0x184c   : > { %9122 = vpow2.f32 %v6025_v18 }
0x1856   : > { %v10314_v45 = vpop.eup %9122 }
0x1857   : > { %v6034_v8 = vsel %vm4427_vm9, %v10314_v45, 0.0 }
0x1858   : > { %6035 = vadd.xlane.f32.xlu1 %v6034_v8 }
0x188b   : > { %v8797_v49 = vpop.f32.mrb[132].mxu0 }
0x188c   : > { %v10318_v51 = vadd.f32 %v8803_v14, %v8797_v49  ;;  %v5733_v52 = vpop.f32.mrb[133].mxu0 }
0x188d   : > { %v10320_v53 = vadd.f32 %v5793_v58, %v5733_v52  ;;  %v8798_v54 = vpop.f32.mrb[134].mxu0 }
0x188e   : > { %v5736_v12 = vpop.f32.mrb[135].mxu0 }
0x188f   : > { %v10322_v56 = vadd.f32 %v5796_v0, %v5736_v12 }
0x1893   : > { %v5851_v16 = vpop.f32.mrb[136].mxu0 }
0x1894   : > { %v5852_v40 = vadd.f32 %v10038_v22, %v5851_v16  ;;  %v8809_v59 = vpop.f32.mrb[137].mxu0 }
0x1895   : > { %v5854_v60 = vpop.f32.mrb[138].mxu0 }
0x1896   : > { %v8810_v1 = vpop.f32.mrb[139].mxu0  ;;  %v6007_v4 = vsel %vm4427_vm9, %v5852_v40, -inf }
0x1897   : > { %6008 = vmax.xlane.f32.xlu0 %v6007_v4 }
0x189b   : > { %v5951_v2 = vpop.f32.mrb[140].mxu0 }
0x189c   : > { %v5952_v6 = vadd.f32 %v10047_v62, %v5951_v2  ;;  %v8821_v14 = vpop.f32.mrb[141].mxu0 }
0x189d   : > { %v5954_v3 = vpop.f32.mrb[142].mxu0 }
0x189e   : > { %v8822_v58 = vpop.f32.mrb[143].mxu0  ;;  %v6013_v61 = vsel %vm4427_vm9, %v5952_v6, -inf  ;;  %v8968_v3 = vld [vmem:[%s10751_s12 + $0x10] sm:$0xff]  }
0x189f   : > { %6014 = vmax.xlane.f32.xlu0 %v6013_v61 }
0x18a3   : > { %6017 = vmax.xlane.f32.xlu0 %v6016_v23 }
0x18e5   : > { %v6036_v46 = vpop.xlane.xlu1 %6035 }
0x1924   : > { %v6009_v22 = vpop.xlane.xlu0 %6008 }
0x1925   : > { %v6019_v63 = vsub.f32 %v5852_v40, %v6009_v22 }
0x1927   : > { %v6023_v0 = vmul.f32 1.442695, %v6019_v63 }
0x1929   : > { %9124 = vpow2.f32 %v6023_v0 }
0x192c   : > { %v6015_v32 = vpop.xlane.xlu0 %6014 }
0x192d   : > { %v6021_v57 = vsub.f32 %v5952_v6, %v6015_v32 }
0x192f   : > { %v6027_v5 = vmul.f32 1.442695, %v6021_v57 }
0x1930   : > { %v6018_v21 = vpop.xlane.xlu0 %6017 }
0x1931   : > { %9126 = vpow2.f32 %v6027_v5  ;;  %v6022_v62 = vsub.f32 %v6002_v7, %v6018_v21 }
0x1933   : > { %v9125_v28 = vpop.eup %9124  ;;  %v6029_v48 = vmul.f32 1.442695, %v6022_v62 }
0x1934   : > { %v6031_v47 = vsel %vm4427_vm9, %v9125_v28, 0.0 }
0x1935   : > { %9128 = vpow2.f32 %v6029_v48  ;;  %6032 = vadd.xlane.f32.xlu0 %v6031_v47 }
0x193b   : > { %v9127_v26 = vpop.eup %9126 }
0x193c   : > { %v6037_v30 = vsel %vm4427_vm9, %v9127_v26, 0.0 }
0x193d   : > { %6038 = vadd.xlane.f32.xlu0 %v6037_v30 }
0x193f   : > { %v9129_v31 = vpop.eup %9128 }
0x1940   : > { %v6040_v44 = vsel %vm4427_vm9, %v9129_v31, 0.0 }
0x1941   : > { %6041 = vadd.xlane.f32.xlu1 %v6040_v44 }
0x1952   : > { %6103 = vrot.lane.b32.xlu1 %v10022_v19, %s10784_s23 }
0x1953   : > { %6055 = vrot.lane.b32.xlu0 %v10003_v27, %s10784_s23 }
0x1956   : > { %6151 = vrot.lane.b32.xlu1 %v10079_v29, %s10784_s23 }
0x1957   : > { %6602 = vrot.lane.b32.xlu0 %v9922_v37, %s10785_s4 }
0x195a   : > { %6199 = vrot.lane.b32.xlu1 %v10089_v39, %s10784_s23 }
0x195b   : > { %6600 = vrot.lane.b32.xlu0 %v9922_v37, %s10786_s3 }
0x195e   : > { %6652 = vrot.lane.b32.xlu1 %v9942_v9, %s10785_s4 }
0x195f   : > { %6650 = vrot.lane.b32.xlu0 %v9942_v9, %s10786_s3 }
0x1962   : > { %6702 = vrot.lane.b32.xlu1 %v9946_v11, %s10785_s4 }
0x1963   : > { %6700 = vrot.lane.b32.xlu0 %v9946_v11, %s10786_s3 }
0x1966   : > { %6752 = vrot.lane.b32.xlu1 %v9974_v50, %s10785_s4 }
0x196a   : > { %6750 = vrot.lane.b32.xlu1 %v9974_v50, %s10786_s3 }
0x19c2   : > { %v6033_v37 = vpop.xlane.xlu0 %6032 }
0x19c3   : > { %9130 = vrcp.f32 %v6033_v37 }
0x19c4   : > { %9132 = vrcp.f32 %v6036_v46 }
0x19ca   : > { %v6039_v34 = vpop.xlane.xlu0 %6038 }
0x19cb   : > { %9134 = vrcp.f32 %v6039_v34 }
0x19cd   : > { %v9131_v33 = vpop.eup %9130 }
0x19ce   : > { %v6047_v9 = vmul.f32 %v9131_v33, %v9125_v28  ;;  %v6042_v35 = vpop.xlane.xlu1 %6041  ;;  %v6056_v36 = vpop.permute.xlu0 %6055 }
0x19cf   : > { %v9133_v20 = vpop.eup %9132  ;;  %9136 = vrcp.f32 %v6042_v35  ;;  %v6061_v11 = vand.u32 %v6056_v36, %v10005_v17 }
0x19d0   : > { %v6048_v24 = vmul.f32 %v9133_v20, %v10314_v45  ;;  %v6051_v10 = vpack.c.bf16 %v6047_v9, %v6047_v9 }
0x19d1   : > { %8830 = vmatpush3.bf16.msra.mxu0 %v6061_v11 }
0x19d2   : > { %v6104_v38 = vpop.permute.xlu1 %6103  ;;  %8841 = vmatprep.subr.bf16.mxu0 %v9203_v55  ;;  %v6052_v18 = vpack.c.bf16 %v6048_v24, %v6048_v24  ;;  %v6603_v40 = vpop.permute.xlu0 %6602 }
0x19d3   : > { %v6109_v50 = vand.u32 %v6104_v38, %v10005_v17  ;;  %v6608_v60 = vsel %vm845_vm3, %v6603_v40, 0 }
0x19d4   : > { %8832 = vmatmul.mubr.msk.bf16.vlgmr.msra.gmra.mrb[144].mxu0 %vm4476_vm10, %v6051_v10 }
0x19d5   : > { %v9135_v13 = vpop.eup %9134  ;;  %8836 = vmatpush3.bf16.msra.mxu1 %v6109_v50  ;;  %8843 = vmatprep.mubr.msk.bf16.mxu0 %vm9204_vm2, %v9203_v55 }
0x19d6   : > { %v6049_v41 = vmul.f32 %v9135_v13, %v9127_v26  ;;  %v6152_v15 = vpop.permute.xlu1 %6151  ;;  %8847 = vmatprep.subr.bf16.mxu1 %v9203_v55  ;;  %v6601_v1 = vpop.permute.xlu0 %6600 }
0x19d7   : > { %v6157_v45 = vand.u32 %v6152_v15, %v10005_v17 }
0x19d8   : > { %8838 = vmatmul.mubr.msk.bf16.vlgmr.msra.gmra.mrb[140].mxu1 %vm4476_vm10, %v6052_v18  ;;  %v6053_v54 = vpack.c.bf16 %v6049_v41, %v6049_v41 }
0x19d9   : > { %v9137_v8 = vpop.eup %9136  ;;  %8842 = vmatpush3.bf16.msra.mxu0 %v6157_v45  ;;  %8849 = vmatprep.mubr.msk.bf16.mxu1 %vm9204_vm2, %v9203_v55 }
0x19da   : > { %v6050_v49 = vmul.f32 %v9137_v8, %v9129_v31  ;;  %v6200_v52 = vpop.permute.xlu1 %6199  ;;  %v10381_v6 = vpop.permute.xlu0 %6650  ;;  %8853 = vmatprep.subr.bf16.mxu0 %v8968_v3 }
0x19db   : > { %v6205_v12 = vand.u32 %v6200_v52, %v10005_v17 }
0x19dc   : > { %8844 = vmatmul.mubr.msk.bf16.vlgmr.msra.gmra.mrb[148].mxu0 %vm4476_vm10, %v6053_v54  ;;  %v6054_v16 = vpack.c.bf16 %v6050_v49, %v6050_v49 }
0x19dd   : > { %8848 = vmatpush3.bf16.msra.mxu1 %v6205_v12  ;;  %8854 = vmatpush3.bf16.msra.mxu0 %v8968_v3 }
0x19de   : > { %8859 = vmatprep.subr.bf16.mxu1 %v9203_v55  ;;  %v10375_v59 = vpop.permute.xlu1 %6652  ;;  %v6701_v14 = vpop.permute.xlu0 %6700  ;;  %8865 = vmatprep.subr.bf16.mxu0 %v9203_v55 }
0x19e0   : > { %8850 = vmatmul.mubr.msk.bf16.vlgmr.msra.gmra.mrb[144].mxu1 %vm4476_vm10, %v6054_v16 }
0x19e1   : > { %8861 = vmatprep.mubr.msk.bf16.mxu1 %vm9204_vm2, %v9203_v55 }
0x19e2   : > { %v6703_v4 = vpop.permute.xlu1 %6702 }
0x19e3   : > { %v6708_v2 = vsel %vm845_vm3, %v6703_v4, 0 }
0x19e6   : > { %8860 = vmatpush3.bf16.xpose.msra.mxu1 %v6608_v60 }
0x19e7   : > { %8871 = vmatprep.subr.bf16.mxu1 %v9203_v55 }
0x19ed   : > { %8862 = vmatmul.mubr.msk.bf16.vlgmr.msra.gmra.mrb[148].mxu1 %vm845_vm3, %v6601_v1 }
0x19ee   : > { %8872 = vmatpush3.bf16.xpose.msra.mxu1 %v6708_v2  ;;  %8873 = vmatprep.mubr.msk.bf16.mxu1 %vm9204_vm2, %v9203_v55 }
0x19ef   : > { %8883 = vmatprep.subr.bf16.mxu1 %v9203_v55 }
0x19f5   : > { %8874 = vmatmul.mubr.msk.bf16.vlgmr.msra.gmra.mrb[152].mxu1 %vm845_vm3, %v6701_v14 }
0x19f6   : > { %8885 = vmatprep.mubr.msk.bf16.mxu1 %vm9204_vm2, %v9203_v55 }
0x1aa7   : > { %v6097_v7 = vpop.f32.mrb[144].mxu0 }
0x1aa8   : > { %v6251_v58 = vcombine.high %v6097_v7, %v6097_v7  ;;  %v6258_v61 = vrot.slane %v6097_v7, %v9888_v43  ;;  %v8833_v23 = vpop.f32.mrb[145].mxu0 }
0x1aa9   : > { %v6100_v22 = vpop.f32.mrb[146].mxu0 }
0x1aaa   : > { %v6266_v63 = vcombine.high %v6258_v61, %v6258_v61  ;;  %v8834_v0 = vpop.f32.mrb[147].mxu0  ;;  %v6265_v32 = vrot.slane %v6251_v58, %v9888_v43  ;;  %v6273_v5 = vrot.slane %v6258_v61, %v9888_v43 }
0x1aab   : > { %v6145_v57 = vpop.f32.mrb[140].mxu1 }
0x1aac   : > { %v6287_v21 = vrot.slane %v6266_v63, %v9888_v43  ;;  %v6290_v62 = vcombine.high %v6145_v57, %v6145_v57  ;;  %v6297_v28 = vrot.slane %v6145_v57, %v9888_v43  ;;  %v8839_v48 = vpop.f32.mrb[141].mxu1  ;;  %v6280_v46 = vrot.slane %v6265_v32, %v9888_v43 }
0x1aad   : > { %v6148_v47 = vpop.f32.mrb[142].mxu1 }
0x1aae   : > { %v6407_v26 = vcombine.low %v6273_v5, %v6287_v21  ;;  %v8165_v30 = vcombine.high %v6273_v5, %v6287_v21  ;;  %v6305_v31 = vcombine.high %v6297_v28, %v6297_v28  ;;  %v8840_v44 = vpop.f32.mrb[143].mxu1  ;;  %v6304_v37 = vrot.slane %v6290_v62, %v9888_v43 }
0x1aaf   : > { %v6312_v34 = vrot.slane %v6297_v28, %v9888_v43  ;;  %v6193_v33 = vpop.f32.mrb[148].mxu0 }
0x1ab0   : > { %v6417_v9 = vrot.slane %v6407_v26, %v9888_v43  ;;  %v6424_v35 = vrot.slane %v8165_v30, %v9888_v43  ;;  %v6326_v36 = vrot.slane %v6305_v31, %v9888_v43  ;;  %v8845_v20 = vpop.f32.mrb[149].mxu0  ;;  %v6329_v38 = vcombine.high %v6193_v33, %v6193_v33 }
0x1ab1   : > { %v6327_v11 = vcombine.high %v6312_v34, %v6312_v34  ;;  %v6409_v24 = vcombine.low %v6280_v46, %v6312_v34  ;;  %v6336_v10 = vrot.slane %v6193_v33, %v9888_v43  ;;  %v6196_v50 = vpop.f32.mrb[150].mxu0  ;;  %v6319_v15 = vrot.slane %v6304_v37, %v9888_v43 }
0x1ab2   : > { %v6328_v13 = vcombine.high %v6326_v36, %v6326_v36  ;;  %v8846_v41 = vpop.f32.mrb[151].mxu0  ;;  %v6343_v45 = vrot.slane %v6329_v38, %v9888_v43  ;;  %v6439_v52 = vcombine.low %v6417_v9, %v6424_v35 }
0x1ab3   : > { %v6410_v18 = vcombine.low %v6326_v36, %v6327_v11  ;;  %v6344_v8 = vcombine.high %v6336_v10, %v6336_v10  ;;  %v6241_v49 = vpop.f32.mrb[144].mxu1  ;;  %v6431_v54 = vrot.slane %v6409_v24, %v9888_v43  ;;  %v6351_v4 = vrot.slane %v6336_v10, %v9888_v43  ;;  %v9187_v10 = vld [vmem:[%s10035_s2] ss:$0 sm:$0xff] }
0x1ab4   : > { %v6368_v12 = vcombine.high %v6241_v49, %v6241_v49  ;;  %v6375_v16 = vrot.slane %v6241_v49, %v9888_v43  ;;  %v8851_v40 = vpop.f32.mrb[145].mxu1  ;;  %v6456_v1 = vcombine.low %v6328_v13, %v6319_v15  ;;  %v6358_v3 = vrot.slane %v6343_v45, %v9888_v43 }
0x1ab5   : > { %v6438_v60 = vrot.slane %v6410_v18, %v9888_v43  ;;  %v6365_v2 = vrot.slane %v6344_v8, %v9888_v43  ;;  %v6244_v14 = vpop.f32.mrb[146].mxu1  ;;  %v6447_v21 = vrot.slane %v6439_v52, %v9888_v43  ;;  %v6658_v52 = vsel %vm845_vm3, %v10375_v59, 0 }
0x1ab6   : > { %v6382_v7 = vrot.slane %v6368_v12, %v9888_v43  ;;  %v6383_v58 = vcombine.high %v6375_v16, %v6375_v16  ;;  %v6390_v61 = vrot.slane %v6375_v16, %v9888_v43  ;;  %v8852_v23 = vpop.f32.mrb[147].mxu1  ;;  %v6466_v62 = vrot.slane %v6456_v1, %v9888_v43  ;;  %v9188_v12 = vld [vmem:[%s10035_s2 + $0x2] ss:$0 sm:$0xff]  ;;  %v6753_v1 = vpop.permute.xlu1 %6752 }
0x1ab7   : > { %v6440_v22 = vcombine.low %v6431_v54, %v6438_v60  ;;  %v6457_v63 = vcombine.low %v6351_v4, %v6365_v2  ;;  %v8166_v0 = vcombine.high %v6351_v4, %v6365_v2  ;;  %v6758_v59 = vsel %vm845_vm3, %v6753_v1, 0 }
0x1ab8   : > { %v6404_v32 = vrot.slane %v6383_v58, %v9888_v43  ;;  %v6405_v57 = vcombine.high %v6390_v61, %v6390_v61  ;;  %v6459_v5 = vcombine.low %v6358_v3, %v6390_v61  ;;  %v6397_v48 = vrot.slane %v6382_v7, %v9888_v43 }
0x1ab9   : > { %v6473_v28 = vrot.slane %v6457_v63, %v9888_v43  ;;  %v6454_v47 = vrot.slane %v6440_v22, %v9888_v43  ;;  %v6480_v26 = vrot.slane %v8166_v0, %v9888_v43 }
0x1aba   : > { %v6406_v30 = vcombine.high %v6404_v32, %v6404_v32  ;;  %v6487_v31 = vrot.slane %v6459_v5, %v9888_v43  ;;  %v6505_v44 = vcombine.low %v6404_v32, %v6405_v57  ;;  %v6751_v14 = vpop.permute.xlu1 %6750 }
0x1abb   : > { %v6488_v46 = vcombine.low %v6466_v62, %v6473_v28  ;;  %v6455_v37 = vcombine.low %v6447_v21, %v6454_v47  ;;  %v9189_v62 = vld [vmem:[%s10035_s2 + $0x1] ss:$0 sm:$0xff] }
0x1abc   : > { %v6489_v34 = vcombine.low %v6480_v26, %v6487_v31  ;;  %v6506_v33 = vcombine.low %v6406_v30, %v6397_v48  ;;  %v6513_v9 = vrot.slane %v6505_v44, %v9888_v43  ;;  %v9190_v31 = vld [vmem:[%s10035_s2 + $0x3] ss:$0 sm:$0xff]  ;;  %s10787_s2 = smul.u32 24, %s10789_s22 }
0x1abd   : > { %v6496_v36 = vrot.slane %v6488_v46, %v9888_v43 }
0x1abe   : > { %v6520_v35 = vrot.slane %v6506_v33, %v9888_v43  ;;  %v6503_v20 = vrot.slane %v6489_v34, %v9888_v43  ;;  %s646_s23 = scalar_lea.vmem %s10759_s20, %s10787_s2 }
0x1ac0   : > { %v6521_v11 = vcombine.low %v6513_v9, %v6520_v35  ;;  %v6644_v24 = vpop.f32.mrb[148].mxu1  ;;  %v6504_v38 = vcombine.low %v6496_v36, %v6503_v20 }
0x1ac1   : > { %v6645_v50 = vadd.f32 %v9187_v10, %v6644_v24  ;;  %v8863_v13 = vpop.f32.mrb[149].mxu1 }
0x1ac2   : > { %v6647_v41 = vpop.f32.mrb[150].mxu1  ;;  %v6532_v15 = vpack.c.bf16 %v6504_v38, %v6455_v37  ;;  %v6528_v18 = vrot.slane %v6521_v11, %v9888_v43 }
0x1ac3   : > { %v8864_v45 = vpop.f32.mrb[151].mxu1  ;;  %v6800_v8 = vsel %vm4427_vm9, %v6645_v50, -inf }
0x1ac4   : > { %6801 = vmax.xlane.f32.xlu0 %v6800_v8  ;;  %8855 = vmatprep.mubr.msk.bf16.mxu0 %vm845_vm3, %v6532_v15  ;;  %v6533_v49 = vpack.c.bf16 %v6528_v18, %v6528_v18 }
0x1ac6   : > { %8856 = vmatmul.mubr.msk.bf16.vlgmr.msra.gmra.mrb[152].mxu0 %vm845_vm3, %v6533_v49 }
0x1ac7   : > { %8866 = vmatpush3.bf16.xpose.msra.mxu0 %v6658_v52  ;;  %8867 = vmatprep.mubr.msk.bf16.mxu0 %vm9204_vm2, %v9203_v55 }
0x1ac8   : > { %v6744_v54 = vpop.f32.mrb[152].mxu1  ;;  %8877 = vmatprep.subr.bf16.mxu0 %v9203_v55 }
0x1ac9   : > { %v6745_v16 = vadd.f32 %v9188_v12, %v6744_v54  ;;  %v8875_v40 = vpop.f32.mrb[153].mxu1 }
0x1aca   : > { %v6747_v60 = vpop.f32.mrb[154].mxu1 }
0x1acb   : > { %v8876_v4 = vpop.f32.mrb[155].mxu1  ;;  %v6806_v2 = vsel %vm4427_vm9, %v6745_v16, -inf }
0x1acc   : > { %6807 = vmax.xlane.f32.xlu0 %v6806_v2 }
0x1ace   : > { %8868 = vmatmul.mubr.msk.bf16.vlgmr.msra.gmra.mrb[156].mxu0 %vm845_vm3, %v10381_v6 }
0x1acf   : > { %8878 = vmatpush3.bf16.xpose.msra.mxu0 %v6758_v59  ;;  %8879 = vmatprep.mubr.msk.bf16.mxu0 %vm9204_vm2, %v9203_v55 }
0x1ad0   : > { %8889 = vmatprep.subr.bf16.mxu0 %v9203_v55 }
0x1ad6   : > { %8880 = vmatmul.mubr.msk.bf16.vlgmr.msra.gmra.mrb[160].mxu0 %vm845_vm3, %v6751_v14 }
0x1ad7   : > { %8891 = vmatprep.mubr.msk.bf16.mxu0 %vm9204_vm2, %v9203_v55 }
0x1b51   : > { %v6802_v3 = vpop.xlane.xlu0 %6801 }
0x1b52   : > { %v6812_v6 = vsub.f32 %v6645_v50, %v6802_v3 }
0x1b54   : > { %v6816_v57 = vmul.f32 1.442695, %v6812_v6 }
0x1b56   : > { %9138 = vpow2.f32 %v6816_v57 }
0x1b59   : > { %v6808_v63 = vpop.xlane.xlu0 %6807 }
0x1b5a   : > { %v6814_v5 = vsub.f32 %v6745_v16, %v6808_v63 }
0x1b60   : > { %v9139_v33 = vpop.eup %9138 }
0x1b61   : > { %v6824_v9 = vsel %vm4427_vm9, %v9139_v33, 0.0 }
0x1b99   : > { %v8857_v7 = vpop.f32.mrb[152].mxu0 }
0x1b9a   : > { %v10449_v58 = vadd.f32 %v8857_v7, %v10318_v51  ;;  %v6583_v61 = vpop.f32.mrb[153].mxu0  ;;  %v6820_v51 = vmul.f32 1.442695, %v6814_v5 }
0x1b9b   : > { %v10452_v23 = vadd.f32 %v6583_v61, %v10320_v53  ;;  %v8858_v22 = vpop.f32.mrb[154].mxu0 }
0x1b9c   : > { %v6586_v0 = vpop.f32.mrb[155].mxu0  ;;  %9140 = vpow2.f32 %v6820_v51  ;;  %v8969_v51 = vld [vmem:[%s10751_s12 + $0x18] sm:$0xff]  }
0x1b9d   : > { %v10455_v32 = vadd.f32 %v6586_v0, %v10322_v56 }
0x1ba1   : > { %v6694_v21 = vpop.f32.mrb[156].mxu0 }
0x1ba2   : > { %v6695_v28 = vadd.f32 %v9189_v62, %v6694_v21  ;;  %v8869_v48 = vpop.f32.mrb[157].mxu0 }
0x1ba3   : > { %v6697_v47 = vpop.f32.mrb[158].mxu0 }
0x1ba4   : > { %v8870_v26 = vpop.f32.mrb[159].mxu0  ;;  %v6803_v53 = vsel %vm4427_vm9, %v6695_v28, -inf }
0x1ba5   : > { %6804 = vmax.xlane.f32.xlu1 %v6803_v53 }
0x1ba6   : > { %v9141_v35 = vpop.eup %9140 }
0x1ba7   : > { %v6830_v36 = vsel %vm4427_vm9, %v9141_v35, 0.0 }
0x1ba9   : > { %v6794_v30 = vpop.f32.mrb[160].mxu0 }
0x1baa   : > { %v6795_v44 = vadd.f32 %v9190_v31, %v6794_v30  ;;  %v8881_v46 = vpop.f32.mrb[161].mxu0 }
0x1bab   : > { %v6797_v56 = vpop.f32.mrb[162].mxu0 }
0x1bac   : > { %v8882_v37 = vpop.f32.mrb[163].mxu0  ;;  %v6809_v34 = vsel %vm4427_vm9, %v6795_v44, -inf }
0x1bad   : > { %6810 = vmax.xlane.f32.xlu0 %v6809_v34 }
0x1bb1   : > { %6825 = vadd.xlane.f32.xlu0 %v6824_v9 }
0x1bb5   : > { %6831 = vadd.xlane.f32.xlu0 %v6830_v36 }
0x1bb6   : > { %6896 = vrot.lane.b32.xlu1 %v10022_v19, %s10786_s3 }
0x1bba   : > { %6944 = vrot.lane.b32.xlu1 %v10079_v29, %s10786_s3 }
0x1bcb   : > { %6848 = vrot.lane.b32.xlu0 %v10003_v27, %s10786_s3 }
0x1c32   : > { %v6805_v20 = vpop.xlane.xlu1 %6804 }
0x1c33   : > { %v6813_v11 = vsub.f32 %v6695_v28, %v6805_v20 }
0x1c35   : > { %v6818_v24 = vmul.f32 1.442695, %v6813_v11 }
0x1c36   : > { %v6897_v38 = vpop.permute.xlu1 %6896 }
0x1c37   : > { %9142 = vpow2.f32 %v6818_v24  ;;  %v6902_v10 = vand.u32 %v6897_v38, %v10005_v17 }
0x1c39   : > { %8890 = vmatpush3.bf16.msra.mxu0 %v6902_v10 }
0x1c3a   : > { %v6811_v50 = vpop.xlane.xlu0 %6810  ;;  %8901 = vmatprep.subr.bf16.mxu0 %v9203_v55  ;;  %v6945_v54 = vpop.permute.xlu1 %6944 }
0x1c3b   : > { %v6815_v13 = vsub.f32 %v6795_v44, %v6811_v50  ;;  %v6950_v60 = vand.u32 %v6945_v54, %v10005_v17 }
0x1c3d   : > { %v6822_v41 = vmul.f32 1.442695, %v6815_v13 }
0x1c3e   : > { %v6826_v19 = vpop.xlane.xlu0 %6825 }
0x1c3f   : > { %9144 = vpow2.f32 %v6822_v41 }
0x1c40   : > { %9146 = vrcp.f32 %v6826_v19 }
0x1c41   : > { %v9143_v29 = vpop.eup %9142 }
0x1c42   : > { %v6832_v15 = vpop.xlane.xlu0 %6831  ;;  %v6827_v27 = vsel %vm4427_vm9, %v9143_v29, 0.0 }
0x1c43   : > { %6828 = vadd.xlane.f32.xlu1 %v6827_v27  ;;  %9148 = vrcp.f32 %v6832_v15 }
0x1c46   : > { %v6849_v18 = vpop.permute.xlu0 %6848 }
0x1c47   : > { %v6854_v45 = vand.u32 %v6849_v18, %v10005_v17 }
0x1c49   : > { %v9145_v8 = vpop.eup %9144  ;;  %8884 = vmatpush3.bf16.msra.mxu1 %v6854_v45 }
0x1c4a   : > { %v9147_v49 = vpop.eup %9146  ;;  %v6833_v52 = vsel %vm4427_vm9, %v9145_v8, 0.0  ;;  %8895 = vmatprep.subr.bf16.mxu1 %v9203_v55 }
0x1c4b   : > { %v6840_v12 = vmul.f32 %v9147_v49, %v9139_v33  ;;  %6834 = vadd.xlane.f32.xlu1 %v6833_v52 }
0x1c4d   : > { %v6844_v16 = vpack.c.bf16 %v6840_v12, %v6840_v12  ;;  %v9149_v40 = vpop.eup %9148 }
0x1c4e   : > { %v6842_v1 = vmul.f32 %v9149_v40, %v9141_v35 }
0x1c4f   : > { %8886 = vmatmul.mubr.msk.bf16.vlgmr.msra.gmra.mrb[156].mxu1 %vm4476_vm10, %v6844_v16 }
0x1c50   : > { %8896 = vmatpush3.bf16.msra.mxu1 %v6950_v60  ;;  %8897 = vmatprep.mubr.msk.bf16.mxu1 %vm9204_vm2, %v9203_v55  ;;  %v6846_v4 = vpack.c.bf16 %v6842_v1, %v6842_v1 }
0x1c51   : > { %8907 = vmatprep.subr.bf16.mxu1 %v8969_v51 }
0x1c57   : > { %8898 = vmatmul.mubr.msk.bf16.vlgmr.msra.gmra.mrb[160].mxu1 %vm4476_vm10, %v6846_v4 }
0x1c58   : > { %8908 = vmatpush3.bf16.msra.mxu1 %v8969_v51 }
0x1c5c   : > { %6992 = vrot.lane.b32.xlu1 %v10089_v39, %s10786_s3 }
0x1cd0   : > { %v6829_v2 = vpop.xlane.xlu1 %6828 }
0x1cd1   : > { %9150 = vrcp.f32 %v6829_v2 }
0x1cd8   : > { %v6835_v59 = vpop.xlane.xlu1 %6834 }
0x1cd9   : > { %9152 = vrcp.f32 %v6835_v59 }
0x1cdb   : > { %v9151_v14 = vpop.eup %9150 }
0x1cdc   : > { %v6841_v3 = vmul.f32 %v9151_v14, %v9143_v29  ;;  %v6993_v7 = vpop.permute.xlu1 %6992 }
0x1cdd   : > { %v6998_v61 = vand.u32 %v6993_v7, %v10005_v17 }
0x1cde   : > { %v6845_v6 = vpack.c.bf16 %v6841_v3, %v6841_v3 }
0x1ce0   : > { %8892 = vmatmul.mubr.msk.bf16.vlgmr.msra.gmra.mrb[164].mxu0 %vm4476_vm10, %v6845_v6 }
0x1ce1   : > { %8902 = vmatpush3.bf16.msra.mxu0 %v6998_v61  ;;  %8903 = vmatprep.mubr.msk.bf16.mxu0 %vm9204_vm2, %v9203_v55 }
0x1ce3   : > { %v9153_v22 = vpop.eup %9152 }
0x1ce4   : > { %v6843_v63 = vmul.f32 %v9153_v22, %v9145_v8 }
0x1ce6   : > { %v6847_v0 = vpack.c.bf16 %v6843_v63, %v6843_v63 }
0x1ce8   : > { %8904 = vmatmul.mubr.msk.bf16.vlgmr.msra.gmra.mrb[168].mxu0 %vm4476_vm10, %v6847_v0 }
0x1ce9   : > { %7565 = vmatprep.mubr.bf16.mxu0 %v9202_v25 }
0x1d22   : > { %v6890_v39 = vpop.f32.mrb[156].mxu1 }
0x1d23   : > { %v8887_v57 = vpop.f32.mrb[157].mxu1  ;;  %v7051_v55 = vrot.slane %v6890_v39, %v9888_v43  ;;  %v7044_v53 = vcombine.high %v6890_v39, %v6890_v39 }
0x1d24   : > { %v6893_v5 = vpop.f32.mrb[158].mxu1 }
0x1d25   : > { %v8888_v21 = vpop.f32.mrb[159].mxu1  ;;  %v7059_v47 = vcombine.high %v7051_v55, %v7051_v55  ;;  %v7066_v31 = vrot.slane %v7051_v55, %v9888_v43  ;;  %v7058_v46 = vrot.slane %v7044_v53, %v9888_v43 }
0x1d27   : > { %v7080_v30 = vrot.slane %v7059_v47, %v9888_v43  ;;  %v7073_v11 = vrot.slane %v7058_v46, %v9888_v43 }
0x1d29   : > { %v7200_v56 = vcombine.low %v7066_v31, %v7080_v30  ;;  %v8180_v37 = vcombine.high %v7066_v31, %v7080_v30 }
0x1d2a   : > { %v6986_v62 = vpop.f32.mrb[160].mxu1 }
0x1d2b   : > { %v8899_v17 = vpop.f32.mrb[161].mxu1  ;;  %v7129_v26 = vrot.slane %v6986_v62, %v9888_v43  ;;  %v7210_v13 = vrot.slane %v7200_v56, %v9888_v43  ;;  %v7217_v41 = vrot.slane %v8180_v37, %v9888_v43  ;;  %v7122_v19 = vcombine.high %v6986_v62, %v6986_v62 }
0x1d2c   : > { %v6989_v28 = vpop.f32.mrb[162].mxu1 }
0x1d2d   : > { %v8900_v48 = vpop.f32.mrb[163].mxu1  ;;  %v7137_v44 = vcombine.high %v7129_v26, %v7129_v26  ;;  %v7144_v29 = vrot.slane %v7129_v26, %v9888_v43  ;;  %v7232_v54 = vcombine.low %v7210_v13, %v7217_v41  ;;  %v7136_v12 = vrot.slane %v7122_v19, %v9888_v43 }
0x1d2f   : > { %v7158_v36 = vrot.slane %v7137_v44, %v9888_v43  ;;  %v7151_v0 = vrot.slane %v7136_v12, %v9888_v43  ;;  %v7240_v62 = vrot.slane %v7232_v54, %v9888_v43 }
0x1d31   : > { %v7250_v45 = vcombine.low %v7144_v29, %v7158_v36  ;;  %v8181_v39 = vcombine.high %v7144_v29, %v7158_v36 }
0x1d33   : > { %v7266_v14 = vrot.slane %v7250_v45, %v9888_v43  ;;  %v7273_v26 = vrot.slane %v8181_v39, %v9888_v43  ;;  %v9192_v45 = vld [vmem:[#allocation3 + $0x10] sm:$0xf]  ;;  %v8975_v39 = vld [vmem:[%s10755_s16 + $0x14] ss:$8 sps:$4 sm:$0xff]  }
0x1db3   : > { %v6938_v34 = vpop.f32.mrb[164].mxu0 }
0x1db4   : > { %v7083_v33 = vcombine.high %v6938_v34, %v6938_v34  ;;  %v7090_v9 = vrot.slane %v6938_v34, %v9888_v43  ;;  %v8893_v35 = vpop.f32.mrb[165].mxu0 }
0x1db5   : > { %v6941_v20 = vpop.f32.mrb[166].mxu0 }
0x1db6   : > { %v7097_v24 = vrot.slane %v7083_v33, %v9888_v43  ;;  %v7098_v38 = vcombine.high %v7090_v9, %v7090_v9  ;;  %v7105_v10 = vrot.slane %v7090_v9, %v9888_v43  ;;  %v8894_v50 = vpop.f32.mrb[167].mxu0 }
0x1db8   : > { %v7119_v15 = vrot.slane %v7098_v38, %v9888_v43  ;;  %v7120_v27 = vcombine.high %v7105_v10, %v7105_v10  ;;  %v7202_v18 = vcombine.low %v7073_v11, %v7105_v10  ;;  %v7112_v8 = vrot.slane %v7097_v24, %v9888_v43  ;;  %v8187_v38 = vld [vmem:[%s10752_s13] ss:$0 sm:$0xff] }
0x1dba   : > { %v7121_v49 = vcombine.high %v7119_v15, %v7119_v15  ;;  %v7203_v52 = vcombine.low %v7119_v15, %v7120_v27  ;;  %v7224_v16 = vrot.slane %v7202_v18, %v9888_v43  ;;  %v9191_v15 = vld [vmem:[#allocation3] sm:$0xff] }
0x1dbb   : > { %v7034_v40 = vpop.f32.mrb[168].mxu0 }
0x1dbc   : > { %v7231_v60 = vrot.slane %v7203_v52, %v9888_v43  ;;  %v7249_v1 = vcombine.low %v7121_v49, %v7112_v8  ;;  %v7161_v4 = vcombine.high %v7034_v40, %v7034_v40  ;;  %v7168_v2 = vrot.slane %v7034_v40, %v9888_v43  ;;  %v8905_v59 = vpop.f32.mrb[169].mxu0 }
0x1dbd   : > { %v7037_v3 = vpop.f32.mrb[170].mxu0 }
0x1dbe   : > { %v7233_v7 = vcombine.low %v7224_v16, %v7231_v60  ;;  %v7259_v61 = vrot.slane %v7249_v1, %v9888_v43  ;;  %v7175_v6 = vrot.slane %v7161_v4, %v9888_v43  ;;  %v7176_v22 = vcombine.high %v7168_v2, %v7168_v2  ;;  %v8906_v63 = vpop.f32.mrb[171].mxu0 }
0x1dbf   : > { %v7183_v57 = vrot.slane %v7168_v2, %v9888_v43  ;;  %v8970_v63 = vld [vmem:[%s10755_s16] ss:$8 sps:$4 sm:$0xff]  }
0x1dc0   : > { %v7281_v5 = vcombine.low %v7259_v61, %v7266_v14  ;;  %v7197_v21 = vrot.slane %v7176_v22, %v9888_v43  ;;  %v7247_v17 = vrot.slane %v7233_v7, %v9888_v43  ;;  %v7190_v51 = vrot.slane %v7175_v6, %v9888_v43 }
0x1dc1   : > { %v7198_v28 = vcombine.high %v7183_v57, %v7183_v57  ;;  %v7252_v48 = vcombine.low %v7151_v0, %v7183_v57  ;;  %v8972_v0 = vld [vmem:[%s10755_s16 + $0x4] ss:$8 sps:$4 sm:$0xff]   ;;  %v8973_v57 = vld [vmem:[%s10755_s16 + $0x10] ss:$8 sps:$4 sm:$0xff]  }
0x1dc2   : > { %v7199_v55 = vcombine.high %v7197_v21, %v7197_v21  ;;  %v7248_v47 = vcombine.low %v7240_v62, %v7247_v17  ;;  %v7289_v37 = vrot.slane %v7281_v5, %v9888_v43  ;;  %7533 = vmatprep.subr.bf16.mxu0 %v8972_v0  ;;  %v8978_v5 = vld [vmem:[%s10755_s16 + $0x24] ss:$8 sps:$4 sm:$0xff]   ;;  %v8981_v62 = vld [vmem:[%s10755_s16 + $0x34] ss:$8 sps:$4 sm:$0xff]   ;;  %v8979_v17 = vld [vmem:[%s10755_s16 + $0x30] ss:$8 sps:$4 sm:$0xff]  }
0x1dc3   : > { %v7280_v53 = vrot.slane %v7252_v48, %v9888_v43  ;;  %v7298_v30 = vcombine.low %v7197_v21, %v7198_v28  ;;  %7534 = vmatpush1.bf16.msra.mxu0 %v8970_v63  ;;  %v8976_v21 = vld [vmem:[%s10755_s16 + $0x20] ss:$8 sps:$4 sm:$0xff]  }
0x1dc4   : > { %v7299_v31 = vcombine.low %v7199_v55, %v7190_v51  ;;  %7535 = vmatprep.subr.bf16.mxu0 %v8975_v39 }
0x1dc5   : > { %v7282_v44 = vcombine.low %v7273_v26, %v7280_v53  ;;  %v7306_v46 = vrot.slane %v7298_v30, %v9888_v43 }
0x1dc6   : > { %v7313_v56 = vrot.slane %v7299_v31, %v9888_v43 }
0x1dc7   : > { %v7296_v34 = vrot.slane %v7282_v44, %v9888_v43  ;;  %7536 = vmatpush1.bf16.msra.mxu0 %v8973_v57 }
0x1dc8   : > { %v7314_v33 = vcombine.low %v7306_v46, %v7313_v56  ;;  %7537 = vmatprep.subr.bf16.mxu0 %v8978_v5  ;;  %v8188_v56 = vld [vmem:[%s10753_s14] ss:$0 sm:$0xff] }
0x1dc9   : > { %v7297_v9 = vcombine.low %v7289_v37, %v7296_v34 }
0x1dca   : > { %v7321_v35 = vrot.slane %v7314_v33, %v9888_v43 }
0x1dcb   : > { %v7325_v36 = vpack.c.bf16 %v7297_v9, %v7248_v47  ;;  %7538 = vmatpush1.bf16.msra.mxu0 %v8976_v21 }
0x1dcc   : > { %v7326_v20 = vpack.c.bf16 %v7321_v35, %v7321_v35  ;;  %7539 = vmatprep.subr.bf16.mxu0 %v8981_v62  ;;  %v8189_v35 = vld [vmem:[%s10754_s15] ss:$0 sm:$0xff] }
0x1dcd   : > { %8909 = vmatprep.mubr.msk.bf16.mxu1 %vm845_vm3, %v7325_v36 }
0x1dce   : > { %8910 = vmatmul.mubr.msk.bf16.vlgmr.msra.gmra.mrb[164].mxu1 %vm845_vm3, %v7326_v20 }
0x1dcf   : > { %7540 = vmatpush1.bf16.msra.mxu0 %v8979_v17 }
0x1ea1   : > { %v8911_v11 = vpop.f32.mrb[164].mxu1 }
0x1ea2   : > { %v7392_v24 = vadd.f32 %v8911_v11, %v10449_v58  ;;  %v7376_v10 = vpop.f32.mrb[165].mxu1  ;;  %v9193_v58 = vld [vmem:[#allocation3 + $0x8] sm:$0xff] }
0x1ea3   : > { %v7390_v50 = vadd.f32 %v7376_v10, %v10452_v23  ;;  %v8912_v13 = vpop.f32.mrb[166].mxu1 }
0x1ea4   : > { %v7379_v41 = vpop.f32.mrb[167].mxu1  ;;  %v7402_v19 = vadd.f32 %v8187_v38, %v7392_v24 }
0x1ea5   : > { %v7400_v43 = vadd.f32 %v8187_v38, %v7390_v50  ;;  %v7391_v29 = vadd.f32 %v7379_v41, %v10455_v32  ;;  %v8982_v41 = vld [vmem:[%s10757_s18 + $0x40] sm:$0xff]  }
0x1ea6   : > { %v10536_v8 = vadd.f32 %v9192_v45, %v7402_v19  ;;  %v8983_v19 = vld [vmem:[%s10757_s18] sm:$0xff]   ;;  %8393 = vmatprep.subr.bf16.mxu1 %v8982_v41  ;;  %v8989_v45 = vld [vmem:[%s10757_s18 + $0x18] sm:$0xff]  }
0x1ea7   : > { %v10534_v27 = vadd.f32 %v9191_v15, %v7400_v43  ;;  %v7401_v18 = vadd.f32 %v8187_v38, %v7391_v29  ;;  %8394 = vmatpush3.bf16.msra.mxu1 %v8983_v19  ;;  %v8984_v43 = vld [vmem:[%s10757_s18 + $0x48] sm:$0xff]   ;;  %v8986_v29 = vld [vmem:[%s10757_s18 + $0x50] sm:$0xff]  }
0x1ea8   : > { %v7414_v32 = vsel %vm660_vm1, %v10536_v8, 0.0  ;;  %8395 = vmatprep.subr.bf16.mxu1 %v8984_v43  ;;  %v8987_v15 = vld [vmem:[%s10757_s18 + $0x10] sm:$0xff]  }
0x1ea9   : > { %v10538_v49 = vadd.f32 %v9193_v58, %v7401_v18  ;;  %v7408_v52 = vsel %vm653_vm0, %v10534_v27, 0.0  ;;  %v8988_v18 = vld [vmem:[%s10757_s18 + $0x58] sm:$0xff]   ;;  %v8990_v58 = vld [vmem:[%s10757_s18 + $0x60] sm:$0xff]  }
0x1eaa   : > { %7409 = vadd.xlane.f32.xlu0 %v7408_v52  ;;  %v8991_v52 = vld [vmem:[%s10757_s18 + $0x20] sm:$0xff]  }
0x1eab   : > { %v7411_v23 = vsel %vm653_vm0, %v10538_v49, 0.0 }
0x1eac   : > { %7412 = vadd.xlane.f32.xlu1 %v7411_v23  ;;  %v8992_v23 = vld [vmem:[%s10757_s18 + $0x68] sm:$0xff]  }
0x1eae   : > { %7415 = vadd.xlane.f32.xlu0 %v7414_v32  ;;  %v8993_v32 = vld [vmem:[%s10757_s18 + $0x28] sm:$0xff]  }
0x1f37   : > { %v7410_v54 = vpop.xlane.xlu0 %7409 }
0x1f38   : > { %v7417_v12 = vmul.f32 0.015625, %v7410_v54  ;;  %v8994_v54 = vld [vmem:[%s10757_s18 + $0x70] sm:$0xff]  }
0x1f39   : > { %v7413_v16 = vpop.xlane.xlu1 %7412 }
0x1f3a   : > { %v7420_v40 = vsub.f32 %v10534_v27, %v7417_v12  ;;  %v7418_v60 = vmul.f32 0.015625, %v7413_v16  ;;  %v8995_v12 = vld [vmem:[%s10757_s18 + $0x30] sm:$0xff]   ;;  %v8996_v16 = vld [vmem:[%s10757_s18 + $0x78] sm:$0xff]  }
0x1f3b   : > { %v7416_v1 = vpop.xlane.xlu0 %7415 }
0x1f3c   : > { %v7421_v4 = vsub.f32 %v10538_v49, %v7418_v60  ;;  %v7419_v2 = vmul.f32 0.015625, %v7416_v1  ;;  %v7423_v59 = vmul.f32 %v7420_v40, %v7420_v40  ;;  %v7479_v60 = vsub.s32 0, %v9885_v42  ;;  %v7475_v1 = vld [vmem:[%s10756_s17] sm:$0x3] }
0x1f3e   : > { %v7422_v14 = vsub.f32 %v10536_v8, %v7419_v2  ;;  %v7426_v3 = vsel %vm653_vm0, %v7423_v59, 0.0  ;;  %v7424_v7 = vmul.f32 %v7421_v4, %v7421_v4  ;;  %v7480_v2 = vrot.slane %v7475_v1, %v7479_v60 }
0x1f3f   : > { %7427 = vadd.xlane.f32.xlu0 %v7426_v3 }
0x1f40   : > { %v7425_v61 = vmul.f32 %v7422_v14, %v7422_v14  ;;  %v7429_v22 = vsel %vm653_vm0, %v7424_v7, 0.0 }
0x1f42   : > { %v7432_v6 = vsel %vm660_vm1, %v7425_v61, 0.0 }
0x1f43   : > { %7433 = vadd.xlane.f32.xlu1 %v7432_v6  ;;  %7430 = vadd.xlane.f32.xlu0 %v7429_v22 }
0x1fcc   : > { %v7428_v28 = vpop.xlane.xlu0 %7427 }
0x1fcd   : > { %v7435_v48 = vmul.f32 0.015625, %v7428_v28 }
0x1fcf   : > { %v7438_v51 = vadd.f32 1e-05, %v7435_v48 }
0x1fd0   : > { %v7431_v55 = vpop.xlane.xlu0 %7430  ;;  %v7434_v47 = vpop.xlane.xlu1 %7433 }
0x1fd1   : > { %9154 = vrsqrt.f32 %v7438_v51  ;;  %v7436_v26 = vmul.f32 0.015625, %v7431_v55  ;;  %v7437_v53 = vmul.f32 0.015625, %v7434_v47 }
0x1fd3   : > { %v7439_v30 = vadd.f32 1e-05, %v7436_v26  ;;  %v7440_v31 = vadd.f32 1e-05, %v7437_v53 }
0x1fd5   : > { %9156 = vrsqrt.f32 %v7439_v30 }
0x1fd6   : > { %9158 = vrsqrt.f32 %v7440_v31 }
0x1fdb   : > { %v9155_v44 = vpop.eup %9154 }
0x1fdc   : > { %v7444_v46 = vmul.f32 %v9155_v44, %v7420_v40  ;;  %v8997_v40 = vld [vmem:[%s10757_s18 + $0x38] sm:$0xff]  }
0x1fde   : > { %v7453_v33 = vmul.f32 %v8188_v56, %v7444_v46 }
0x1fdf   : > { %v9157_v37 = vpop.eup %9156 }
0x1fe0   : > { %v9159_v34 = vpop.eup %9158  ;;  %v7445_v9 = vmul.f32 %v9157_v37, %v7421_v4  ;;  %v7462_v11 = vadd.f32 %v8189_v35, %v7453_v33  ;;  %v7483_v4 = vsub.s32 1, %v9885_v42 }
0x1fe1   : > { %v7446_v20 = vmul.f32 %v9159_v34, %v7422_v14 }
0x1fe2   : > { %v7454_v36 = vmul.f32 %v8188_v56, %v7445_v9  ;;  %v7484_v59 = vrot.slane %v7475_v1, %v7483_v4 }
0x1fe3   : > { %v7455_v10 = vmul.f32 %v8188_v56, %v7446_v20 }
0x1fe4   : > { %v7463_v24 = vadd.f32 %v8189_v35, %v7454_v36 }
0x1fe5   : > { %v7464_v50 = vadd.f32 %v8189_v35, %v7455_v10 }
0x1fe6   : > { %v7465_v38 = vpack.c.bf16 %v7463_v24, %v7462_v11 }
0x1fe7   : > { %v7466_v13 = vpack.c.bf16 %v7464_v50, %v7464_v50 }
0x1fe8   : > { %8198 = vmatmul.mubr.msk.bf16.vlgmr.msra.gmra.mrb[172].mxu0 %vm653_vm0, %v7465_v38 }
0x1fe9   : > { %7575 = vmatprep.mubr.bf16.mxu0 %v9202_v25  ;;  %v8985_v25 = vld [vmem:[%s10757_s18 + $0x8] sm:$0xff]  }
0x1fea   : > { %8396 = vmatpush3.bf16.msra.mxu1 %v8985_v25 }
0x1feb   : > { %8397 = vmatprep.subr.bf16.mxu1 %v8986_v29 }
0x1fee   : > { %8398 = vmatpush3.bf16.msra.mxu1 %v8987_v15 }
0x1fef   : > { %8399 = vmatprep.subr.bf16.mxu1 %v8988_v18 }
0x1ff0   : > { %8199 = vmatmul.mubr.msk.bf16.gmra.mrb[176].mxu0 %vm653_vm0, %v7466_v13 }
0x1ff2   : > { %8400 = vmatpush3.bf16.msra.mxu1 %v8989_v45 }
0x1ff3   : > { %8401 = vmatprep.subr.bf16.mxu1 %v8990_v58 }
0x1ff6   : > { %8402 = vmatpush3.bf16.msra.mxu1 %v8991_v52 }
0x1ff7   : > { %8403 = vmatprep.subr.bf16.mxu1 %v8992_v23 }
0x1ffa   : > { %8404 = vmatpush3.bf16.msra.mxu1 %v8993_v32 }
0x1ffb   : > { %8405 = vmatprep.subr.bf16.mxu1 %v8994_v54 }
0x1ffe   : > { %8406 = vmatpush3.bf16.msra.mxu1 %v8995_v12 }
0x1fff   : > { %8407 = vmatprep.subr.bf16.mxu1 %v8996_v16 }
0x2002   : > { %8408 = vmatpush3.bf16.msra.mxu1 %v8997_v40 }
0x20bb   : > { %v7567_v14 = vpop.f32.mrb[172].mxu0 }
0x20bc   : > { %v10638_v3 = vadd.f32 %v7567_v14, %v7480_v2  ;;  %v7569_v7 = vpop.f32.mrb[173].mxu0 }
0x20bd   : > { %v10640_v61 = vadd.f32 %v7569_v7, %v7484_v59  ;;  %v7571_v6 = vpop.f32.mrb[174].mxu0 }
0x20be   : > { %v10643_v22 = vmul.f32 0.70710677, %v10638_v3  ;;  %v10645_v63 = vadd.f32 %v7571_v6, %v7480_v2  ;;  %v7573_v0 = vpop.f32.mrb[175].mxu0 }
0x20bf   : > { %v10648_v39 = vmul.f32 0.70710677, %v10640_v61  ;;  %v10650_v57 = vadd.f32 %v7573_v0, %v7484_v59 }
0x20c0   : > { %v7596_v42 = vand.u32 2147483647, %v10643_v22  ;;  %v10654_v5 = vmul.f32 0.70710677, %v10645_v63  ;;  %vm7716_vm11 = vcmp.ge.f32.partialorder %v10643_v22, 0.0 }
0x20c1   : > { %v7597_v21 = vand.u32 2147483647, %v10648_v39  ;;  %v10658_v62 = vmul.f32 0.70710677, %v10650_v57  ;;  %vm7717_vm12 = vcmp.ge.f32.partialorder %v10648_v39, 0.0 }
0x20c2   : > { %v7602_v17 = vmul.f32 0.3275911, %v7596_v42  ;;  %v7598_v28 = vand.u32 2147483647, %v10654_v5  ;;  %v7680_v36 = vsub.f32 0.0, %v7596_v42  ;;  %vm7718_vm13 = vcmp.ge.f32.partialorder %v10654_v5, 0.0 }
0x20c3   : > { %v7603_v48 = vmul.f32 0.3275911, %v7597_v21  ;;  %v7599_v51 = vand.u32 2147483647, %v10658_v62  ;;  %v7577_v26 = vpop.f32.mrb[176].mxu0  ;;  %v7681_v11 = vsub.f32 0.0, %v7597_v21 }
0x20c4   : > { %v7608_v55 = vadd.f32 1.0, %v7602_v17  ;;  %v7604_v47 = vmul.f32 0.3275911, %v7598_v28  ;;  %v7579_v31 = vpop.f32.mrb[177].mxu0  ;;  %v10662_v34 = vadd.f32 %v7577_v26, %v7480_v2  ;;  %v7686_v13 = vmul.f32 %v7680_v36, %v7596_v42 }
0x20c5   : > { %v7609_v53 = vadd.f32 1.0, %v7603_v48  ;;  %v7605_v30 = vmul.f32 0.3275911, %v7599_v51  ;;  %v7581_v46 = vpop.f32.mrb[178].mxu0  ;;  %v10664_v33 = vadd.f32 %v7579_v31, %v7484_v59  ;;  %v7682_v41 = vsub.f32 0.0, %v7598_v28 }
0x20c6   : > { %9160 = vrcp.f32 %v7608_v55  ;;  %v7610_v44 = vadd.f32 1.0, %v7604_v47  ;;  %v7582_v56 = vpop.f32.mrb[179].mxu0  ;;  %v10667_v9 = vmul.f32 0.70710677, %v10662_v34  ;;  %v7687_v29 = vmul.f32 %v7681_v11, %v7597_v21 }
0x20c7   : > { %9162 = vrcp.f32 %v7609_v53  ;;  %v7611_v37 = vadd.f32 1.0, %v7605_v30  ;;  %v10670_v35 = vmul.f32 0.70710677, %v10664_v33  ;;  %v7683_v45 = vsub.f32 0.0, %v7599_v51 }
0x20c8   : > { %9164 = vrcp.f32 %v7610_v44  ;;  %v7600_v20 = vand.u32 2147483647, %v10667_v9  ;;  %v7692_v23 = vmul.f32 1.442695, %v7686_v13  ;;  %v7688_v54 = vmul.f32 %v7682_v41, %v7598_v28 }
0x20c9   : > { %9166 = vrcp.f32 %v7611_v37  ;;  %v7601_v24 = vand.u32 2147483647, %v10670_v35  ;;  %v7694_v16 = vmul.f32 1.442695, %v7687_v29  ;;  %v7689_v4 = vmul.f32 %v7683_v45, %v7599_v51 }
0x20ca   : > { %v7606_v38 = vmul.f32 0.3275911, %v7600_v20  ;;  %v7684_v2 = vsub.f32 0.0, %v7600_v20  ;;  %v7696_v0 = vmul.f32 1.442695, %v7688_v54  ;;  %vm7719_vm14 = vcmp.ge.f32.partialorder %v10658_v62, 0.0 }
0x20cb   : > { %v7607_v10 = vmul.f32 0.3275911, %v7601_v24  ;;  %v7685_v42 = vsub.f32 0.0, %v7601_v24  ;;  %v7698_v55 = vmul.f32 1.442695, %v7689_v4  ;;  %vm7720_vm15 = vcmp.ge.f32.partialorder %v10667_v9, 0.0 }
0x20cc   : > { %v7612_v19 = vadd.f32 1.0, %v7606_v38  ;;  %v7690_v47 = vmul.f32 %v7684_v2, %v7600_v20  ;;  %vm7721_vm2 = vcmp.ge.f32.partialorder %v10670_v35, 0.0  ;;  %v8200_v35 = vld [vmem:[%s10758_s19] ss:$0 sm:$0xff] }
0x20cd   : > { %v7613_v15 = vadd.f32 1.0, %v7607_v10  ;;  %v7691_v44 = vmul.f32 %v7685_v42, %v7601_v24 }
0x20ce   : > { %9168 = vrcp.f32 %v7612_v19  ;;  %v7700_v20 = vmul.f32 1.442695, %v7690_v47 }
0x20cf   : > { %9170 = vrcp.f32 %v7613_v15  ;;  %v7702_v24 = vmul.f32 1.442695, %v7691_v44 }
0x20d0   : > { %v9161_v50 = vpop.eup %9160  ;;  %9172 = vpow2.f32 %v7692_v23 }
0x20d1   : > { %v9163_v43 = vpop.eup %9162  ;;  %v7626_v25 = vmul.f32 1.0614054, %v9161_v50  ;;  %9174 = vpow2.f32 %v7694_v16 }
0x20d2   : > { %v7627_v18 = vmul.f32 1.0614054, %v9163_v43  ;;  %v10674_v52 = vpop.eup %9164  ;;  %9176 = vpow2.f32 %v7696_v0 }
0x20d3   : > { %v7632_v58 = vadd.f32 -1.4531521, %v7626_v25  ;;  %v7628_v40 = vmul.f32 1.0614054, %v10674_v52  ;;  %v10677_v60 = vpop.eup %9166  ;;  %9178 = vpow2.f32 %v7698_v55 }
0x20d4   : > { %v7633_v32 = vadd.f32 -1.4531521, %v7627_v18  ;;  %v7629_v7 = vmul.f32 1.0614054, %v10677_v60  ;;  %9180 = vpow2.f32 %v7700_v20  ;;  %v7584_v20 = vmul.f32 0.5, %v10638_v3 }
0x20d5   : > { %v7638_v12 = vmul.f32 %v9161_v50, %v7632_v58  ;;  %v7634_v14 = vadd.f32 -1.4531521, %v7628_v40  ;;  %9182 = vpow2.f32 %v7702_v24  ;;  %v7587_v3 = vmul.f32 0.5, %v10650_v57 }
0x20d6   : > { %v7639_v1 = vmul.f32 %v9163_v43, %v7633_v32  ;;  %v7635_v28 = vadd.f32 -1.4531521, %v7629_v7 }
0x20d7   : > { %v7644_v59 = vadd.f32 1.4214138, %v7638_v12  ;;  %v7640_v17 = vmul.f32 %v10674_v52, %v7634_v14 }
0x20d8   : > { %v7645_v6 = vadd.f32 1.4214138, %v7639_v1  ;;  %v7641_v51 = vmul.f32 %v10677_v60, %v7635_v28  ;;  %v10682_v30 = vpop.eup %9168 }
0x20d9   : > { %v7650_v21 = vmul.f32 %v9161_v50, %v7644_v59  ;;  %v7646_v53 = vadd.f32 1.4214138, %v7640_v17  ;;  %v10684_v46 = vpop.eup %9170  ;;  %v7630_v11 = vmul.f32 1.0614054, %v10682_v30 }
0x20da   : > { %v7651_v48 = vmul.f32 %v9163_v43, %v7645_v6  ;;  %v7647_v36 = vadd.f32 1.4214138, %v7641_v51  ;;  %v7631_v10 = vmul.f32 1.0614054, %v10684_v46  ;;  %v9173_v32 = vpop.eup %9172 }
0x20db   : > { %v7656_v26 = vadd.f32 -0.28449672, %v7650_v21  ;;  %v7652_v37 = vmul.f32 %v10674_v52, %v7646_v53  ;;  %v7636_v25 = vadd.f32 -1.4531521, %v7630_v11  ;;  %v9175_v16 = vpop.eup %9174 }
0x20dc   : > { %v7657_v31 = vadd.f32 -0.28449672, %v7651_v48  ;;  %v7653_v19 = vmul.f32 %v10677_v60, %v7647_v36  ;;  %v7637_v15 = vadd.f32 -1.4531521, %v7631_v10  ;;  %v9177_v42 = vpop.eup %9176 }
0x20dd   : > { %v7662_v56 = vmul.f32 %v9161_v50, %v7656_v26  ;;  %v7658_v41 = vadd.f32 -0.28449672, %v7652_v37  ;;  %v7642_v23 = vmul.f32 %v10682_v30, %v7636_v25  ;;  %v9179_v47 = vpop.eup %9178 }
0x20de   : > { %v7663_v38 = vmul.f32 %v9163_v43, %v7657_v31  ;;  %v7659_v58 = vadd.f32 -0.28449672, %v7653_v19  ;;  %v7643_v12 = vmul.f32 %v10684_v46, %v7637_v15 }
0x20df   : > { %v7668_v13 = vadd.f32 0.2548296, %v7662_v56  ;;  %v7664_v45 = vmul.f32 %v10674_v52, %v7658_v41  ;;  %v7648_v2 = vadd.f32 1.4214138, %v7642_v23 }
0x20e0   : > { %v7669_v29 = vadd.f32 0.2548296, %v7663_v38  ;;  %v7665_v4 = vmul.f32 %v10677_v60, %v7659_v58  ;;  %v7649_v14 = vadd.f32 1.4214138, %v7643_v12 }
0x20e1   : > { %v7674_v18 = vmul.f32 %v9161_v50, %v7668_v13  ;;  %v7670_v1 = vadd.f32 0.2548296, %v7664_v45  ;;  %v7654_v0 = vmul.f32 %v10682_v30, %v7648_v2  ;;  %v7586_v13 = vmul.f32 0.5, %v10645_v63 }
0x20e2   : > { %v7675_v54 = vmul.f32 %v9163_v43, %v7669_v29  ;;  %v7671_v6 = vadd.f32 0.2548296, %v7665_v4  ;;  %v7655_v21 = vmul.f32 %v10684_v46, %v7649_v14  ;;  %v7588_v2 = vmul.f32 0.5, %v10662_v34 }
0x20e3   : > { %v7704_v40 = vmul.f32 %v9173_v32, %v7674_v18  ;;  %v7676_v7 = vmul.f32 %v10674_v52, %v7670_v1  ;;  %v7660_v55 = vadd.f32 -0.28449672, %v7654_v0  ;;  %v7585_v18 = vmul.f32 0.5, %v10640_v61 }
0x20e4   : > { %v7705_v59 = vmul.f32 %v9175_v16, %v7675_v54  ;;  %v7677_v48 = vmul.f32 %v10677_v60, %v7671_v6  ;;  %v7661_v53 = vadd.f32 -0.28449672, %v7655_v21  ;;  %v9181_v60 = vpop.eup %9180 }
0x20e5   : > { %v7710_v50 = vsub.f32 1.0, %v7704_v40  ;;  %v7706_v28 = vmul.f32 %v9177_v42, %v7676_v7  ;;  %v7666_v44 = vmul.f32 %v10682_v30, %v7660_v55  ;;  %v9183_v39 = vpop.eup %9182 }
0x20e6   : > { %v7711_v43 = vsub.f32 1.0, %v7705_v59  ;;  %v7707_v52 = vmul.f32 %v9179_v47, %v7677_v48  ;;  %v7667_v56 = vmul.f32 %v10684_v46, %v7661_v53  ;;  %v7589_v59 = vmul.f32 0.5, %v10664_v33 }
0x20e7   : > { %v7722_v17 = vsub.f32 0.0, %v7710_v50  ;;  %v7712_v31 = vsub.f32 1.0, %v7706_v28  ;;  %v7672_v38 = vadd.f32 0.2548296, %v7666_v44 }
0x20e8   : > { %v7723_v26 = vsub.f32 0.0, %v7711_v43  ;;  %v7713_v11 = vsub.f32 1.0, %v7707_v52  ;;  %v7673_v22 = vadd.f32 0.2548296, %v7667_v56 }
0x20e9   : > { %v7728_v51 = vsel %vm7716_vm11, %v7710_v50, %v7722_v17  ;;  %v7724_v36 = vsub.f32 0.0, %v7712_v31  ;;  %v7678_v25 = vmul.f32 %v10682_v30, %v7672_v38 }
0x20ea   : > { %v7729_v37 = vsel %vm7717_vm12, %v7711_v43, %v7723_v26  ;;  %v7734_v10 = vadd.f32 1.0, %v7728_v51  ;;  %v7725_v19 = vsub.f32 0.0, %v7713_v11  ;;  %v7679_v15 = vmul.f32 %v10684_v46, %v7673_v22 }
0x20eb   : > { %v7730_v41 = vsel %vm7718_vm13, %v7712_v31, %v7724_v36  ;;  %v7735_v29 = vadd.f32 1.0, %v7729_v37  ;;  %v7708_v5 = vmul.f32 %v9181_v60, %v7678_v25 }
0x20ec   : > { %v7736_v24 = vadd.f32 1.0, %v7730_v41  ;;  %v7731_v45 = vsel %vm7719_vm14, %v7713_v11, %v7725_v19  ;;  %v7740_v58 = vmul.f32 %v7734_v10, %v7584_v20  ;;  %v7709_v32 = vmul.f32 %v9183_v39, %v7679_v15 }
0x20ed   : > { %v7737_v63 = vadd.f32 1.0, %v7731_v45  ;;  %v7714_v54 = vsub.f32 1.0, %v7708_v5  ;;  %v7741_v12 = vmul.f32 %v7735_v29, %v7585_v18 }
0x20ee   : > { %v7742_v23 = vmul.f32 %v7736_v24, %v7586_v13  ;;  %v7715_v40 = vsub.f32 1.0, %v7709_v32 }
0x20ef   : > { %v7743_v16 = vmul.f32 %v7737_v63, %v7587_v3  ;;  %v7726_v1 = vsub.f32 0.0, %v7714_v54 }
0x20f0   : > { %v7746_v30 = vpack.c.bf16 %v7742_v23, %v7740_v58  ;;  %v7727_v46 = vsub.f32 0.0, %v7715_v40 }
0x20f1   : > { %v7747_v62 = vpack.c.bf16 %v7743_v16, %v7741_v12  ;;  %v7732_v61 = vsel %vm7720_vm15, %v7714_v54, %v7726_v1 }
0x20f2   : > { %v7733_v57 = vsel %vm7721_vm2, %v7715_v40, %v7727_v46  ;;  %v7738_v4 = vadd.f32 1.0, %v7732_v61 }
0x20f3   : > { %7917 = vmatprep.mubr.bf16.mxu1 %v7747_v62  ;;  %v7739_v14 = vadd.f32 1.0, %v7733_v57 }
0x20f4   : > { %7918 = vmatmul.mubr.bf16.vlgmr.msra.gmra.mrb[168].mxu1 %v7746_v30  ;;  %v7744_v7 = vmul.f32 %v7738_v4, %v7588_v2 }
0x20f5   : > { %v7745_v50 = vmul.f32 %v7739_v14, %v7589_v59 }
0x20f6   : > { %v7748_v0 = vpack.c.bf16 %v7744_v7, %v7744_v7 }
0x20f7   : > { %v7749_v6 = vpack.c.bf16 %v7745_v50, %v7745_v50 }
0x20f9   : > { %7925 = vmatprep.mubr.bf16.mxu1 %v7749_v6 }
0x20fc   : > { %7926 = vmatmul.mubr.bf16.gmra.mrb[172].mxu1 %v7748_v0 }
0x21c7   : > { %v8409_v9 = vpop.f32.mrb[168].mxu1 }
0x21c8   : > { %v8410_v42 = vpop.f32.mrb[169].mxu1 }
0x21c9   : > { %v8411_v43 = vadd.f32 %v8410_v42, %v8409_v9  ;;  %v8412_v21 = vpop.f32.mrb[170].mxu1 }
0x21ca   : > { %v8413_v17 = vpop.f32.mrb[171].mxu1 }
0x21cb   : > { %v7920_v34 = vadd.f32 %v8411_v43, %v8200_v35  ;;  %v8414_v28 = vadd.f32 %v8413_v17, %v8412_v21 }
0x21cd   : > { %v7933_v33 = vadd.f32 %v7920_v34, %v10534_v27  ;;  %v7923_v48 = vadd.f32 %v8414_v28, %v8200_v35 }
0x21cf   : > { %7936 = vst.msk [vmem:[#allocation2] sm:$0xff] %vm653_vm0, %v7933_v33  ;;  %v7934_v55 = vadd.f32 %v7923_v48, %v10538_v49  ;;  %v8415_v47 = vpop.f32.mrb[172].mxu1 }
0x21d0   : > { %v8416_v26 = vpop.f32.mrb[173].mxu1 }
0x21d1   : > { %7937 = vst.msk [vmem:[#allocation2 + $0x8] sm:$0xff] %vm653_vm0, %v7934_v55  ;;  %v8417_v53 = vadd.f32 %v8416_v26, %v8415_v47  ;;  %v8418_v51 = vpop.f32.mrb[174].mxu1 }
0x21d2   : > { %v8419_v31 = vpop.f32.mrb[175].mxu1 }
0x21d3   : > { %v7928_v52 = vadd.f32 %v8417_v53, %v8200_v35 }
0x21d5   : > { %v7935_v44 = vadd.f32 %v7928_v52, %v10536_v8 }
0x21d7   : > { %7938 = vst.msk [vmem:[#allocation2 + $0x10] sm:$0xf] %vm660_vm1, %v7935_v44 }
0x21d8   : > { %v7939_v56 = vld [vmem:[#allocation2] ss:$5 sm:$0xf] }
0x21d9   : > { %7940 = vst.msk [vmem:[#allocation3] sm:$0xf] %vm660_vm1, %v7939_v56 }
0x21de   : > { %v7941_v27 = vld [vmem:[#allocation2 + $0x1] ss:$5 sm:$0xf]  ;;  %v7943_v37 = vld [vmem:[#allocation2 + $0x2] ss:$5 sm:$0xf] }
0x21df   : > { %7942 = vst.msk [vmem:[#allocation3 + $0x4] sm:$0xf] %vm660_vm1, %v7941_v27  ;;  %7944 = vst.msk [vmem:[#allocation3 + $0x8] sm:$0xf] %vm660_vm1, %v7943_v37 }
0x21e0   : > { %v7945_v49 = vld [vmem:[#allocation2 + $0x3] ss:$5 sm:$0xf]  ;;  %v7948_v36 = vld [vmem:[#allocation2 + $0x4] ss:$5 sm:$0xf] }
0x21e1   : > { %7946 = vst.msk [vmem:[#allocation3 + $0xc] sm:$0xf] %vm660_vm1, %v7945_v49  ;;  %7949 = vst.msk [vmem:[#allocation3 + $0x10] sm:$0xf] %vm660_vm1, %v7948_v36 }
0x21e6   : > { %v7950_v8 = vld [vmem:[#allocation3] sm:$0xff] }
0x21e7   : > { %7953 = vst.msk [vmem:[%s646_s23] sm:$0xff] %vm653_vm0, %v7950_v8 }
0x21e8   : > { %v7951_v11 = vld [vmem:[#allocation3 + $0x8] sm:$0xff]  ;;  %v7952_v38 = vld [vmem:[#allocation3 + $0x10] sm:$0xf] }
0x21e9   : > { %7954 = vst.msk [vmem:[%s646_s23 + $0x8] sm:$0xff] %vm653_vm0, %v7951_v11 }
0x21ea   : > { %7955 = vst.msk [vmem:[%s646_s23 + $0x10] sm:$0xf] %vm660_vm1, %v7952_v38 }
0x21eb PF: > { %s30_s1 = sadd.s32 1, %s9200_s1  }
0x21ec   : > { %p27_p4 = scmp.ge.s32.totalorder %s30_s1, 4  }
0x21ee   :  { %29 = sbr.rel (!%p27_p4) target bundleno = 6 (0x6), region = 143 }

</bundles_post_ra>
